<compile_context>
chip_gen: v7x
topology: tpu7x:2x2x1
jax: 0.10.0
libtpu: 0.0.40
codegen_flags: <defaults>
</compile_context>

<pallas_src>
import functools

import numpy as np

import jax
import jax.numpy as jnp
from jax.experimental import pallas as pl
from jax.experimental.pallas import tpu as pltpu


def _res_lstm_kernel(x_ref, hx0_ref, cx0_ref, wx_ref, wh_ref, wc_ref, bx_ref,
                     bh_ref, y_ref, hy_ref, cy_ref, hx_s, cx_s, xg_s, *,
                     hidden_size, time_chunk, input_eq_hidden, unroll):
    H = hidden_size
    TT = time_chunk
    Bb = x_ref.shape[1]
    I = x_ref.shape[2]
    NX = xg_s.shape[-1]           # 3H (ifo) or 4H (ifo + residual projection)

    t_blk = pl.program_id(1)      # time-chunk index (innermost grid axis)

    # Load the initial state into the persistent VMEM carry at the first chunk
    # (re-initialized for every batch block since t_blk restarts at 0).
    @pl.when(t_blk == 0)
    def _():
        hx_s[...] = hx0_ref[...]
        cx_s[...] = cx0_ref[...]

    # ---- chunk-level x precompute: one large, pipeline-friendly MXU push ----
    # xg cols 0:3H  = x @ [Wii^T]  (+ summed ifo biases, folded in once)
    # xg cols 3H:4H = x @ Wir^T    (residual projection; only when I != H)
    x2d = x_ref[...].reshape(TT * Bb, I)
    xg = jnp.dot(x2d.astype(wx_ref.dtype), wx_ref[...],
                 preferred_element_type=jnp.float32)
    xg = xg + bx_ref[...]                       # residual cols get +0
    xg_s[...] = xg.reshape(TT, Bb, NX)

    # Hoist loop-invariant loads / broadcasts out of the timestep loop.
    wh = wh_ref[...]                            # (H, 4H): [Wih^T | Whh^T]
    wc = wc_ref[...]                            # (H, 3H): Wic^T
    bh = jnp.broadcast_to(bh_ref[...], (Bb, H))  # cellgate bias b_hh

    def step(tt, carry):
        hx, cx = carry
        xg_t = xg_s[tt]                                             # (Bb, NX)
        rec_h = jnp.dot(hx.astype(wh.dtype), wh,
                        preferred_element_type=jnp.float32)         # (Bb, 4H)
        rec_c = jnp.dot(cx.astype(wc.dtype), wc,
                        preferred_element_type=jnp.float32)         # (Bb, 3H)

        ifo = xg_t[:, 0:3 * H] + rec_h[:, 0:3 * H] + rec_c
        ingate = jax.nn.sigmoid(ifo[:, 0:H])
        forgetgate = jax.nn.sigmoid(ifo[:, H:2 * H])
        outgate = jax.nn.sigmoid(ifo[:, 2 * H:3 * H])
        cellgate = jnp.tanh(rec_h[:, 3 * H:4 * H] + bh)

        cy = forgetgate * cx + ingate * cellgate
        ry = jnp.tanh(cy)
        res = x_ref[tt] if input_eq_hidden else xg_t[:, 3 * H:4 * H]
        hy = outgate * (ry + res)

        y_ref[tt] = hy.astype(y_ref.dtype)
        return hy, cy

    hx, cx = jax.lax.fori_loop(0, TT, step, (hx_s[...], cx_s[...]),
                               unroll=unroll)

    # Carry the state to the next time chunk.
    hx_s[...] = hx
    cx_s[...] = cx

    # Emit the final state only once, on the last time chunk.
    @pl.when(t_blk == pl.num_programs(1) - 1)
    def _():
        hy_ref[...] = hx.astype(hy_ref.dtype)
        cy_ref[...] = cx.astype(cy_ref.dtype)


def res_lstm_layer(x, hidden, params, *, time_chunk=None, batch_block=None,
                   weight_dtype=jnp.bfloat16, unroll=None):
    """Pallas forward of ResLSTMLayer.

    x:      (T, B, input_size) float32
    hidden: tuple (hx, cx), each (1, B, H)  (leading axis squeezed like torch)
    params: dict of parameters with PyTorch shapes.
    Returns: (y, (hy, cy)) with y: (T,B,H), hy/cy: (B,H)
    """
    T, B, I = x.shape
    hx0 = hidden[0].reshape(hidden[0].shape[-2], hidden[0].shape[-1])  # squeeze
    cx0 = hidden[1].reshape(hidden[1].shape[-2], hidden[1].shape[-1])
    H = hx0.shape[-1]
    input_eq_hidden = (I == H)
    NX = (3 if input_eq_hidden else 4) * H

    # ---- batch blocking: only worthwhile on v7x (2 TensorCores / chip) ------
    if batch_block is None:
        Bb = B
        try:
            kind = jax.devices()[0].device_kind.lower()
        except Exception:  # pragma: no cover
            kind = ""
        if "v7" in kind and B % 2 == 0 and (B // 2) % 8 == 0:
            Bb = B // 2
    else:
        Bb = batch_block
    assert B % Bb == 0, "batch_block must divide B"
    if Bb != B:
        assert Bb % 8 == 0, "batch_block must be a multiple of 8 sublanes (f32)"
    nb = B // Bb

    # ---- fused weight / bias prep (plain JAX glue; bias math stays f32) -----
    f32 = jnp.float32
    w_ii_t = params["weight_ii"].T.astype(f32)        # (I, 3H)
    w_ih_t = params["weight_ih"].T.astype(f32)        # (H, 3H)
    w_ic_t = params["weight_ic"].T.astype(f32)        # (H, 3H)
    w_hh_t = params["weight_hh"].T.astype(f32)        # (H, H)

    wh = jnp.concatenate([w_ih_t, w_hh_t], axis=1).astype(weight_dtype)  # (H,4H)
    wc = w_ic_t.astype(weight_dtype)                                     # (H,3H)
    b_ifo = (params["bias_ii"] + params["bias_ih"]
             + params["bias_ic"]).astype(f32)
    if input_eq_hidden:
        wx = w_ii_t.astype(weight_dtype)                                 # (I,3H)
        bx = b_ifo.reshape(1, NX)
    else:
        w_ir_t = params["weight_ir"].T.astype(f32)                       # (I, H)
        wx = jnp.concatenate([w_ii_t, w_ir_t], axis=1).astype(weight_dtype)
        bx = jnp.concatenate([b_ifo, jnp.zeros((H,), f32)]).reshape(1, NX)
    bh = params["bias_hh"].astype(f32).reshape(1, H)

    w_item = np.dtype(weight_dtype).itemsize
    weight_bytes = (wx.size + wh.size + wc.size) * w_item + (bx.size + bh.size) * 4

    # ---- time-chunk selection from the VMEM budget ---------------------------
    # Budget uses the smallest physical VMEM across generations (v7x: 64 MiB).
    budget = int(0.7 * (64 << 20))
    if time_chunk is None:
        TT = 1
        for d in range(1, min(T, 64) + 1):
            if T % d:
                continue
            chunk_bytes = 4 * d * Bb * (2 * I + 2 * H + NX)  # 2x x, 2x y, xg
            if weight_bytes * 2 + chunk_bytes + 4 * Bb * 8 * H <= budget:
                TT = d
    else:
        TT = time_chunk
    assert T % TT == 0, "time_chunk must divide T"

    chunk_bytes = 4 * TT * Bb * (2 * I + 2 * H + NX)
    need = weight_bytes * 2 + chunk_bytes + 4 * Bb * 8 * H + (2 << 20)
    vmem_limit = int(min(64 << 20, max(32 << 20, need)))

    if unroll is None:
        unroll = True if TT <= 8 else 4   # partial unroll avoids vreg spills

    kernel = functools.partial(_res_lstm_kernel, hidden_size=H, time_chunk=TT,
                               input_eq_hidden=input_eq_hidden, unroll=unroll)

    def build(single_buffer_weights):
        if single_buffer_weights:
            # Grid-invariant blocks: single-buffer them (no double-buffer copy).
            inv = lambda shape: pl.BlockSpec(shape, lambda b, t: (0, 0),
                                             pipeline_mode=pl.Buffered(1))
        else:
            inv = lambda shape: pl.BlockSpec(shape, lambda b, t: (0, 0))

        in_specs = [
            pl.BlockSpec((TT, Bb, I), lambda b, t: (t, b, 0)),   # x time-chunk
            pl.BlockSpec((Bb, H), lambda b, t: (b, 0)),          # hx0
            pl.BlockSpec((Bb, H), lambda b, t: (b, 0)),          # cx0
            inv((I, NX)),                                        # Wx (+ Wir)
            inv((H, 4 * H)),                                     # Wh  [ih|hh]
            inv((H, 3 * H)),                                     # Wc  (ic)
            inv((1, NX)),                                        # summed ifo bias
            inv((1, H)),                                         # b_hh
        ]
        out_specs = [
            pl.BlockSpec((TT, Bb, H), lambda b, t: (t, b, 0)),   # y time-chunk
            pl.BlockSpec((Bb, H), lambda b, t: (b, 0)),          # final hy
            pl.BlockSpec((Bb, H), lambda b, t: (b, 0)),          # final cy
        ]
        grid_spec = pltpu.PrefetchScalarGridSpec(
            num_scalar_prefetch=0,
            grid=(nb, T // TT),
            in_specs=in_specs,
            out_specs=out_specs,
            scratch_shapes=[pltpu.VMEM((Bb, H), jnp.float32),        # hx carry
                            pltpu.VMEM((Bb, H), jnp.float32),        # cx carry
                            pltpu.VMEM((TT, Bb, NX), jnp.float32)])  # xg chunk
        return pl.pallas_call(
            kernel,
            grid_spec=grid_spec,
            out_shape=(
                jax.ShapeDtypeStruct((T, B, H), jnp.float32),
                jax.ShapeDtypeStruct((B, H), jnp.float32),
                jax.ShapeDtypeStruct((B, H), jnp.float32),
            ),
            compiler_params=pltpu.CompilerParams(
                # batch blocks are independent ("parallel", megacore/v7x);
                # the time axis is the serial recurrence carried in scratch.
                dimension_semantics=("parallel", "arbitrary"),
                vmem_limit_bytes=vmem_limit),
        )

    args = (x, hx0, cx0, wx, wh, wc, bx, bh)
    try:
        y, hy, cy = build(True)(*args)
    except Exception:
        # Fallback if this jax version rejects pipeline_mode=pl.Buffered(1).
        y, hy, cy = build(False)(*args)
    return y, (hy, cy)


def _reference(x, hidden, params):
    """Pure-JAX reference mirroring the PyTorch module exactly."""
    hx = hidden[0][0]
    cx = hidden[1][0]
    H = hx.shape[-1]
    input_size = x.shape[-1]
    outs = []
    for t in range(x.shape[0]):
        xt = x[t]
        ifo = (xt @ params["weight_ii"].T + params["bias_ii"]
               + hx @ params["weight_ih"].T + params["bias_ih"]
               + cx @ params["weight_ic"].T + params["bias_ic"])
        i, f, o = jnp.split(ifo, 3, axis=1)
        c = jnp.tanh(hx @ params["weight_hh"].T + params["bias_hh"])
        i = jax.nn.sigmoid(i)
        f = jax.nn.sigmoid(f)
        o = jax.nn.sigmoid(o)
        cy = f * cx + i * c
        ry = jnp.tanh(cy)
        if input_size == H:
            hy = o * (ry + xt)
        else:
            hy = o * (ry + xt @ params["weight_ir"].T)
        outs.append(hy)
        hx, cx = hy, cy
    return jnp.stack(outs), (hx, cx)


def _make_params(key, input_size, hidden_size, scale=0.25):
    ks = jax.random.split(key, 9)
    return {
        "weight_ii": scale * jax.random.normal(ks[0], (3 * hidden_size, input_size), jnp.float32),
        "weight_ic": scale * jax.random.normal(ks[1], (3 * hidden_size, hidden_size), jnp.float32),
        "weight_ih": scale * jax.random.normal(ks[2], (3 * hidden_size, hidden_size), jnp.float32),
        "bias_ii":   scale * jax.random.normal(ks[3], (3 * hidden_size,), jnp.float32),
        "bias_ic":   scale * jax.random.normal(ks[4], (3 * hidden_size,), jnp.float32),
        "bias_ih":   scale * jax.random.normal(ks[5], (3 * hidden_size,), jnp.float32),
        "weight_hh": scale * jax.random.normal(ks[6], (hidden_size, hidden_size), jnp.float32),
        "bias_hh":   scale * jax.random.normal(ks[7], (hidden_size,), jnp.float32),
        "weight_ir": scale * jax.random.normal(ks[8], (hidden_size, input_size), jnp.float32),
    }


if __name__ == "__main__":
    key = jax.random.PRNGKey(0)
    T, B, H = 8, 8, 32

    # Tolerances: the jnp reference uses XLA's default (reduced-precision) f32
    # matmul path on TPU while the kernel's MXU matmuls may be exact f32, so the
    # "f32" comparison allows a few 1e-2; bf16 weights get a loose sanity check.
    TOL32 = dict(rtol=5e-2, atol=5e-2)
    TOL16 = dict(rtol=0.3, atol=0.3)

    for input_size in (16, 32):   # 32 == H also exercises the identity-residual path
        kp, kx, kh, kc, key = jax.random.split(key, 5)
        params = _make_params(kp, input_size, H)
        x = jax.random.normal(kx, (T, B, input_size), jnp.float32)
        hx0 = jax.random.normal(kh, (1, B, H), jnp.float32)
        cx0 = jax.random.normal(kc, (1, B, H), jnp.float32)

        y_ref, (hy_ref, cy_ref) = _reference(x, (hx0, cx0), params)

        # f32 weights, single time chunk (TT == T).
        y, (hy, cy) = res_lstm_layer(x, (hx0, cx0), params,
                                     weight_dtype=jnp.float32)
        jax.block_until_ready((y, hy, cy))
        assert jnp.allclose(y, y_ref, **TOL32)
        assert jnp.allclose(hy, hy_ref, **TOL32)
        assert jnp.allclose(cy, cy_ref, **TOL32)

        # f32 weights, multiple time chunks + partial unroll (exercises the
        # cross-chunk state carry and the last-chunk final-state write).
        y2, (hy2, cy2) = res_lstm_layer(x, (hx0, cx0), params,
                                        weight_dtype=jnp.float32,
                                        time_chunk=4, unroll=2)
        jax.block_until_ready((y2, hy2, cy2))
        assert jnp.allclose(y2, y_ref, **TOL32)
        assert jnp.allclose(hy2, hy_ref, **TOL32)
        assert jnp.allclose(cy2, cy_ref, **TOL32)

        # Default path (bf16 weights): loose sanity check, all outputs asserted.
        y16, (hy16, cy16) = res_lstm_layer(x, (hx0, cx0), params)
        jax.block_until_ready((y16, hy16, cy16))
        assert jnp.allclose(y16, y_ref, **TOL16)
        assert jnp.allclose(hy16, hy_ref, **TOL16)
        assert jnp.allclose(cy16, cy_ref, **TOL16)

    print("KERNEL_OK")
</pallas_src>

<mosaic_0001>
module attributes {stable_mosaic.version = 11 : i64} {
  func.func @_res_lstm_kernel(%arg0: i32, %arg1: i32, %arg2: memref<8x8x16xf32, #tpu.memory_space<vmem>>, %arg3: memref<8x32xf32, #tpu.memory_space<vmem>>, %arg4: memref<8x32xf32, #tpu.memory_space<vmem>>, %arg5: memref<16x128xf32, #tpu.memory_space<vmem>>, %arg6: memref<32x128xf32, #tpu.memory_space<vmem>>, %arg7: memref<32x96xf32, #tpu.memory_space<vmem>>, %arg8: memref<1x128xf32, #tpu.memory_space<vmem>>, %arg9: memref<1x32xf32, #tpu.memory_space<vmem>>, %arg10: memref<8x8x32xf32, #tpu.memory_space<vmem>>, %arg11: memref<8x32xf32, #tpu.memory_space<vmem>>, %arg12: memref<8x32xf32, #tpu.memory_space<vmem>>, %arg13: memref<8x32xf32, #tpu.memory_space<vmem>>, %arg14: memref<8x32xf32, #tpu.memory_space<vmem>>, %arg15: memref<8x8x128xf32, #tpu.memory_space<vmem>>) attributes {dimension_semantics = [#tpu.dimension_semantics<parallel>, #tpu.dimension_semantics<arbitrary>], iteration_bounds = array<i64: 1, 1>, scalar_prefetch = 0 : i64, scratch_operands = 3 : i64, tpu.core_type = #tpu.core_type<tc>, window_params = [{transform_indices = @transform_0, window_bounds = array<i64: 8, 8, 16>}, {transform_indices = @transform_1, window_bounds = array<i64: 8, 32>}, {transform_indices = @transform_2, window_bounds = array<i64: 8, 32>}, {pipeline_mode = #tpu.pipeline_mode<synchronous>, transform_indices = @transform_3, window_bounds = array<i64: 16, 128>}, {pipeline_mode = #tpu.pipeline_mode<synchronous>, transform_indices = @transform_4, window_bounds = array<i64: 32, 128>}, {pipeline_mode = #tpu.pipeline_mode<synchronous>, transform_indices = @transform_5, window_bounds = array<i64: 32, 96>}, {pipeline_mode = #tpu.pipeline_mode<synchronous>, transform_indices = @transform_6, window_bounds = array<i64: 1, 128>}, {pipeline_mode = #tpu.pipeline_mode<synchronous>, transform_indices = @transform_7, window_bounds = array<i64: 1, 32>}, {transform_indices = @transform_8, window_bounds = array<i64: 8, 8, 32>}, {transform_indices = @transform_9, window_bounds = array<i64: 8, 32>}, {transform_indices = @transform_10, window_bounds = array<i64: 8, 32>}]} {
    %c0_i32 = arith.constant 0 : i32
    %0 = arith.cmpi eq, %arg1, %c0_i32 : i32
    %1 = arith.extui %0 : i1 to i32
    %c0_i32_0 = arith.constant 0 : i32
    %2 = arith.cmpi ne, %1, %c0_i32_0 : i32
    scf.if %2 {
      %c0_99 = arith.constant 0 : index
      %c0_100 = arith.constant 0 : index
      %352 = vector.load %arg3[%c0_99, %c0_100] : memref<8x32xf32, #tpu.memory_space<vmem>>, vector<8x32xf32>
      %c0_101 = arith.constant 0 : index
      %c0_102 = arith.constant 0 : index
      %353 = vector.load %arg13[%c0_101, %c0_102] : memref<8x32xf32, #tpu.memory_space<vmem>>, vector<8x32xf32>
      tpu.vector_store %arg13[%c0_101, %c0_102], %352 {strides = array<i32>} : memref<8x32xf32, #tpu.memory_space<vmem>>, vector<8x32xf32>,
      %c0_103 = arith.constant 0 : index
      %c0_104 = arith.constant 0 : index
      %354 = vector.load %arg4[%c0_103, %c0_104] : memref<8x32xf32, #tpu.memory_space<vmem>>, vector<8x32xf32>
      %c0_105 = arith.constant 0 : index
      %c0_106 = arith.constant 0 : index
      %355 = vector.load %arg14[%c0_105, %c0_106] : memref<8x32xf32, #tpu.memory_space<vmem>>, vector<8x32xf32>
      tpu.vector_store %arg14[%c0_105, %c0_106], %354 {strides = array<i32>} : memref<8x32xf32, #tpu.memory_space<vmem>>, vector<8x32xf32>,
    } else {
    }
    %c0 = arith.constant 0 : index
    %c0_1 = arith.constant 0 : index
    %c0_2 = arith.constant 0 : index
    %3 = vector.load %arg2[%c0, %c0_1, %c0_2] : memref<8x8x16xf32, #tpu.memory_space<vmem>>, vector<8x8x16xf32>
    %4 = vector.shape_cast %3 : vector<8x8x16xf32> to vector<64x16xf32>
    %c0_3 = arith.constant 0 : index
    %c0_4 = arith.constant 0 : index
    %5 = vector.load %arg5[%c0_3, %c0_4] : memref<16x128xf32, #tpu.memory_space<vmem>>, vector<16x128xf32>
    %cst = arith.constant dense<0.000000e+00> : vector<64x128xf32>
    %6 = tpu.matmul %4, %5, %cst {dimension_numbers = #tpu.dot_dimension_numbers<[1], [0], [0], [1], [0, 0, 1, 1], [], []>} : vector<64x16xf32>, vector<16x128xf32>, vector<64x128xf32> -> vector<64x128xf32>
    %c0_5 = arith.constant 0 : index
    %c0_6 = arith.constant 0 : index
    %7 = vector.load %arg8[%c0_5, %c0_6] : memref<1x128xf32, #tpu.memory_space<vmem>>, vector<1x128xf32>
    %8 = vector.broadcast %7 : vector<1x128xf32> to vector<64x128xf32>
    %9 = arith.addf %6, %8 : vector<64x128xf32>
    %10 = vector.shape_cast %9 : vector<64x128xf32> to vector<8x8x128xf32>
    %c0_7 = arith.constant 0 : index
    %c0_8 = arith.constant 0 : index
    %c0_9 = arith.constant 0 : index
    %11 = vector.load %arg15[%c0_7, %c0_8, %c0_9] : memref<8x8x128xf32, #tpu.memory_space<vmem>>, vector<8x8x128xf32>
    tpu.vector_store %arg15[%c0_7, %c0_8, %c0_9], %10 {strides = array<i32>} : memref<8x8x128xf32, #tpu.memory_space<vmem>>, vector<8x8x128xf32>,
    %c0_10 = arith.constant 0 : index
    %c0_11 = arith.constant 0 : index
    %12 = vector.load %arg6[%c0_10, %c0_11] : memref<32x128xf32, #tpu.memory_space<vmem>>, vector<32x128xf32>
    %c0_12 = arith.constant 0 : index
    %c0_13 = arith.constant 0 : index
    %13 = vector.load %arg7[%c0_12, %c0_13] : memref<32x96xf32, #tpu.memory_space<vmem>>, vector<32x96xf32>
    %c0_14 = arith.constant 0 : index
    %c0_15 = arith.constant 0 : index
    %14 = vector.load %arg9[%c0_14, %c0_15] : memref<1x32xf32, #tpu.memory_space<vmem>>, vector<1x32xf32>
    %15 = vector.shape_cast %14 : vector<1x32xf32> to vector<1x32xf32>
    %16 = vector.broadcast %15 : vector<1x32xf32> to vector<8x32xf32>
    %c0_16 = arith.constant 0 : index
    %c0_17 = arith.constant 0 : index
    %17 = vector.load %arg13[%c0_16, %c0_17] : memref<8x32xf32, #tpu.memory_space<vmem>>, vector<8x32xf32>
    %c0_18 = arith.constant 0 : index
    %c0_19 = arith.constant 0 : index
    %18 = vector.load %arg14[%c0_18, %c0_19] : memref<8x32xf32, #tpu.memory_space<vmem>>, vector<8x32xf32>
    %c0_i32_20 = arith.constant 0 : i32
    %19 = arith.index_cast %c0_i32_20 : i32 to index
    %c0_21 = arith.constant 0 : index
    %c0_22 = arith.constant 0 : index
    %20 = vector.load %arg15[%19, %c0_21, %c0_22] : memref<8x8x128xf32, #tpu.memory_space<vmem>>, vector<1x8x128xf32>
    %21 = vector.shape_cast %20 : vector<1x8x128xf32> to vector<8x128xf32>
    %cst_23 = arith.constant dense<0.000000e+00> : vector<8x128xf32>
    %22 = tpu.matmul %17, %12, %cst_23 {dimension_numbers = #tpu.dot_dimension_numbers<[1], [0], [0], [1], [0, 0, 1, 1], [], []>} : vector<8x32xf32>, vector<32x128xf32>, vector<8x128xf32> -> vector<8x128xf32>
    %cst_24 = arith.constant dense<0.000000e+00> : vector<8x96xf32>
    %23 = tpu.matmul %18, %13, %cst_24 {dimension_numbers = #tpu.dot_dimension_numbers<[1], [0], [0], [1], [0, 0, 1, 1], [], []>} : vector<8x32xf32>, vector<32x96xf32>, vector<8x96xf32> -> vector<8x96xf32>
    %24 = vector.extract_strided_slice %21 {offsets = [0, 0], sizes = [8, 96], strides = [1, 1]} : vector<8x128xf32> to vector<8x96xf32>
    %25 = vector.extract_strided_slice %22 {offsets = [0, 0], sizes = [8, 96], strides = [1, 1]} : vector<8x128xf32> to vector<8x96xf32>
    %26 = arith.addf %24, %25 : vector<8x96xf32>
    %27 = arith.addf %26, %23 : vector<8x96xf32>
    %28 = vector.extract_strided_slice %27 {offsets = [0, 0], sizes = [8, 32], strides = [1, 1]} : vector<8x96xf32> to vector<8x32xf32>
    %29 = arith.negf %28 : vector<8x32xf32>
    %30 = math.exp %29 : vector<8x32xf32>
    %cst_25 = arith.constant 1.000000e+00 : f32
    %31 = vector.broadcast %cst_25 : f32 to vector<8x32xf32>
    %32 = arith.addf %31, %30 : vector<8x32xf32>
    %33 = arith.divf %31, %32 : vector<8x32xf32>
    %34 = vector.extract_strided_slice %27 {offsets = [0, 32], sizes = [8, 32], strides = [1, 1]} : vector<8x96xf32> to vector<8x32xf32>
    %35 = arith.negf %34 : vector<8x32xf32>
    %36 = math.exp %35 : vector<8x32xf32>
    %cst_26 = arith.constant 1.000000e+00 : f32
    %37 = vector.broadcast %cst_26 : f32 to vector<8x32xf32>
    %38 = arith.addf %37, %36 : vector<8x32xf32>
    %39 = arith.divf %37, %38 : vector<8x32xf32>
    %40 = vector.extract_strided_slice %27 {offsets = [0, 64], sizes = [8, 32], strides = [1, 1]} : vector<8x96xf32> to vector<8x32xf32>
    %41 = arith.negf %40 : vector<8x32xf32>
    %42 = math.exp %41 : vector<8x32xf32>
    %cst_27 = arith.constant 1.000000e+00 : f32
    %43 = vector.broadcast %cst_27 : f32 to vector<8x32xf32>
    %44 = arith.addf %43, %42 : vector<8x32xf32>
    %45 = arith.divf %43, %44 : vector<8x32xf32>
    %46 = vector.extract_strided_slice %22 {offsets = [0, 96], sizes = [8, 32], strides = [1, 1]} : vector<8x128xf32> to vector<8x32xf32>
    %47 = arith.addf %46, %16 : vector<8x32xf32>
    %48 = math.tanh %47 : vector<8x32xf32>
    %49 = arith.mulf %39, %18 : vector<8x32xf32>
    %50 = arith.mulf %33, %48 : vector<8x32xf32>
    %51 = arith.addf %49, %50 : vector<8x32xf32>
    %52 = math.tanh %51 : vector<8x32xf32>
    %53 = vector.extract_strided_slice %21 {offsets = [0, 96], sizes = [8, 32], strides = [1, 1]} : vector<8x128xf32> to vector<8x32xf32>
    %54 = arith.addf %52, %53 : vector<8x32xf32>
    %55 = arith.mulf %45, %54 : vector<8x32xf32>
    %56 = arith.index_cast %c0_i32_20 : i32 to index
    %c0_28 = arith.constant 0 : index
    %c0_29 = arith.constant 0 : index
    %57 = vector.load %arg10[%56, %c0_28, %c0_29] : memref<8x8x32xf32, #tpu.memory_space<vmem>>, vector<1x8x32xf32>
    %58 = vector.shape_cast %57 : vector<1x8x32xf32> to vector<8x32xf32>
    %59 = vector.shape_cast %55 : vector<8x32xf32> to vector<1x8x32xf32>
    tpu.vector_store %arg10[%56, %c0_28, %c0_29], %59 {strides = array<i32>} : memref<8x8x32xf32, #tpu.memory_space<vmem>>, vector<1x8x32xf32>,
    %c1_i32 = arith.constant 1 : i32
    %60 = arith.index_cast %c1_i32 : i32 to index
    %c0_30 = arith.constant 0 : index
    %c0_31 = arith.constant 0 : index
    %61 = vector.load %arg15[%60, %c0_30, %c0_31] : memref<8x8x128xf32, #tpu.memory_space<vmem>>, vector<1x8x128xf32>
    %62 = vector.shape_cast %61 : vector<1x8x128xf32> to vector<8x128xf32>
    %cst_32 = arith.constant dense<0.000000e+00> : vector<8x128xf32>
    %63 = tpu.matmul %55, %12, %cst_32 {dimension_numbers = #tpu.dot_dimension_numbers<[1], [0], [0], [1], [0, 0, 1, 1], [], []>} : vector<8x32xf32>, vector<32x128xf32>, vector<8x128xf32> -> vector<8x128xf32>
    %cst_33 = arith.constant dense<0.000000e+00> : vector<8x96xf32>
    %64 = tpu.matmul %51, %13, %cst_33 {dimension_numbers = #tpu.dot_dimension_numbers<[1], [0], [0], [1], [0, 0, 1, 1], [], []>} : vector<8x32xf32>, vector<32x96xf32>, vector<8x96xf32> -> vector<8x96xf32>
    %65 = vector.extract_strided_slice %62 {offsets = [0, 0], sizes = [8, 96], strides = [1, 1]} : vector<8x128xf32> to vector<8x96xf32>
    %66 = vector.extract_strided_slice %63 {offsets = [0, 0], sizes = [8, 96], strides = [1, 1]} : vector<8x128xf32> to vector<8x96xf32>
    %67 = arith.addf %65, %66 : vector<8x96xf32>
    %68 = arith.addf %67, %64 : vector<8x96xf32>
    %69 = vector.extract_strided_slice %68 {offsets = [0, 0], sizes = [8, 32], strides = [1, 1]} : vector<8x96xf32> to vector<8x32xf32>
    %70 = arith.negf %69 : vector<8x32xf32>
    %71 = math.exp %70 : vector<8x32xf32>
    %cst_34 = arith.constant 1.000000e+00 : f32
    %72 = vector.broadcast %cst_34 : f32 to vector<8x32xf32>
    %73 = arith.addf %72, %71 : vector<8x32xf32>
    %74 = arith.divf %72, %73 : vector<8x32xf32>
    %75 = vector.extract_strided_slice %68 {offsets = [0, 32], sizes = [8, 32], strides = [1, 1]} : vector<8x96xf32> to vector<8x32xf32>
    %76 = arith.negf %75 : vector<8x32xf32>
    %77 = math.exp %76 : vector<8x32xf32>
    %cst_35 = arith.constant 1.000000e+00 : f32
    %78 = vector.broadcast %cst_35 : f32 to vector<8x32xf32>
    %79 = arith.addf %78, %77 : vector<8x32xf32>
    %80 = arith.divf %78, %79 : vector<8x32xf32>
    %81 = vector.extract_strided_slice %68 {offsets = [0, 64], sizes = [8, 32], strides = [1, 1]} : vector<8x96xf32> to vector<8x32xf32>
    %82 = arith.negf %81 : vector<8x32xf32>
    %83 = math.exp %82 : vector<8x32xf32>
    %cst_36 = arith.constant 1.000000e+00 : f32
    %84 = vector.broadcast %cst_36 : f32 to vector<8x32xf32>
    %85 = arith.addf %84, %83 : vector<8x32xf32>
    %86 = arith.divf %84, %85 : vector<8x32xf32>
    %87 = vector.extract_strided_slice %63 {offsets = [0, 96], sizes = [8, 32], strides = [1, 1]} : vector<8x128xf32> to vector<8x32xf32>
    %88 = arith.addf %87, %16 : vector<8x32xf32>
    %89 = math.tanh %88 : vector<8x32xf32>
    %90 = arith.mulf %80, %51 : vector<8x32xf32>
    %91 = arith.mulf %74, %89 : vector<8x32xf32>
    %92 = arith.addf %90, %91 : vector<8x32xf32>
    %93 = math.tanh %92 : vector<8x32xf32>
    %94 = vector.extract_strided_slice %62 {offsets = [0, 96], sizes = [8, 32], strides = [1, 1]} : vector<8x128xf32> to vector<8x32xf32>
    %95 = arith.addf %93, %94 : vector<8x32xf32>
    %96 = arith.mulf %86, %95 : vector<8x32xf32>
    %97 = arith.index_cast %c1_i32 : i32 to index
    %c0_37 = arith.constant 0 : index
    %c0_38 = arith.constant 0 : index
    %98 = vector.load %arg10[%97, %c0_37, %c0_38] : memref<8x8x32xf32, #tpu.memory_space<vmem>>, vector<1x8x32xf32>
    %99 = vector.shape_cast %98 : vector<1x8x32xf32> to vector<8x32xf32>
    %100 = vector.shape_cast %96 : vector<8x32xf32> to vector<1x8x32xf32>
    tpu.vector_store %arg10[%97, %c0_37, %c0_38], %100 {strides = array<i32>} : memref<8x8x32xf32, #tpu.memory_space<vmem>>, vector<1x8x32xf32>,
    %c2_i32 = arith.constant 2 : i32
    %101 = arith.index_cast %c2_i32 : i32 to index
    %c0_39 = arith.constant 0 : index
    %c0_40 = arith.constant 0 : index
    %102 = vector.load %arg15[%101, %c0_39, %c0_40] : memref<8x8x128xf32, #tpu.memory_space<vmem>>, vector<1x8x128xf32>
    %103 = vector.shape_cast %102 : vector<1x8x128xf32> to vector<8x128xf32>
    %cst_41 = arith.constant dense<0.000000e+00> : vector<8x128xf32>
    %104 = tpu.matmul %96, %12, %cst_41 {dimension_numbers = #tpu.dot_dimension_numbers<[1], [0], [0], [1], [0, 0, 1, 1], [], []>} : vector<8x32xf32>, vector<32x128xf32>, vector<8x128xf32> -> vector<8x128xf32>
    %cst_42 = arith.constant dense<0.000000e+00> : vector<8x96xf32>
    %105 = tpu.matmul %92, %13, %cst_42 {dimension_numbers = #tpu.dot_dimension_numbers<[1], [0], [0], [1], [0, 0, 1, 1], [], []>} : vector<8x32xf32>, vector<32x96xf32>, vector<8x96xf32> -> vector<8x96xf32>
    %106 = vector.extract_strided_slice %103 {offsets = [0, 0], sizes = [8, 96], strides = [1, 1]} : vector<8x128xf32> to vector<8x96xf32>
    %107 = vector.extract_strided_slice %104 {offsets = [0, 0], sizes = [8, 96], strides = [1, 1]} : vector<8x128xf32> to vector<8x96xf32>
    %108 = arith.addf %106, %107 : vector<8x96xf32>
    %109 = arith.addf %108, %105 : vector<8x96xf32>
    %110 = vector.extract_strided_slice %109 {offsets = [0, 0], sizes = [8, 32], strides = [1, 1]} : vector<8x96xf32> to vector<8x32xf32>
    %111 = arith.negf %110 : vector<8x32xf32>
    %112 = math.exp %111 : vector<8x32xf32>
    %cst_43 = arith.constant 1.000000e+00 : f32
    %113 = vector.broadcast %cst_43 : f32 to vector<8x32xf32>
    %114 = arith.addf %113, %112 : vector<8x32xf32>
    %115 = arith.divf %113, %114 : vector<8x32xf32>
    %116 = vector.extract_strided_slice %109 {offsets = [0, 32], sizes = [8, 32], strides = [1, 1]} : vector<8x96xf32> to vector<8x32xf32>
    %117 = arith.negf %116 : vector<8x32xf32>
    %118 = math.exp %117 : vector<8x32xf32>
    %cst_44 = arith.constant 1.000000e+00 : f32
    %119 = vector.broadcast %cst_44 : f32 to vector<8x32xf32>
    %120 = arith.addf %119, %118 : vector<8x32xf32>
    %121 = arith.divf %119, %120 : vector<8x32xf32>
    %122 = vector.extract_strided_slice %109 {offsets = [0, 64], sizes = [8, 32], strides = [1, 1]} : vector<8x96xf32> to vector<8x32xf32>
    %123 = arith.negf %122 : vector<8x32xf32>
    %124 = math.exp %123 : vector<8x32xf32>
    %cst_45 = arith.constant 1.000000e+00 : f32
    %125 = vector.broadcast %cst_45 : f32 to vector<8x32xf32>
    %126 = arith.addf %125, %124 : vector<8x32xf32>
    %127 = arith.divf %125, %126 : vector<8x32xf32>
    %128 = vector.extract_strided_slice %104 {offsets = [0, 96], sizes = [8, 32], strides = [1, 1]} : vector<8x128xf32> to vector<8x32xf32>
    %129 = arith.addf %128, %16 : vector<8x32xf32>
    %130 = math.tanh %129 : vector<8x32xf32>
    %131 = arith.mulf %121, %92 : vector<8x32xf32>
    %132 = arith.mulf %115, %130 : vector<8x32xf32>
    %133 = arith.addf %131, %132 : vector<8x32xf32>
    %134 = math.tanh %133 : vector<8x32xf32>
    %135 = vector.extract_strided_slice %103 {offsets = [0, 96], sizes = [8, 32], strides = [1, 1]} : vector<8x128xf32> to vector<8x32xf32>
    %136 = arith.addf %134, %135 : vector<8x32xf32>
    %137 = arith.mulf %127, %136 : vector<8x32xf32>
    %138 = arith.index_cast %c2_i32 : i32 to index
    %c0_46 = arith.constant 0 : index
    %c0_47 = arith.constant 0 : index
    %139 = vector.load %arg10[%138, %c0_46, %c0_47] : memref<8x8x32xf32, #tpu.memory_space<vmem>>, vector<1x8x32xf32>
    %140 = vector.shape_cast %139 : vector<1x8x32xf32> to vector<8x32xf32>
    %141 = vector.shape_cast %137 : vector<8x32xf32> to vector<1x8x32xf32>
    tpu.vector_store %arg10[%138, %c0_46, %c0_47], %141 {strides = array<i32>} : memref<8x8x32xf32, #tpu.memory_space<vmem>>, vector<1x8x32xf32>,
    %c3_i32 = arith.constant 3 : i32
    %142 = arith.index_cast %c3_i32 : i32 to index
    %c0_48 = arith.constant 0 : index
    %c0_49 = arith.constant 0 : index
    %143 = vector.load %arg15[%142, %c0_48, %c0_49] : memref<8x8x128xf32, #tpu.memory_space<vmem>>, vector<1x8x128xf32>
    %144 = vector.shape_cast %143 : vector<1x8x128xf32> to vector<8x128xf32>
    %cst_50 = arith.constant dense<0.000000e+00> : vector<8x128xf32>
    %145 = tpu.matmul %137, %12, %cst_50 {dimension_numbers = #tpu.dot_dimension_numbers<[1], [0], [0], [1], [0, 0, 1, 1], [], []>} : vector<8x32xf32>, vector<32x128xf32>, vector<8x128xf32> -> vector<8x128xf32>
    %cst_51 = arith.constant dense<0.000000e+00> : vector<8x96xf32>
    %146 = tpu.matmul %133, %13, %cst_51 {dimension_numbers = #tpu.dot_dimension_numbers<[1], [0], [0], [1], [0, 0, 1, 1], [], []>} : vector<8x32xf32>, vector<32x96xf32>, vector<8x96xf32> -> vector<8x96xf32>
    %147 = vector.extract_strided_slice %144 {offsets = [0, 0], sizes = [8, 96], strides = [1, 1]} : vector<8x128xf32> to vector<8x96xf32>
    %148 = vector.extract_strided_slice %145 {offsets = [0, 0], sizes = [8, 96], strides = [1, 1]} : vector<8x128xf32> to vector<8x96xf32>
    %149 = arith.addf %147, %148 : vector<8x96xf32>
    %150 = arith.addf %149, %146 : vector<8x96xf32>
    %151 = vector.extract_strided_slice %150 {offsets = [0, 0], sizes = [8, 32], strides = [1, 1]} : vector<8x96xf32> to vector<8x32xf32>
    %152 = arith.negf %151 : vector<8x32xf32>
    %153 = math.exp %152 : vector<8x32xf32>
    %cst_52 = arith.constant 1.000000e+00 : f32
    %154 = vector.broadcast %cst_52 : f32 to vector<8x32xf32>
    %155 = arith.addf %154, %153 : vector<8x32xf32>
    %156 = arith.divf %154, %155 : vector<8x32xf32>
    %157 = vector.extract_strided_slice %150 {offsets = [0, 32], sizes = [8, 32], strides = [1, 1]} : vector<8x96xf32> to vector<8x32xf32>
    %158 = arith.negf %157 : vector<8x32xf32>
    %159 = math.exp %158 : vector<8x32xf32>
    %cst_53 = arith.constant 1.000000e+00 : f32
    %160 = vector.broadcast %cst_53 : f32 to vector<8x32xf32>
    %161 = arith.addf %160, %159 : vector<8x32xf32>
    %162 = arith.divf %160, %161 : vector<8x32xf32>
    %163 = vector.extract_strided_slice %150 {offsets = [0, 64], sizes = [8, 32], strides = [1, 1]} : vector<8x96xf32> to vector<8x32xf32>
    %164 = arith.negf %163 : vector<8x32xf32>
    %165 = math.exp %164 : vector<8x32xf32>
    %cst_54 = arith.constant 1.000000e+00 : f32
    %166 = vector.broadcast %cst_54 : f32 to vector<8x32xf32>
    %167 = arith.addf %166, %165 : vector<8x32xf32>
    %168 = arith.divf %166, %167 : vector<8x32xf32>
    %169 = vector.extract_strided_slice %145 {offsets = [0, 96], sizes = [8, 32], strides = [1, 1]} : vector<8x128xf32> to vector<8x32xf32>
    %170 = arith.addf %169, %16 : vector<8x32xf32>
    %171 = math.tanh %170 : vector<8x32xf32>
    %172 = arith.mulf %162, %133 : vector<8x32xf32>
    %173 = arith.mulf %156, %171 : vector<8x32xf32>
    %174 = arith.addf %172, %173 : vector<8x32xf32>
    %175 = math.tanh %174 : vector<8x32xf32>
    %176 = vector.extract_strided_slice %144 {offsets = [0, 96], sizes = [8, 32], strides = [1, 1]} : vector<8x128xf32> to vector<8x32xf32>
    %177 = arith.addf %175, %176 : vector<8x32xf32>
    %178 = arith.mulf %168, %177 : vector<8x32xf32>
    %179 = arith.index_cast %c3_i32 : i32 to index
    %c0_55 = arith.constant 0 : index
    %c0_56 = arith.constant 0 : index
    %180 = vector.load %arg10[%179, %c0_55, %c0_56] : memref<8x8x32xf32, #tpu.memory_space<vmem>>, vector<1x8x32xf32>
    %181 = vector.shape_cast %180 : vector<1x8x32xf32> to vector<8x32xf32>
    %182 = vector.shape_cast %178 : vector<8x32xf32> to vector<1x8x32xf32>
    tpu.vector_store %arg10[%179, %c0_55, %c0_56], %182 {strides = array<i32>} : memref<8x8x32xf32, #tpu.memory_space<vmem>>, vector<1x8x32xf32>,
    %c4_i32 = arith.constant 4 : i32
    %183 = arith.index_cast %c4_i32 : i32 to index
    %c0_57 = arith.constant 0 : index
    %c0_58 = arith.constant 0 : index
    %184 = vector.load %arg15[%183, %c0_57, %c0_58] : memref<8x8x128xf32, #tpu.memory_space<vmem>>, vector<1x8x128xf32>
    %185 = vector.shape_cast %184 : vector<1x8x128xf32> to vector<8x128xf32>
    %cst_59 = arith.constant dense<0.000000e+00> : vector<8x128xf32>
    %186 = tpu.matmul %178, %12, %cst_59 {dimension_numbers = #tpu.dot_dimension_numbers<[1], [0], [0], [1], [0, 0, 1, 1], [], []>} : vector<8x32xf32>, vector<32x128xf32>, vector<8x128xf32> -> vector<8x128xf32>
    %cst_60 = arith.constant dense<0.000000e+00> : vector<8x96xf32>
    %187 = tpu.matmul %174, %13, %cst_60 {dimension_numbers = #tpu.dot_dimension_numbers<[1], [0], [0], [1], [0, 0, 1, 1], [], []>} : vector<8x32xf32>, vector<32x96xf32>, vector<8x96xf32> -> vector<8x96xf32>
    %188 = vector.extract_strided_slice %185 {offsets = [0, 0], sizes = [8, 96], strides = [1, 1]} : vector<8x128xf32> to vector<8x96xf32>
    %189 = vector.extract_strided_slice %186 {offsets = [0, 0], sizes = [8, 96], strides = [1, 1]} : vector<8x128xf32> to vector<8x96xf32>
    %190 = arith.addf %188, %189 : vector<8x96xf32>
    %191 = arith.addf %190, %187 : vector<8x96xf32>
    %192 = vector.extract_strided_slice %191 {offsets = [0, 0], sizes = [8, 32], strides = [1, 1]} : vector<8x96xf32> to vector<8x32xf32>
    %193 = arith.negf %192 : vector<8x32xf32>
    %194 = math.exp %193 : vector<8x32xf32>
    %cst_61 = arith.constant 1.000000e+00 : f32
    %195 = vector.broadcast %cst_61 : f32 to vector<8x32xf32>
    %196 = arith.addf %195, %194 : vector<8x32xf32>
    %197 = arith.divf %195, %196 : vector<8x32xf32>
    %198 = vector.extract_strided_slice %191 {offsets = [0, 32], sizes = [8, 32], strides = [1, 1]} : vector<8x96xf32> to vector<8x32xf32>
    %199 = arith.negf %198 : vector<8x32xf32>
    %200 = math.exp %199 : vector<8x32xf32>
    %cst_62 = arith.constant 1.000000e+00 : f32
    %201 = vector.broadcast %cst_62 : f32 to vector<8x32xf32>
    %202 = arith.addf %201, %200 : vector<8x32xf32>
    %203 = arith.divf %201, %202 : vector<8x32xf32>
    %204 = vector.extract_strided_slice %191 {offsets = [0, 64], sizes = [8, 32], strides = [1, 1]} : vector<8x96xf32> to vector<8x32xf32>
    %205 = arith.negf %204 : vector<8x32xf32>
    %206 = math.exp %205 : vector<8x32xf32>
    %cst_63 = arith.constant 1.000000e+00 : f32
    %207 = vector.broadcast %cst_63 : f32 to vector<8x32xf32>
    %208 = arith.addf %207, %206 : vector<8x32xf32>
    %209 = arith.divf %207, %208 : vector<8x32xf32>
    %210 = vector.extract_strided_slice %186 {offsets = [0, 96], sizes = [8, 32], strides = [1, 1]} : vector<8x128xf32> to vector<8x32xf32>
    %211 = arith.addf %210, %16 : vector<8x32xf32>
    %212 = math.tanh %211 : vector<8x32xf32>
    %213 = arith.mulf %203, %174 : vector<8x32xf32>
    %214 = arith.mulf %197, %212 : vector<8x32xf32>
    %215 = arith.addf %213, %214 : vector<8x32xf32>
    %216 = math.tanh %215 : vector<8x32xf32>
    %217 = vector.extract_strided_slice %185 {offsets = [0, 96], sizes = [8, 32], strides = [1, 1]} : vector<8x128xf32> to vector<8x32xf32>
    %218 = arith.addf %216, %217 : vector<8x32xf32>
    %219 = arith.mulf %209, %218 : vector<8x32xf32>
    %220 = arith.index_cast %c4_i32 : i32 to index
    %c0_64 = arith.constant 0 : index
    %c0_65 = arith.constant 0 : index
    %221 = vector.load %arg10[%220, %c0_64, %c0_65] : memref<8x8x32xf32, #tpu.memory_space<vmem>>, vector<1x8x32xf32>
    %222 = vector.shape_cast %221 : vector<1x8x32xf32> to vector<8x32xf32>
    %223 = vector.shape_cast %219 : vector<8x32xf32> to vector<1x8x32xf32>
    tpu.vector_store %arg10[%220, %c0_64, %c0_65], %223 {strides = array<i32>} : memref<8x8x32xf32, #tpu.memory_space<vmem>>, vector<1x8x32xf32>,
    %c5_i32 = arith.constant 5 : i32
    %224 = arith.index_cast %c5_i32 : i32 to index
    %c0_66 = arith.constant 0 : index
    %c0_67 = arith.constant 0 : index
    %225 = vector.load %arg15[%224, %c0_66, %c0_67] : memref<8x8x128xf32, #tpu.memory_space<vmem>>, vector<1x8x128xf32>
    %226 = vector.shape_cast %225 : vector<1x8x128xf32> to vector<8x128xf32>
    %cst_68 = arith.constant dense<0.000000e+00> : vector<8x128xf32>
    %227 = tpu.matmul %219, %12, %cst_68 {dimension_numbers = #tpu.dot_dimension_numbers<[1], [0], [0], [1], [0, 0, 1, 1], [], []>} : vector<8x32xf32>, vector<32x128xf32>, vector<8x128xf32> -> vector<8x128xf32>
    %cst_69 = arith.constant dense<0.000000e+00> : vector<8x96xf32>
    %228 = tpu.matmul %215, %13, %cst_69 {dimension_numbers = #tpu.dot_dimension_numbers<[1], [0], [0], [1], [0, 0, 1, 1], [], []>} : vector<8x32xf32>, vector<32x96xf32>, vector<8x96xf32> -> vector<8x96xf32>
    %229 = vector.extract_strided_slice %226 {offsets = [0, 0], sizes = [8, 96], strides = [1, 1]} : vector<8x128xf32> to vector<8x96xf32>
    %230 = vector.extract_strided_slice %227 {offsets = [0, 0], sizes = [8, 96], strides = [1, 1]} : vector<8x128xf32> to vector<8x96xf32>
    %231 = arith.addf %229, %230 : vector<8x96xf32>
    %232 = arith.addf %231, %228 : vector<8x96xf32>
    %233 = vector.extract_strided_slice %232 {offsets = [0, 0], sizes = [8, 32], strides = [1, 1]} : vector<8x96xf32> to vector<8x32xf32>
    %234 = arith.negf %233 : vector<8x32xf32>
    %235 = math.exp %234 : vector<8x32xf32>
    %cst_70 = arith.constant 1.000000e+00 : f32
    %236 = vector.broadcast %cst_70 : f32 to vector<8x32xf32>
    %237 = arith.addf %236, %235 : vector<8x32xf32>
    %238 = arith.divf %236, %237 : vector<8x32xf32>
    %239 = vector.extract_strided_slice %232 {offsets = [0, 32], sizes = [8, 32], strides = [1, 1]} : vector<8x96xf32> to vector<8x32xf32>
    %240 = arith.negf %239 : vector<8x32xf32>
    %241 = math.exp %240 : vector<8x32xf32>
    %cst_71 = arith.constant 1.000000e+00 : f32
    %242 = vector.broadcast %cst_71 : f32 to vector<8x32xf32>
    %243 = arith.addf %242, %241 : vector<8x32xf32>
    %244 = arith.divf %242, %243 : vector<8x32xf32>
    %245 = vector.extract_strided_slice %232 {offsets = [0, 64], sizes = [8, 32], strides = [1, 1]} : vector<8x96xf32> to vector<8x32xf32>
    %246 = arith.negf %245 : vector<8x32xf32>
    %247 = math.exp %246 : vector<8x32xf32>
    %cst_72 = arith.constant 1.000000e+00 : f32
    %248 = vector.broadcast %cst_72 : f32 to vector<8x32xf32>
    %249 = arith.addf %248, %247 : vector<8x32xf32>
    %250 = arith.divf %248, %249 : vector<8x32xf32>
    %251 = vector.extract_strided_slice %227 {offsets = [0, 96], sizes = [8, 32], strides = [1, 1]} : vector<8x128xf32> to vector<8x32xf32>
    %252 = arith.addf %251, %16 : vector<8x32xf32>
    %253 = math.tanh %252 : vector<8x32xf32>
    %254 = arith.mulf %244, %215 : vector<8x32xf32>
    %255 = arith.mulf %238, %253 : vector<8x32xf32>
    %256 = arith.addf %254, %255 : vector<8x32xf32>
    %257 = math.tanh %256 : vector<8x32xf32>
    %258 = vector.extract_strided_slice %226 {offsets = [0, 96], sizes = [8, 32], strides = [1, 1]} : vector<8x128xf32> to vector<8x32xf32>
    %259 = arith.addf %257, %258 : vector<8x32xf32>
    %260 = arith.mulf %250, %259 : vector<8x32xf32>
    %261 = arith.index_cast %c5_i32 : i32 to index
    %c0_73 = arith.constant 0 : index
    %c0_74 = arith.constant 0 : index
    %262 = vector.load %arg10[%261, %c0_73, %c0_74] : memref<8x8x32xf32, #tpu.memory_space<vmem>>, vector<1x8x32xf32>
    %263 = vector.shape_cast %262 : vector<1x8x32xf32> to vector<8x32xf32>
    %264 = vector.shape_cast %260 : vector<8x32xf32> to vector<1x8x32xf32>
    tpu.vector_store %arg10[%261, %c0_73, %c0_74], %264 {strides = array<i32>} : memref<8x8x32xf32, #tpu.memory_space<vmem>>, vector<1x8x32xf32>,
    %c6_i32 = arith.constant 6 : i32
    %265 = arith.index_cast %c6_i32 : i32 to index
    %c0_75 = arith.constant 0 : index
    %c0_76 = arith.constant 0 : index
    %266 = vector.load %arg15[%265, %c0_75, %c0_76] : memref<8x8x128xf32, #tpu.memory_space<vmem>>, vector<1x8x128xf32>
    %267 = vector.shape_cast %266 : vector<1x8x128xf32> to vector<8x128xf32>
    %cst_77 = arith.constant dense<0.000000e+00> : vector<8x128xf32>
    %268 = tpu.matmul %260, %12, %cst_77 {dimension_numbers = #tpu.dot_dimension_numbers<[1], [0], [0], [1], [0, 0, 1, 1], [], []>} : vector<8x32xf32>, vector<32x128xf32>, vector<8x128xf32> -> vector<8x128xf32>
    %cst_78 = arith.constant dense<0.000000e+00> : vector<8x96xf32>
    %269 = tpu.matmul %256, %13, %cst_78 {dimension_numbers = #tpu.dot_dimension_numbers<[1], [0], [0], [1], [0, 0, 1, 1], [], []>} : vector<8x32xf32>, vector<32x96xf32>, vector<8x96xf32> -> vector<8x96xf32>
    %270 = vector.extract_strided_slice %267 {offsets = [0, 0], sizes = [8, 96], strides = [1, 1]} : vector<8x128xf32> to vector<8x96xf32>
    %271 = vector.extract_strided_slice %268 {offsets = [0, 0], sizes = [8, 96], strides = [1, 1]} : vector<8x128xf32> to vector<8x96xf32>
    %272 = arith.addf %270, %271 : vector<8x96xf32>
    %273 = arith.addf %272, %269 : vector<8x96xf32>
    %274 = vector.extract_strided_slice %273 {offsets = [0, 0], sizes = [8, 32], strides = [1, 1]} : vector<8x96xf32> to vector<8x32xf32>
    %275 = arith.negf %274 : vector<8x32xf32>
    %276 = math.exp %275 : vector<8x32xf32>
    %cst_79 = arith.constant 1.000000e+00 : f32
    %277 = vector.broadcast %cst_79 : f32 to vector<8x32xf32>
    %278 = arith.addf %277, %276 : vector<8x32xf32>
    %279 = arith.divf %277, %278 : vector<8x32xf32>
    %280 = vector.extract_strided_slice %273 {offsets = [0, 32], sizes = [8, 32], strides = [1, 1]} : vector<8x96xf32> to vector<8x32xf32>
    %281 = arith.negf %280 : vector<8x32xf32>
    %282 = math.exp %281 : vector<8x32xf32>
    %cst_80 = arith.constant 1.000000e+00 : f32
    %283 = vector.broadcast %cst_80 : f32 to vector<8x32xf32>
    %284 = arith.addf %283, %282 : vector<8x32xf32>
    %285 = arith.divf %283, %284 : vector<8x32xf32>
    %286 = vector.extract_strided_slice %273 {offsets = [0, 64], sizes = [8, 32], strides = [1, 1]} : vector<8x96xf32> to vector<8x32xf32>
    %287 = arith.negf %286 : vector<8x32xf32>
    %288 = math.exp %287 : vector<8x32xf32>
    %cst_81 = arith.constant 1.000000e+00 : f32
    %289 = vector.broadcast %cst_81 : f32 to vector<8x32xf32>
    %290 = arith.addf %289, %288 : vector<8x32xf32>
    %291 = arith.divf %289, %290 : vector<8x32xf32>
    %292 = vector.extract_strided_slice %268 {offsets = [0, 96], sizes = [8, 32], strides = [1, 1]} : vector<8x128xf32> to vector<8x32xf32>
    %293 = arith.addf %292, %16 : vector<8x32xf32>
    %294 = math.tanh %293 : vector<8x32xf32>
    %295 = arith.mulf %285, %256 : vector<8x32xf32>
    %296 = arith.mulf %279, %294 : vector<8x32xf32>
    %297 = arith.addf %295, %296 : vector<8x32xf32>
    %298 = math.tanh %297 : vector<8x32xf32>
    %299 = vector.extract_strided_slice %267 {offsets = [0, 96], sizes = [8, 32], strides = [1, 1]} : vector<8x128xf32> to vector<8x32xf32>
    %300 = arith.addf %298, %299 : vector<8x32xf32>
    %301 = arith.mulf %291, %300 : vector<8x32xf32>
    %302 = arith.index_cast %c6_i32 : i32 to index
    %c0_82 = arith.constant 0 : index
    %c0_83 = arith.constant 0 : index
    %303 = vector.load %arg10[%302, %c0_82, %c0_83] : memref<8x8x32xf32, #tpu.memory_space<vmem>>, vector<1x8x32xf32>
    %304 = vector.shape_cast %303 : vector<1x8x32xf32> to vector<8x32xf32>
    %305 = vector.shape_cast %301 : vector<8x32xf32> to vector<1x8x32xf32>
    tpu.vector_store %arg10[%302, %c0_82, %c0_83], %305 {strides = array<i32>} : memref<8x8x32xf32, #tpu.memory_space<vmem>>, vector<1x8x32xf32>,
    %c7_i32 = arith.constant 7 : i32
    %306 = arith.index_cast %c7_i32 : i32 to index
    %c0_84 = arith.constant 0 : index
    %c0_85 = arith.constant 0 : index
    %307 = vector.load %arg15[%306, %c0_84, %c0_85] : memref<8x8x128xf32, #tpu.memory_space<vmem>>, vector<1x8x128xf32>
    %308 = vector.shape_cast %307 : vector<1x8x128xf32> to vector<8x128xf32>
    %cst_86 = arith.constant dense<0.000000e+00> : vector<8x128xf32>
    %309 = tpu.matmul %301, %12, %cst_86 {dimension_numbers = #tpu.dot_dimension_numbers<[1], [0], [0], [1], [0, 0, 1, 1], [], []>} : vector<8x32xf32>, vector<32x128xf32>, vector<8x128xf32> -> vector<8x128xf32>
    %cst_87 = arith.constant dense<0.000000e+00> : vector<8x96xf32>
    %310 = tpu.matmul %297, %13, %cst_87 {dimension_numbers = #tpu.dot_dimension_numbers<[1], [0], [0], [1], [0, 0, 1, 1], [], []>} : vector<8x32xf32>, vector<32x96xf32>, vector<8x96xf32> -> vector<8x96xf32>
    %311 = vector.extract_strided_slice %308 {offsets = [0, 0], sizes = [8, 96], strides = [1, 1]} : vector<8x128xf32> to vector<8x96xf32>
    %312 = vector.extract_strided_slice %309 {offsets = [0, 0], sizes = [8, 96], strides = [1, 1]} : vector<8x128xf32> to vector<8x96xf32>
    %313 = arith.addf %311, %312 : vector<8x96xf32>
    %314 = arith.addf %313, %310 : vector<8x96xf32>
    %315 = vector.extract_strided_slice %314 {offsets = [0, 0], sizes = [8, 32], strides = [1, 1]} : vector<8x96xf32> to vector<8x32xf32>
    %316 = arith.negf %315 : vector<8x32xf32>
    %317 = math.exp %316 : vector<8x32xf32>
    %cst_88 = arith.constant 1.000000e+00 : f32
    %318 = vector.broadcast %cst_88 : f32 to vector<8x32xf32>
    %319 = arith.addf %318, %317 : vector<8x32xf32>
    %320 = arith.divf %318, %319 : vector<8x32xf32>
    %321 = vector.extract_strided_slice %314 {offsets = [0, 32], sizes = [8, 32], strides = [1, 1]} : vector<8x96xf32> to vector<8x32xf32>
    %322 = arith.negf %321 : vector<8x32xf32>
    %323 = math.exp %322 : vector<8x32xf32>
    %cst_89 = arith.constant 1.000000e+00 : f32
    %324 = vector.broadcast %cst_89 : f32 to vector<8x32xf32>
    %325 = arith.addf %324, %323 : vector<8x32xf32>
    %326 = arith.divf %324, %325 : vector<8x32xf32>
    %327 = vector.extract_strided_slice %314 {offsets = [0, 64], sizes = [8, 32], strides = [1, 1]} : vector<8x96xf32> to vector<8x32xf32>
    %328 = arith.negf %327 : vector<8x32xf32>
    %329 = math.exp %328 : vector<8x32xf32>
    %cst_90 = arith.constant 1.000000e+00 : f32
    %330 = vector.broadcast %cst_90 : f32 to vector<8x32xf32>
    %331 = arith.addf %330, %329 : vector<8x32xf32>
    %332 = arith.divf %330, %331 : vector<8x32xf32>
    %333 = vector.extract_strided_slice %309 {offsets = [0, 96], sizes = [8, 32], strides = [1, 1]} : vector<8x128xf32> to vector<8x32xf32>
    %334 = arith.addf %333, %16 : vector<8x32xf32>
    %335 = math.tanh %334 : vector<8x32xf32>
    %336 = arith.mulf %326, %297 : vector<8x32xf32>
    %337 = arith.mulf %320, %335 : vector<8x32xf32>
    %338 = arith.addf %336, %337 : vector<8x32xf32>
    %339 = math.tanh %338 : vector<8x32xf32>
    %340 = vector.extract_strided_slice %308 {offsets = [0, 96], sizes = [8, 32], strides = [1, 1]} : vector<8x128xf32> to vector<8x32xf32>
    %341 = arith.addf %339, %340 : vector<8x32xf32>
    %342 = arith.mulf %332, %341 : vector<8x32xf32>
    %343 = arith.index_cast %c7_i32 : i32 to index
    %c0_91 = arith.constant 0 : index
    %c0_92 = arith.constant 0 : index
    %344 = vector.load %arg10[%343, %c0_91, %c0_92] : memref<8x8x32xf32, #tpu.memory_space<vmem>>, vector<1x8x32xf32>
    %345 = vector.shape_cast %344 : vector<1x8x32xf32> to vector<8x32xf32>
    %346 = vector.shape_cast %342 : vector<8x32xf32> to vector<1x8x32xf32>
    tpu.vector_store %arg10[%343, %c0_91, %c0_92], %346 {strides = array<i32>} : memref<8x8x32xf32, #tpu.memory_space<vmem>>, vector<1x8x32xf32>,
    %c8_i32 = arith.constant 8 : i32
    %c0_93 = arith.constant 0 : index
    %c0_94 = arith.constant 0 : index
    %347 = vector.load %arg13[%c0_93, %c0_94] : memref<8x32xf32, #tpu.memory_space<vmem>>, vector<8x32xf32>
    tpu.vector_store %arg13[%c0_93, %c0_94], %342 {strides = array<i32>} : memref<8x32xf32, #tpu.memory_space<vmem>>, vector<8x32xf32>,
    %c0_95 = arith.constant 0 : index
    %c0_96 = arith.constant 0 : index
    %348 = vector.load %arg14[%c0_95, %c0_96] : memref<8x32xf32, #tpu.memory_space<vmem>>, vector<8x32xf32>
    tpu.vector_store %arg14[%c0_95, %c0_96], %338 {strides = array<i32>} : memref<8x32xf32, #tpu.memory_space<vmem>>, vector<8x32xf32>,
    %c0_i32_97 = arith.constant 0 : i32
    %349 = arith.cmpi eq, %arg1, %c0_i32_97 : i32
    %350 = arith.extui %349 : i1 to i32
    %c0_i32_98 = arith.constant 0 : i32
    %351 = arith.cmpi ne, %350, %c0_i32_98 : i32
    scf.if %351 {
      %c0_99 = arith.constant 0 : index
      %c0_100 = arith.constant 0 : index
      %352 = vector.load %arg11[%c0_99, %c0_100] : memref<8x32xf32, #tpu.memory_space<vmem>>, vector<8x32xf32>
      tpu.vector_store %arg11[%c0_99, %c0_100], %342 {strides = array<i32>} : memref<8x32xf32, #tpu.memory_space<vmem>>, vector<8x32xf32>,
      %c0_101 = arith.constant 0 : index
      %c0_102 = arith.constant 0 : index
      %353 = vector.load %arg12[%c0_101, %c0_102] : memref<8x32xf32, #tpu.memory_space<vmem>>, vector<8x32xf32>
      tpu.vector_store %arg12[%c0_101, %c0_102], %338 {strides = array<i32>} : memref<8x32xf32, #tpu.memory_space<vmem>>, vector<8x32xf32>,
    } else {
    }
    return
  }
  func.func @transform_0(%arg0: i32, %arg1: i32) -> (i32, i32, i32) {
    %c0_i32 = arith.constant 0 : i32
    %c0_i32_0 = arith.constant 0 : i32
    return %arg1, %arg0, %c0_i32 : i32, i32, i32
  }
  func.func @transform_1(%arg0: i32, %arg1: i32) -> (i32, i32) {
    %c0_i32 = arith.constant 0 : i32
    %c0_i32_0 = arith.constant 0 : i32
    return %arg0, %c0_i32 : i32, i32
  }
  func.func @transform_2(%arg0: i32, %arg1: i32) -> (i32, i32) {
    %c0_i32 = arith.constant 0 : i32
    %c0_i32_0 = arith.constant 0 : i32
    return %arg0, %c0_i32 : i32, i32
  }
  func.func @transform_3(%arg0: i32, %arg1: i32) -> (i32, i32) {
    %c0_i32 = arith.constant 0 : i32
    %c0_i32_0 = arith.constant 0 : i32
    %c0_i32_1 = arith.constant 0 : i32
    return %c0_i32, %c0_i32_0 : i32, i32
  }
  func.func @transform_4(%arg0: i32, %arg1: i32) -> (i32, i32) {
    %c0_i32 = arith.constant 0 : i32
    %c0_i32_0 = arith.constant 0 : i32
    %c0_i32_1 = arith.constant 0 : i32
    return %c0_i32, %c0_i32_0 : i32, i32
  }
  func.func @transform_5(%arg0: i32, %arg1: i32) -> (i32, i32) {
    %c0_i32 = arith.constant 0 : i32
    %c0_i32_0 = arith.constant 0 : i32
    %c0_i32_1 = arith.constant 0 : i32
    return %c0_i32, %c0_i32_0 : i32, i32
  }
  func.func @transform_6(%arg0: i32, %arg1: i32) -> (i32, i32) {
    %c0_i32 = arith.constant 0 : i32
    %c0_i32_0 = arith.constant 0 : i32
    %c0_i32_1 = arith.constant 0 : i32
    return %c0_i32, %c0_i32_0 : i32, i32
  }
  func.func @transform_7(%arg0: i32, %arg1: i32) -> (i32, i32) {
    %c0_i32 = arith.constant 0 : i32
    %c0_i32_0 = arith.constant 0 : i32
    %c0_i32_1 = arith.constant 0 : i32
    return %c0_i32, %c0_i32_0 : i32, i32
  }
  func.func @transform_8(%arg0: i32, %arg1: i32) -> (i32, i32, i32) {
    %c0_i32 = arith.constant 0 : i32
    %c0_i32_0 = arith.constant 0 : i32
    return %arg1, %arg0, %c0_i32 : i32, i32, i32
  }
  func.func @transform_9(%arg0: i32, %arg1: i32) -> (i32, i32) {
    %c0_i32 = arith.constant 0 : i32
    %c0_i32_0 = arith.constant 0 : i32
    return %arg0, %c0_i32 : i32, i32
  }
  func.func @transform_10(%arg0: i32, %arg1: i32) -> (i32, i32) {
    %c0_i32 = arith.constant 0 : i32
    %c0_i32_0 = arith.constant 0 : i32
    return %arg0, %c0_i32 : i32, i32
  }
}

module attributes {stable_mosaic.version = 11 : i64} {
  func.func @_res_lstm_kernel(%arg0: i32, %arg1: i32, %arg2: memref<8x8x16xf32, #tpu.memory_space<vmem>>, %arg3: memref<8x32xf32, #tpu.memory_space<vmem>>, %arg4: memref<8x32xf32, #tpu.memory_space<vmem>>, %arg5: memref<16x128xf32, #tpu.memory_space<vmem>>, %arg6: memref<32x128xf32, #tpu.memory_space<vmem>>, %arg7: memref<32x96xf32, #tpu.memory_space<vmem>>, %arg8: memref<1x128xf32, #tpu.memory_space<vmem>>, %arg9: memref<1x32xf32, #tpu.memory_space<vmem>>, %arg10: memref<8x8x32xf32, #tpu.memory_space<vmem>>, %arg11: memref<8x32xf32, #tpu.memory_space<vmem>>, %arg12: memref<8x32xf32, #tpu.memory_space<vmem>>, %arg13: memref<8x32xf32, #tpu.memory_space<vmem>>, %arg14: memref<8x32xf32, #tpu.memory_space<vmem>>, %arg15: memref<8x8x128xf32, #tpu.memory_space<vmem>>) attributes {dimension_semantics = [#tpu.dimension_semantics<parallel>, #tpu.dimension_semantics<arbitrary>], iteration_bounds = array<i64: 1, 1>, scalar_prefetch = 0 : i64, scratch_operands = 3 : i64, tpu.core_type = #tpu.core_type<tc>, window_params = [{transform_indices = @transform_0, window_bounds = array<i64: 8, 8, 16>}, {transform_indices = @transform_1, window_bounds = array<i64: 8, 32>}, {transform_indices = @transform_2, window_bounds = array<i64: 8, 32>}, {pipeline_mode = #tpu.pipeline_mode<synchronous>, transform_indices = @transform_3, window_bounds = array<i64: 16, 128>}, {pipeline_mode = #tpu.pipeline_mode<synchronous>, transform_indices = @transform_4, window_bounds = array<i64: 32, 128>}, {pipeline_mode = #tpu.pipeline_mode<synchronous>, transform_indices = @transform_5, window_bounds = array<i64: 32, 96>}, {pipeline_mode = #tpu.pipeline_mode<synchronous>, transform_indices = @transform_6, window_bounds = array<i64: 1, 128>}, {pipeline_mode = #tpu.pipeline_mode<synchronous>, transform_indices = @transform_7, window_bounds = array<i64: 1, 32>}, {transform_indices = @transform_8, window_bounds = array<i64: 8, 8, 32>}, {transform_indices = @transform_9, window_bounds = array<i64: 8, 32>}, {transform_indices = @transform_10, window_bounds = array<i64: 8, 32>}]} {
    %c0_i32 = arith.constant 0 : i32
    %0 = arith.cmpi eq, %arg1, %c0_i32 : i32
    %1 = arith.extui %0 : i1 to i32
    %c0_i32_0 = arith.constant 0 : i32
    %2 = arith.cmpi ne, %1, %c0_i32_0 : i32
    scf.if %2 {
      %c0_99 = arith.constant 0 : index
      %c0_100 = arith.constant 0 : index
      %352 = vector.load %arg3[%c0_99, %c0_100] : memref<8x32xf32, #tpu.memory_space<vmem>>, vector<8x32xf32>
      %c0_101 = arith.constant 0 : index
      %c0_102 = arith.constant 0 : index
      %353 = vector.load %arg13[%c0_101, %c0_102] : memref<8x32xf32, #tpu.memory_space<vmem>>, vector<8x32xf32>
      tpu.vector_store %arg13[%c0_101, %c0_102], %352 {strides = array<i32>} : memref<8x32xf32, #tpu.memory_space<vmem>>, vector<8x32xf32>,
      %c0_103 = arith.constant 0 : index
      %c0_104 = arith.constant 0 : index
      %354 = vector.load %arg4[%c0_103, %c0_104] : memref<8x32xf32, #tpu.memory_space<vmem>>, vector<8x32xf32>
      %c0_105 = arith.constant 0 : index
      %c0_106 = arith.constant 0 : index
      %355 = vector.load %arg14[%c0_105, %c0_106] : memref<8x32xf32, #tpu.memory_space<vmem>>, vector<8x32xf32>
      tpu.vector_store %arg14[%c0_105, %c0_106], %354 {strides = array<i32>} : memref<8x32xf32, #tpu.memory_space<vmem>>, vector<8x32xf32>,
    } else {
    }
    %c0 = arith.constant 0 : index
    %c0_1 = arith.constant 0 : index
    %c0_2 = arith.constant 0 : index
    %3 = vector.load %arg2[%c0, %c0_1, %c0_2] : memref<8x8x16xf32, #tpu.memory_space<vmem>>, vector<8x8x16xf32>
    %4 = vector.shape_cast %3 : vector<8x8x16xf32> to vector<64x16xf32>
    %c0_3 = arith.constant 0 : index
    %c0_4 = arith.constant 0 : index
    %5 = vector.load %arg5[%c0_3, %c0_4] : memref<16x128xf32, #tpu.memory_space<vmem>>, vector<16x128xf32>
    %cst = arith.constant dense<0.000000e+00> : vector<64x128xf32>
    %6 = tpu.matmul %4, %5, %cst {dimension_numbers = #tpu.dot_dimension_numbers<[1], [0], [0], [1], [0, 0, 1, 1], [], []>} : vector<64x16xf32>, vector<16x128xf32>, vector<64x128xf32> -> vector<64x128xf32>
    %c0_5 = arith.constant 0 : index
    %c0_6 = arith.constant 0 : index
    %7 = vector.load %arg8[%c0_5, %c0_6] : memref<1x128xf32, #tpu.memory_space<vmem>>, vector<1x128xf32>
    %8 = vector.broadcast %7 : vector<1x128xf32> to vector<64x128xf32>
    %9 = arith.addf %6, %8 : vector<64x128xf32>
    %10 = vector.shape_cast %9 : vector<64x128xf32> to vector<8x8x128xf32>
    %c0_7 = arith.constant 0 : index
    %c0_8 = arith.constant 0 : index
    %c0_9 = arith.constant 0 : index
    %11 = vector.load %arg15[%c0_7, %c0_8, %c0_9] : memref<8x8x128xf32, #tpu.memory_space<vmem>>, vector<8x8x128xf32>
    tpu.vector_store %arg15[%c0_7, %c0_8, %c0_9], %10 {strides = array<i32>} : memref<8x8x128xf32, #tpu.memory_space<vmem>>, vector<8x8x128xf32>,
    %c0_10 = arith.constant 0 : index
    %c0_11 = arith.constant 0 : index
    %12 = vector.load %arg6[%c0_10, %c0_11] : memref<32x128xf32, #tpu.memory_space<vmem>>, vector<32x128xf32>
    %c0_12 = arith.constant 0 : index
    %c0_13 = arith.constant 0 : index
    %13 = vector.load %arg7[%c0_12, %c0_13] : memref<32x96xf32, #tpu.memory_space<vmem>>, vector<32x96xf32>
    %c0_14 = arith.constant 0 : index
    %c0_15 = arith.constant 0 : index
    %14 = vector.load %arg9[%c0_14, %c0_15] : memref<1x32xf32, #tpu.memory_space<vmem>>, vector<1x32xf32>
    %15 = vector.shape_cast %14 : vector<1x32xf32> to vector<1x32xf32>
    %16 = vector.broadcast %15 : vector<1x32xf32> to vector<8x32xf32>
    %c0_16 = arith.constant 0 : index
    %c0_17 = arith.constant 0 : index
    %17 = vector.load %arg13[%c0_16, %c0_17] : memref<8x32xf32, #tpu.memory_space<vmem>>, vector<8x32xf32>
    %c0_18 = arith.constant 0 : index
    %c0_19 = arith.constant 0 : index
    %18 = vector.load %arg14[%c0_18, %c0_19] : memref<8x32xf32, #tpu.memory_space<vmem>>, vector<8x32xf32>
    %c0_i32_20 = arith.constant 0 : i32
    %19 = arith.index_cast %c0_i32_20 : i32 to index
    %c0_21 = arith.constant 0 : index
    %c0_22 = arith.constant 0 : index
    %20 = vector.load %arg15[%19, %c0_21, %c0_22] : memref<8x8x128xf32, #tpu.memory_space<vmem>>, vector<1x8x128xf32>
    %21 = vector.shape_cast %20 : vector<1x8x128xf32> to vector<8x128xf32>
    %cst_23 = arith.constant dense<0.000000e+00> : vector<8x128xf32>
    %22 = tpu.matmul %17, %12, %cst_23 {dimension_numbers = #tpu.dot_dimension_numbers<[1], [0], [0], [1], [0, 0, 1, 1], [], []>} : vector<8x32xf32>, vector<32x128xf32>, vector<8x128xf32> -> vector<8x128xf32>
    %cst_24 = arith.constant dense<0.000000e+00> : vector<8x96xf32>
    %23 = tpu.matmul %18, %13, %cst_24 {dimension_numbers = #tpu.dot_dimension_numbers<[1], [0], [0], [1], [0, 0, 1, 1], [], []>} : vector<8x32xf32>, vector<32x96xf32>, vector<8x96xf32> -> vector<8x96xf32>
    %24 = vector.extract_strided_slice %21 {offsets = [0, 0], sizes = [8, 96], strides = [1, 1]} : vector<8x128xf32> to vector<8x96xf32>
    %25 = vector.extract_strided_slice %22 {offsets = [0, 0], sizes = [8, 96], strides = [1, 1]} : vector<8x128xf32> to vector<8x96xf32>
    %26 = arith.addf %24, %25 : vector<8x96xf32>
    %27 = arith.addf %26, %23 : vector<8x96xf32>
    %28 = vector.extract_strided_slice %27 {offsets = [0, 0], sizes = [8, 32], strides = [1, 1]} : vector<8x96xf32> to vector<8x32xf32>
    %29 = arith.negf %28 : vector<8x32xf32>
    %30 = math.exp %29 : vector<8x32xf32>
    %cst_25 = arith.constant 1.000000e+00 : f32
    %31 = vector.broadcast %cst_25 : f32 to vector<8x32xf32>
    %32 = arith.addf %31, %30 : vector<8x32xf32>
    %33 = arith.divf %31, %32 : vector<8x32xf32>
    %34 = vector.extract_strided_slice %27 {offsets = [0, 32], sizes = [8, 32], strides = [1, 1]} : vector<8x96xf32> to vector<8x32xf32>
    %35 = arith.negf %34 : vector<8x32xf32>
    %36 = math.exp %35 : vector<8x32xf32>
    %cst_26 = arith.constant 1.000000e+00 : f32
    %37 = vector.broadcast %cst_26 : f32 to vector<8x32xf32>
    %38 = arith.addf %37, %36 : vector<8x32xf32>
    %39 = arith.divf %37, %38 : vector<8x32xf32>
    %40 = vector.extract_strided_slice %27 {offsets = [0, 64], sizes = [8, 32], strides = [1, 1]} : vector<8x96xf32> to vector<8x32xf32>
    %41 = arith.negf %40 : vector<8x32xf32>
    %42 = math.exp %41 : vector<8x32xf32>
    %cst_27 = arith.constant 1.000000e+00 : f32
    %43 = vector.broadcast %cst_27 : f32 to vector<8x32xf32>
    %44 = arith.addf %43, %42 : vector<8x32xf32>
    %45 = arith.divf %43, %44 : vector<8x32xf32>
    %46 = vector.extract_strided_slice %22 {offsets = [0, 96], sizes = [8, 32], strides = [1, 1]} : vector<8x128xf32> to vector<8x32xf32>
    %47 = arith.addf %46, %16 : vector<8x32xf32>
    %48 = math.tanh %47 : vector<8x32xf32>
    %49 = arith.mulf %39, %18 : vector<8x32xf32>
    %50 = arith.mulf %33, %48 : vector<8x32xf32>
    %51 = arith.addf %49, %50 : vector<8x32xf32>
    %52 = math.tanh %51 : vector<8x32xf32>
    %53 = vector.extract_strided_slice %21 {offsets = [0, 96], sizes = [8, 32], strides = [1, 1]} : vector<8x128xf32> to vector<8x32xf32>
    %54 = arith.addf %52, %53 : vector<8x32xf32>
    %55 = arith.mulf %45, %54 : vector<8x32xf32>
    %56 = arith.index_cast %c0_i32_20 : i32 to index
    %c0_28 = arith.constant 0 : index
    %c0_29 = arith.constant 0 : index
    %57 = vector.load %arg10[%56, %c0_28, %c0_29] : memref<8x8x32xf32, #tpu.memory_space<vmem>>, vector<1x8x32xf32>
    %58 = vector.shape_cast %57 : vector<1x8x32xf32> to vector<8x32xf32>
    %59 = vector.shape_cast %55 : vector<8x32xf32> to vector<1x8x32xf32>
    tpu.vector_store %arg10[%56, %c0_28, %c0_29], %59 {strides = array<i32>} : memref<8x8x32xf32, #tpu.memory_space<vmem>>, vector<1x8x32xf32>,
    %c1_i32 = arith.constant 1 : i32
    %60 = arith.index_cast %c1_i32 : i32 to index
    %c0_30 = arith.constant 0 : index
    %c0_31 = arith.constant 0 : index
    %61 = vector.load %arg15[%60, %c0_30, %c0_31] : memref<8x8x128xf32, #tpu.memory_space<vmem>>, vector<1x8x128xf32>
    %62 = vector.shape_cast %61 : vector<1x8x128xf32> to vector<8x128xf32>
    %cst_32 = arith.constant dense<0.000000e+00> : vector<8x128xf32>
    %63 = tpu.matmul %55, %12, %cst_32 {dimension_numbers = #tpu.dot_dimension_numbers<[1], [0], [0], [1], [0, 0, 1, 1], [], []>} : vector<8x32xf32>, vector<32x128xf32>, vector<8x128xf32> -> vector<8x128xf32>
    %cst_33 = arith.constant dense<0.000000e+00> : vector<8x96xf32>
    %64 = tpu.matmul %51, %13, %cst_33 {dimension_numbers = #tpu.dot_dimension_numbers<[1], [0], [0], [1], [0, 0, 1, 1], [], []>} : vector<8x32xf32>, vector<32x96xf32>, vector<8x96xf32> -> vector<8x96xf32>
    %65 = vector.extract_strided_slice %62 {offsets = [0, 0], sizes = [8, 96], strides = [1, 1]} : vector<8x128xf32> to vector<8x96xf32>
    %66 = vector.extract_strided_slice %63 {offsets = [0, 0], sizes = [8, 96], strides = [1, 1]} : vector<8x128xf32> to vector<8x96xf32>
    %67 = arith.addf %65, %66 : vector<8x96xf32>
    %68 = arith.addf %67, %64 : vector<8x96xf32>
    %69 = vector.extract_strided_slice %68 {offsets = [0, 0], sizes = [8, 32], strides = [1, 1]} : vector<8x96xf32> to vector<8x32xf32>
    %70 = arith.negf %69 : vector<8x32xf32>
    %71 = math.exp %70 : vector<8x32xf32>
    %cst_34 = arith.constant 1.000000e+00 : f32
    %72 = vector.broadcast %cst_34 : f32 to vector<8x32xf32>
    %73 = arith.addf %72, %71 : vector<8x32xf32>
    %74 = arith.divf %72, %73 : vector<8x32xf32>
    %75 = vector.extract_strided_slice %68 {offsets = [0, 32], sizes = [8, 32], strides = [1, 1]} : vector<8x96xf32> to vector<8x32xf32>
    %76 = arith.negf %75 : vector<8x32xf32>
    %77 = math.exp %76 : vector<8x32xf32>
    %cst_35 = arith.constant 1.000000e+00 : f32
    %78 = vector.broadcast %cst_35 : f32 to vector<8x32xf32>
    %79 = arith.addf %78, %77 : vector<8x32xf32>
    %80 = arith.divf %78, %79 : vector<8x32xf32>
    %81 = vector.extract_strided_slice %68 {offsets = [0, 64], sizes = [8, 32], strides = [1, 1]} : vector<8x96xf32> to vector<8x32xf32>
    %82 = arith.negf %81 : vector<8x32xf32>
    %83 = math.exp %82 : vector<8x32xf32>
    %cst_36 = arith.constant 1.000000e+00 : f32
    %84 = vector.broadcast %cst_36 : f32 to vector<8x32xf32>
    %85 = arith.addf %84, %83 : vector<8x32xf32>
    %86 = arith.divf %84, %85 : vector<8x32xf32>
    %87 = vector.extract_strided_slice %63 {offsets = [0, 96], sizes = [8, 32], strides = [1, 1]} : vector<8x128xf32> to vector<8x32xf32>
    %88 = arith.addf %87, %16 : vector<8x32xf32>
    %89 = math.tanh %88 : vector<8x32xf32>
    %90 = arith.mulf %80, %51 : vector<8x32xf32>
    %91 = arith.mulf %74, %89 : vector<8x32xf32>
    %92 = arith.addf %90, %91 : vector<8x32xf32>
    %93 = math.tanh %92 : vector<8x32xf32>
    %94 = vector.extract_strided_slice %62 {offsets = [0, 96], sizes = [8, 32], strides = [1, 1]} : vector<8x128xf32> to vector<8x32xf32>
    %95 = arith.addf %93, %94 : vector<8x32xf32>
    %96 = arith.mulf %86, %95 : vector<8x32xf32>
    %97 = arith.index_cast %c1_i32 : i32 to index
    %c0_37 = arith.constant 0 : index
    %c0_38 = arith.constant 0 : index
    %98 = vector.load %arg10[%97, %c0_37, %c0_38] : memref<8x8x32xf32, #tpu.memory_space<vmem>>, vector<1x8x32xf32>
    %99 = vector.shape_cast %98 : vector<1x8x32xf32> to vector<8x32xf32>
    %100 = vector.shape_cast %96 : vector<8x32xf32> to vector<1x8x32xf32>
    tpu.vector_store %arg10[%97, %c0_37, %c0_38], %100 {strides = array<i32>} : memref<8x8x32xf32, #tpu.memory_space<vmem>>, vector<1x8x32xf32>,
    %c2_i32 = arith.constant 2 : i32
    %101 = arith.index_cast %c2_i32 : i32 to index
    %c0_39 = arith.constant 0 : index
    %c0_40 = arith.constant 0 : index
    %102 = vector.load %arg15[%101, %c0_39, %c0_40] : memref<8x8x128xf32, #tpu.memory_space<vmem>>, vector<1x8x128xf32>
    %103 = vector.shape_cast %102 : vector<1x8x128xf32> to vector<8x128xf32>
    %cst_41 = arith.constant dense<0.000000e+00> : vector<8x128xf32>
    %104 = tpu.matmul %96, %12, %cst_41 {dimension_numbers = #tpu.dot_dimension_numbers<[1], [0], [0], [1], [0, 0, 1, 1], [], []>} : vector<8x32xf32>, vector<32x128xf32>, vector<8x128xf32> -> vector<8x128xf32>
    %cst_42 = arith.constant dense<0.000000e+00> : vector<8x96xf32>
    %105 = tpu.matmul %92, %13, %cst_42 {dimension_numbers = #tpu.dot_dimension_numbers<[1], [0], [0], [1], [0, 0, 1, 1], [], []>} : vector<8x32xf32>, vector<32x96xf32>, vector<8x96xf32> -> vector<8x96xf32>
    %106 = vector.extract_strided_slice %103 {offsets = [0, 0], sizes = [8, 96], strides = [1, 1]} : vector<8x128xf32> to vector<8x96xf32>
    %107 = vector.extract_strided_slice %104 {offsets = [0, 0], sizes = [8, 96], strides = [1, 1]} : vector<8x128xf32> to vector<8x96xf32>
    %108 = arith.addf %106, %107 : vector<8x96xf32>
    %109 = arith.addf %108, %105 : vector<8x96xf32>
    %110 = vector.extract_strided_slice %109 {offsets = [0, 0], sizes = [8, 32], strides = [1, 1]} : vector<8x96xf32> to vector<8x32xf32>
    %111 = arith.negf %110 : vector<8x32xf32>
    %112 = math.exp %111 : vector<8x32xf32>
    %cst_43 = arith.constant 1.000000e+00 : f32
    %113 = vector.broadcast %cst_43 : f32 to vector<8x32xf32>
    %114 = arith.addf %113, %112 : vector<8x32xf32>
    %115 = arith.divf %113, %114 : vector<8x32xf32>
    %116 = vector.extract_strided_slice %109 {offsets = [0, 32], sizes = [8, 32], strides = [1, 1]} : vector<8x96xf32> to vector<8x32xf32>
    %117 = arith.negf %116 : vector<8x32xf32>
    %118 = math.exp %117 : vector<8x32xf32>
    %cst_44 = arith.constant 1.000000e+00 : f32
    %119 = vector.broadcast %cst_44 : f32 to vector<8x32xf32>
    %120 = arith.addf %119, %118 : vector<8x32xf32>
    %121 = arith.divf %119, %120 : vector<8x32xf32>
    %122 = vector.extract_strided_slice %109 {offsets = [0, 64], sizes = [8, 32], strides = [1, 1]} : vector<8x96xf32> to vector<8x32xf32>
    %123 = arith.negf %122 : vector<8x32xf32>
    %124 = math.exp %123 : vector<8x32xf32>
    %cst_45 = arith.constant 1.000000e+00 : f32
    %125 = vector.broadcast %cst_45 : f32 to vector<8x32xf32>
    %126 = arith.addf %125, %124 : vector<8x32xf32>
    %127 = arith.divf %125, %126 : vector<8x32xf32>
    %128 = vector.extract_strided_slice %104 {offsets = [0, 96], sizes = [8, 32], strides = [1, 1]} : vector<8x128xf32> to vector<8x32xf32>
    %129 = arith.addf %128, %16 : vector<8x32xf32>
    %130 = math.tanh %129 : vector<8x32xf32>
    %131 = arith.mulf %121, %92 : vector<8x32xf32>
    %132 = arith.mulf %115, %130 : vector<8x32xf32>
    %133 = arith.addf %131, %132 : vector<8x32xf32>
    %134 = math.tanh %133 : vector<8x32xf32>
    %135 = vector.extract_strided_slice %103 {offsets = [0, 96], sizes = [8, 32], strides = [1, 1]} : vector<8x128xf32> to vector<8x32xf32>
    %136 = arith.addf %134, %135 : vector<8x32xf32>
    %137 = arith.mulf %127, %136 : vector<8x32xf32>
    %138 = arith.index_cast %c2_i32 : i32 to index
    %c0_46 = arith.constant 0 : index
    %c0_47 = arith.constant 0 : index
    %139 = vector.load %arg10[%138, %c0_46, %c0_47] : memref<8x8x32xf32, #tpu.memory_space<vmem>>, vector<1x8x32xf32>
    %140 = vector.shape_cast %139 : vector<1x8x32xf32> to vector<8x32xf32>
    %141 = vector.shape_cast %137 : vector<8x32xf32> to vector<1x8x32xf32>
    tpu.vector_store %arg10[%138, %c0_46, %c0_47], %141 {strides = array<i32>} : memref<8x8x32xf32, #tpu.memory_space<vmem>>, vector<1x8x32xf32>,
    %c3_i32 = arith.constant 3 : i32
    %142 = arith.index_cast %c3_i32 : i32 to index
    %c0_48 = arith.constant 0 : index
    %c0_49 = arith.constant 0 : index
    %143 = vector.load %arg15[%142, %c0_48, %c0_49] : memref<8x8x128xf32, #tpu.memory_space<vmem>>, vector<1x8x128xf32>
    %144 = vector.shape_cast %143 : vector<1x8x128xf32> to vector<8x128xf32>
    %cst_50 = arith.constant dense<0.000000e+00> : vector<8x128xf32>
    %145 = tpu.matmul %137, %12, %cst_50 {dimension_numbers = #tpu.dot_dimension_numbers<[1], [0], [0], [1], [0, 0, 1, 1], [], []>} : vector<8x32xf32>, vector<32x128xf32>, vector<8x128xf32> -> vector<8x128xf32>
    %cst_51 = arith.constant dense<0.000000e+00> : vector<8x96xf32>
    %146 = tpu.matmul %133, %13, %cst_51 {dimension_numbers = #tpu.dot_dimension_numbers<[1], [0], [0], [1], [0, 0, 1, 1], [], []>} : vector<8x32xf32>, vector<32x96xf32>, vector<8x96xf32> -> vector<8x96xf32>
    %147 = vector.extract_strided_slice %144 {offsets = [0, 0], sizes = [8, 96], strides = [1, 1]} : vector<8x128xf32> to vector<8x96xf32>
    %148 = vector.extract_strided_slice %145 {offsets = [0, 0], sizes = [8, 96], strides = [1, 1]} : vector<8x128xf32> to vector<8x96xf32>
    %149 = arith.addf %147, %148 : vector<8x96xf32>
    %150 = arith.addf %149, %146 : vector<8x96xf32>
    %151 = vector.extract_strided_slice %150 {offsets = [0, 0], sizes = [8, 32], strides = [1, 1]} : vector<8x96xf32> to vector<8x32xf32>
    %152 = arith.negf %151 : vector<8x32xf32>
    %153 = math.exp %152 : vector<8x32xf32>
    %cst_52 = arith.constant 1.000000e+00 : f32
    %154 = vector.broadcast %cst_52 : f32 to vector<8x32xf32>
    %155 = arith.addf %154, %153 : vector<8x32xf32>
    %156 = arith.divf %154, %155 : vector<8x32xf32>
    %157 = vector.extract_strided_slice %150 {offsets = [0, 32], sizes = [8, 32], strides = [1, 1]} : vector<8x96xf32> to vector<8x32xf32>
    %158 = arith.negf %157 : vector<8x32xf32>
    %159 = math.exp %158 : vector<8x32xf32>
    %cst_53 = arith.constant 1.000000e+00 : f32
    %160 = vector.broadcast %cst_53 : f32 to vector<8x32xf32>
    %161 = arith.addf %160, %159 : vector<8x32xf32>
    %162 = arith.divf %160, %161 : vector<8x32xf32>
    %163 = vector.extract_strided_slice %150 {offsets = [0, 64], sizes = [8, 32], strides = [1, 1]} : vector<8x96xf32> to vector<8x32xf32>
    %164 = arith.negf %163 : vector<8x32xf32>
    %165 = math.exp %164 : vector<8x32xf32>
    %cst_54 = arith.constant 1.000000e+00 : f32
    %166 = vector.broadcast %cst_54 : f32 to vector<8x32xf32>
    %167 = arith.addf %166, %165 : vector<8x32xf32>
    %168 = arith.divf %166, %167 : vector<8x32xf32>
    %169 = vector.extract_strided_slice %145 {offsets = [0, 96], sizes = [8, 32], strides = [1, 1]} : vector<8x128xf32> to vector<8x32xf32>
    %170 = arith.addf %169, %16 : vector<8x32xf32>
    %171 = math.tanh %170 : vector<8x32xf32>
    %172 = arith.mulf %162, %133 : vector<8x32xf32>
    %173 = arith.mulf %156, %171 : vector<8x32xf32>
    %174 = arith.addf %172, %173 : vector<8x32xf32>
    %175 = math.tanh %174 : vector<8x32xf32>
    %176 = vector.extract_strided_slice %144 {offsets = [0, 96], sizes = [8, 32], strides = [1, 1]} : vector<8x128xf32> to vector<8x32xf32>
    %177 = arith.addf %175, %176 : vector<8x32xf32>
    %178 = arith.mulf %168, %177 : vector<8x32xf32>
    %179 = arith.index_cast %c3_i32 : i32 to index
    %c0_55 = arith.constant 0 : index
    %c0_56 = arith.constant 0 : index
    %180 = vector.load %arg10[%179, %c0_55, %c0_56] : memref<8x8x32xf32, #tpu.memory_space<vmem>>, vector<1x8x32xf32>
    %181 = vector.shape_cast %180 : vector<1x8x32xf32> to vector<8x32xf32>
    %182 = vector.shape_cast %178 : vector<8x32xf32> to vector<1x8x32xf32>
    tpu.vector_store %arg10[%179, %c0_55, %c0_56], %182 {strides = array<i32>} : memref<8x8x32xf32, #tpu.memory_space<vmem>>, vector<1x8x32xf32>,
    %c4_i32 = arith.constant 4 : i32
    %183 = arith.index_cast %c4_i32 : i32 to index
    %c0_57 = arith.constant 0 : index
    %c0_58 = arith.constant 0 : index
    %184 = vector.load %arg15[%183, %c0_57, %c0_58] : memref<8x8x128xf32, #tpu.memory_space<vmem>>, vector<1x8x128xf32>
    %185 = vector.shape_cast %184 : vector<1x8x128xf32> to vector<8x128xf32>
    %cst_59 = arith.constant dense<0.000000e+00> : vector<8x128xf32>
    %186 = tpu.matmul %178, %12, %cst_59 {dimension_numbers = #tpu.dot_dimension_numbers<[1], [0], [0], [1], [0, 0, 1, 1], [], []>} : vector<8x32xf32>, vector<32x128xf32>, vector<8x128xf32> -> vector<8x128xf32>
    %cst_60 = arith.constant dense<0.000000e+00> : vector<8x96xf32>
    %187 = tpu.matmul %174, %13, %cst_60 {dimension_numbers = #tpu.dot_dimension_numbers<[1], [0], [0], [1], [0, 0, 1, 1], [], []>} : vector<8x32xf32>, vector<32x96xf32>, vector<8x96xf32> -> vector<8x96xf32>
    %188 = vector.extract_strided_slice %185 {offsets = [0, 0], sizes = [8, 96], strides = [1, 1]} : vector<8x128xf32> to vector<8x96xf32>
    %189 = vector.extract_strided_slice %186 {offsets = [0, 0], sizes = [8, 96], strides = [1, 1]} : vector<8x128xf32> to vector<8x96xf32>
    %190 = arith.addf %188, %189 : vector<8x96xf32>
    %191 = arith.addf %190, %187 : vector<8x96xf32>
    %192 = vector.extract_strided_slice %191 {offsets = [0, 0], sizes = [8, 32], strides = [1, 1]} : vector<8x96xf32> to vector<8x32xf32>
    %193 = arith.negf %192 : vector<8x32xf32>
    %194 = math.exp %193 : vector<8x32xf32>
    %cst_61 = arith.constant 1.000000e+00 : f32
    %195 = vector.broadcast %cst_61 : f32 to vector<8x32xf32>
    %196 = arith.addf %195, %194 : vector<8x32xf32>
    %197 = arith.divf %195, %196 : vector<8x32xf32>
    %198 = vector.extract_strided_slice %191 {offsets = [0, 32], sizes = [8, 32], strides = [1, 1]} : vector<8x96xf32> to vector<8x32xf32>
    %199 = arith.negf %198 : vector<8x32xf32>
    %200 = math.exp %199 : vector<8x32xf32>
    %cst_62 = arith.constant 1.000000e+00 : f32
    %201 = vector.broadcast %cst_62 : f32 to vector<8x32xf32>
    %202 = arith.addf %201, %200 : vector<8x32xf32>
    %203 = arith.divf %201, %202 : vector<8x32xf32>
    %204 = vector.extract_strided_slice %191 {offsets = [0, 64], sizes = [8, 32], strides = [1, 1]} : vector<8x96xf32> to vector<8x32xf32>
    %205 = arith.negf %204 : vector<8x32xf32>
    %206 = math.exp %205 : vector<8x32xf32>
    %cst_63 = arith.constant 1.000000e+00 : f32
    %207 = vector.broadcast %cst_63 : f32 to vector<8x32xf32>
    %208 = arith.addf %207, %206 : vector<8x32xf32>
    %209 = arith.divf %207, %208 : vector<8x32xf32>
    %210 = vector.extract_strided_slice %186 {offsets = [0, 96], sizes = [8, 32], strides = [1, 1]} : vector<8x128xf32> to vector<8x32xf32>
    %211 = arith.addf %210, %16 : vector<8x32xf32>
    %212 = math.tanh %211 : vector<8x32xf32>
    %213 = arith.mulf %203, %174 : vector<8x32xf32>
    %214 = arith.mulf %197, %212 : vector<8x32xf32>
    %215 = arith.addf %213, %214 : vector<8x32xf32>
    %216 = math.tanh %215 : vector<8x32xf32>
    %217 = vector.extract_strided_slice %185 {offsets = [0, 96], sizes = [8, 32], strides = [1, 1]} : vector<8x128xf32> to vector<8x32xf32>
    %218 = arith.addf %216, %217 : vector<8x32xf32>
    %219 = arith.mulf %209, %218 : vector<8x32xf32>
    %220 = arith.index_cast %c4_i32 : i32 to index
    %c0_64 = arith.constant 0 : index
    %c0_65 = arith.constant 0 : index
    %221 = vector.load %arg10[%220, %c0_64, %c0_65] : memref<8x8x32xf32, #tpu.memory_space<vmem>>, vector<1x8x32xf32>
    %222 = vector.shape_cast %221 : vector<1x8x32xf32> to vector<8x32xf32>
    %223 = vector.shape_cast %219 : vector<8x32xf32> to vector<1x8x32xf32>
    tpu.vector_store %arg10[%220, %c0_64, %c0_65], %223 {strides = array<i32>} : memref<8x8x32xf32, #tpu.memory_space<vmem>>, vector<1x8x32xf32>,
    %c5_i32 = arith.constant 5 : i32
    %224 = arith.index_cast %c5_i32 : i32 to index
    %c0_66 = arith.constant 0 : index
    %c0_67 = arith.constant 0 : index
    %225 = vector.load %arg15[%224, %c0_66, %c0_67] : memref<8x8x128xf32, #tpu.memory_space<vmem>>, vector<1x8x128xf32>
    %226 = vector.shape_cast %225 : vector<1x8x128xf32> to vector<8x128xf32>
    %cst_68 = arith.constant dense<0.000000e+00> : vector<8x128xf32>
    %227 = tpu.matmul %219, %12, %cst_68 {dimension_numbers = #tpu.dot_dimension_numbers<[1], [0], [0], [1], [0, 0, 1, 1], [], []>} : vector<8x32xf32>, vector<32x128xf32>, vector<8x128xf32> -> vector<8x128xf32>
    %cst_69 = arith.constant dense<0.000000e+00> : vector<8x96xf32>
    %228 = tpu.matmul %215, %13, %cst_69 {dimension_numbers = #tpu.dot_dimension_numbers<[1], [0], [0], [1], [0, 0, 1, 1], [], []>} : vector<8x32xf32>, vector<32x96xf32>, vector<8x96xf32> -> vector<8x96xf32>
    %229 = vector.extract_strided_slice %226 {offsets = [0, 0], sizes = [8, 96], strides = [1, 1]} : vector<8x128xf32> to vector<8x96xf32>
    %230 = vector.extract_strided_slice %227 {offsets = [0, 0], sizes = [8, 96], strides = [1, 1]} : vector<8x128xf32> to vector<8x96xf32>
    %231 = arith.addf %229, %230 : vector<8x96xf32>
    %232 = arith.addf %231, %228 : vector<8x96xf32>
    %233 = vector.extract_strided_slice %232 {offsets = [0, 0], sizes = [8, 32], strides = [1, 1]} : vector<8x96xf32> to vector<8x32xf32>
    %234 = arith.negf %233 : vector<8x32xf32>
    %235 = math.exp %234 : vector<8x32xf32>
    %cst_70 = arith.constant 1.000000e+00 : f32
    %236 = vector.broadcast %cst_70 : f32 to vector<8x32xf32>
    %237 = arith.addf %236, %235 : vector<8x32xf32>
    %238 = arith.divf %236, %237 : vector<8x32xf32>
    %239 = vector.extract_strided_slice %232 {offsets = [0, 32], sizes = [8, 32], strides = [1, 1]} : vector<8x96xf32> to vector<8x32xf32>
    %240 = arith.negf %239 : vector<8x32xf32>
    %241 = math.exp %240 : vector<8x32xf32>
    %cst_71 = arith.constant 1.000000e+00 : f32
    %242 = vector.broadcast %cst_71 : f32 to vector<8x32xf32>
    %243 = arith.addf %242, %241 : vector<8x32xf32>
    %244 = arith.divf %242, %243 : vector<8x32xf32>
    %245 = vector.extract_strided_slice %232 {offsets = [0, 64], sizes = [8, 32], strides = [1, 1]} : vector<8x96xf32> to vector<8x32xf32>
    %246 = arith.negf %245 : vector<8x32xf32>
    %247 = math.exp %246 : vector<8x32xf32>
    %cst_72 = arith.constant 1.000000e+00 : f32
    %248 = vector.broadcast %cst_72 : f32 to vector<8x32xf32>
    %249 = arith.addf %248, %247 : vector<8x32xf32>
    %250 = arith.divf %248, %249 : vector<8x32xf32>
    %251 = vector.extract_strided_slice %227 {offsets = [0, 96], sizes = [8, 32], strides = [1, 1]} : vector<8x128xf32> to vector<8x32xf32>
    %252 = arith.addf %251, %16 : vector<8x32xf32>
    %253 = math.tanh %252 : vector<8x32xf32>
    %254 = arith.mulf %244, %215 : vector<8x32xf32>
    %255 = arith.mulf %238, %253 : vector<8x32xf32>
    %256 = arith.addf %254, %255 : vector<8x32xf32>
    %257 = math.tanh %256 : vector<8x32xf32>
    %258 = vector.extract_strided_slice %226 {offsets = [0, 96], sizes = [8, 32], strides = [1, 1]} : vector<8x128xf32> to vector<8x32xf32>
    %259 = arith.addf %257, %258 : vector<8x32xf32>
    %260 = arith.mulf %250, %259 : vector<8x32xf32>
    %261 = arith.index_cast %c5_i32 : i32 to index
    %c0_73 = arith.constant 0 : index
    %c0_74 = arith.constant 0 : index
    %262 = vector.load %arg10[%261, %c0_73, %c0_74] : memref<8x8x32xf32, #tpu.memory_space<vmem>>, vector<1x8x32xf32>
    %263 = vector.shape_cast %262 : vector<1x8x32xf32> to vector<8x32xf32>
    %264 = vector.shape_cast %260 : vector<8x32xf32> to vector<1x8x32xf32>
    tpu.vector_store %arg10[%261, %c0_73, %c0_74], %264 {strides = array<i32>} : memref<8x8x32xf32, #tpu.memory_space<vmem>>, vector<1x8x32xf32>,
    %c6_i32 = arith.constant 6 : i32
    %265 = arith.index_cast %c6_i32 : i32 to index
    %c0_75 = arith.constant 0 : index
    %c0_76 = arith.constant 0 : index
    %266 = vector.load %arg15[%265, %c0_75, %c0_76] : memref<8x8x128xf32, #tpu.memory_space<vmem>>, vector<1x8x128xf32>
    %267 = vector.shape_cast %266 : vector<1x8x128xf32> to vector<8x128xf32>
    %cst_77 = arith.constant dense<0.000000e+00> : vector<8x128xf32>
    %268 = tpu.matmul %260, %12, %cst_77 {dimension_numbers = #tpu.dot_dimension_numbers<[1], [0], [0], [1], [0, 0, 1, 1], [], []>} : vector<8x32xf32>, vector<32x128xf32>, vector<8x128xf32> -> vector<8x128xf32>
    %cst_78 = arith.constant dense<0.000000e+00> : vector<8x96xf32>
    %269 = tpu.matmul %256, %13, %cst_78 {dimension_numbers = #tpu.dot_dimension_numbers<[1], [0], [0], [1], [0, 0, 1, 1], [], []>} : vector<8x32xf32>, vector<32x96xf32>, vector<8x96xf32> -> vector<8x96xf32>
    %270 = vector.extract_strided_slice %267 {offsets = [0, 0], sizes = [8, 96], strides = [1, 1]} : vector<8x128xf32> to vector<8x96xf32>
    %271 = vector.extract_strided_slice %268 {offsets = [0, 0], sizes = [8, 96], strides = [1, 1]} : vector<8x128xf32> to vector<8x96xf32>
    %272 = arith.addf %270, %271 : vector<8x96xf32>
    %273 = arith.addf %272, %269 : vector<8x96xf32>
    %274 = vector.extract_strided_slice %273 {offsets = [0, 0], sizes = [8, 32], strides = [1, 1]} : vector<8x96xf32> to vector<8x32xf32>
    %275 = arith.negf %274 : vector<8x32xf32>
    %276 = math.exp %275 : vector<8x32xf32>
    %cst_79 = arith.constant 1.000000e+00 : f32
    %277 = vector.broadcast %cst_79 : f32 to vector<8x32xf32>
    %278 = arith.addf %277, %276 : vector<8x32xf32>
    %279 = arith.divf %277, %278 : vector<8x32xf32>
    %280 = vector.extract_strided_slice %273 {offsets = [0, 32], sizes = [8, 32], strides = [1, 1]} : vector<8x96xf32> to vector<8x32xf32>
    %281 = arith.negf %280 : vector<8x32xf32>
    %282 = math.exp %281 : vector<8x32xf32>
    %cst_80 = arith.constant 1.000000e+00 : f32
    %283 = vector.broadcast %cst_80 : f32 to vector<8x32xf32>
    %284 = arith.addf %283, %282 : vector<8x32xf32>
    %285 = arith.divf %283, %284 : vector<8x32xf32>
    %286 = vector.extract_strided_slice %273 {offsets = [0, 64], sizes = [8, 32], strides = [1, 1]} : vector<8x96xf32> to vector<8x32xf32>
    %287 = arith.negf %286 : vector<8x32xf32>
    %288 = math.exp %287 : vector<8x32xf32>
    %cst_81 = arith.constant 1.000000e+00 : f32
    %289 = vector.broadcast %cst_81 : f32 to vector<8x32xf32>
    %290 = arith.addf %289, %288 : vector<8x32xf32>
    %291 = arith.divf %289, %290 : vector<8x32xf32>
    %292 = vector.extract_strided_slice %268 {offsets = [0, 96], sizes = [8, 32], strides = [1, 1]} : vector<8x128xf32> to vector<8x32xf32>
    %293 = arith.addf %292, %16 : vector<8x32xf32>
    %294 = math.tanh %293 : vector<8x32xf32>
    %295 = arith.mulf %285, %256 : vector<8x32xf32>
    %296 = arith.mulf %279, %294 : vector<8x32xf32>
    %297 = arith.addf %295, %296 : vector<8x32xf32>
    %298 = math.tanh %297 : vector<8x32xf32>
    %299 = vector.extract_strided_slice %267 {offsets = [0, 96], sizes = [8, 32], strides = [1, 1]} : vector<8x128xf32> to vector<8x32xf32>
    %300 = arith.addf %298, %299 : vector<8x32xf32>
    %301 = arith.mulf %291, %300 : vector<8x32xf32>
    %302 = arith.index_cast %c6_i32 : i32 to index
    %c0_82 = arith.constant 0 : index
    %c0_83 = arith.constant 0 : index
    %303 = vector.load %arg10[%302, %c0_82, %c0_83] : memref<8x8x32xf32, #tpu.memory_space<vmem>>, vector<1x8x32xf32>
    %304 = vector.shape_cast %303 : vector<1x8x32xf32> to vector<8x32xf32>
    %305 = vector.shape_cast %301 : vector<8x32xf32> to vector<1x8x32xf32>
    tpu.vector_store %arg10[%302, %c0_82, %c0_83], %305 {strides = array<i32>} : memref<8x8x32xf32, #tpu.memory_space<vmem>>, vector<1x8x32xf32>,
    %c7_i32 = arith.constant 7 : i32
    %306 = arith.index_cast %c7_i32 : i32 to index
    %c0_84 = arith.constant 0 : index
    %c0_85 = arith.constant 0 : index
    %307 = vector.load %arg15[%306, %c0_84, %c0_85] : memref<8x8x128xf32, #tpu.memory_space<vmem>>, vector<1x8x128xf32>
    %308 = vector.shape_cast %307 : vector<1x8x128xf32> to vector<8x128xf32>
    %cst_86 = arith.constant dense<0.000000e+00> : vector<8x128xf32>
    %309 = tpu.matmul %301, %12, %cst_86 {dimension_numbers = #tpu.dot_dimension_numbers<[1], [0], [0], [1], [0, 0, 1, 1], [], []>} : vector<8x32xf32>, vector<32x128xf32>, vector<8x128xf32> -> vector<8x128xf32>
    %cst_87 = arith.constant dense<0.000000e+00> : vector<8x96xf32>
    %310 = tpu.matmul %297, %13, %cst_87 {dimension_numbers = #tpu.dot_dimension_numbers<[1], [0], [0], [1], [0, 0, 1, 1], [], []>} : vector<8x32xf32>, vector<32x96xf32>, vector<8x96xf32> -> vector<8x96xf32>
    %311 = vector.extract_strided_slice %308 {offsets = [0, 0], sizes = [8, 96], strides = [1, 1]} : vector<8x128xf32> to vector<8x96xf32>
    %312 = vector.extract_strided_slice %309 {offsets = [0, 0], sizes = [8, 96], strides = [1, 1]} : vector<8x128xf32> to vector<8x96xf32>
    %313 = arith.addf %311, %312 : vector<8x96xf32>
    %314 = arith.addf %313, %310 : vector<8x96xf32>
    %315 = vector.extract_strided_slice %314 {offsets = [0, 0], sizes = [8, 32], strides = [1, 1]} : vector<8x96xf32> to vector<8x32xf32>
    %316 = arith.negf %315 : vector<8x32xf32>
    %317 = math.exp %316 : vector<8x32xf32>
    %cst_88 = arith.constant 1.000000e+00 : f32
    %318 = vector.broadcast %cst_88 : f32 to vector<8x32xf32>
    %319 = arith.addf %318, %317 : vector<8x32xf32>
    %320 = arith.divf %318, %319 : vector<8x32xf32>
    %321 = vector.extract_strided_slice %314 {offsets = [0, 32], sizes = [8, 32], strides = [1, 1]} : vector<8x96xf32> to vector<8x32xf32>
    %322 = arith.negf %321 : vector<8x32xf32>
    %323 = math.exp %322 : vector<8x32xf32>
    %cst_89 = arith.constant 1.000000e+00 : f32
    %324 = vector.broadcast %cst_89 : f32 to vector<8x32xf32>
    %325 = arith.addf %324, %323 : vector<8x32xf32>
    %326 = arith.divf %324, %325 : vector<8x32xf32>
    %327 = vector.extract_strided_slice %314 {offsets = [0, 64], sizes = [8, 32], strides = [1, 1]} : vector<8x96xf32> to vector<8x32xf32>
    %328 = arith.negf %327 : vector<8x32xf32>
    %329 = math.exp %328 : vector<8x32xf32>
    %cst_90 = arith.constant 1.000000e+00 : f32
    %330 = vector.broadcast %cst_90 : f32 to vector<8x32xf32>
    %331 = arith.addf %330, %329 : vector<8x32xf32>
    %332 = arith.divf %330, %331 : vector<8x32xf32>
    %333 = vector.extract_strided_slice %309 {offsets = [0, 96], sizes = [8, 32], strides = [1, 1]} : vector<8x128xf32> to vector<8x32xf32>
    %334 = arith.addf %333, %16 : vector<8x32xf32>
    %335 = math.tanh %334 : vector<8x32xf32>
    %336 = arith.mulf %326, %297 : vector<8x32xf32>
    %337 = arith.mulf %320, %335 : vector<8x32xf32>
    %338 = arith.addf %336, %337 : vector<8x32xf32>
    %339 = math.tanh %338 : vector<8x32xf32>
    %340 = vector.extract_strided_slice %308 {offsets = [0, 96], sizes = [8, 32], strides = [1, 1]} : vector<8x128xf32> to vector<8x32xf32>
    %341 = arith.addf %339, %340 : vector<8x32xf32>
    %342 = arith.mulf %332, %341 : vector<8x32xf32>
    %343 = arith.index_cast %c7_i32 : i32 to index
    %c0_91 = arith.constant 0 : index
    %c0_92 = arith.constant 0 : index
    %344 = vector.load %arg10[%343, %c0_91, %c0_92] : memref<8x8x32xf32, #tpu.memory_space<vmem>>, vector<1x8x32xf32>
    %345 = vector.shape_cast %344 : vector<1x8x32xf32> to vector<8x32xf32>
    %346 = vector.shape_cast %342 : vector<8x32xf32> to vector<1x8x32xf32>
    tpu.vector_store %arg10[%343, %c0_91, %c0_92], %346 {strides = array<i32>} : memref<8x8x32xf32, #tpu.memory_space<vmem>>, vector<1x8x32xf32>,
    %c8_i32 = arith.constant 8 : i32
    %c0_93 = arith.constant 0 : index
    %c0_94 = arith.constant 0 : index
    %347 = vector.load %arg13[%c0_93, %c0_94] : memref<8x32xf32, #tpu.memory_space<vmem>>, vector<8x32xf32>
    tpu.vector_store %arg13[%c0_93, %c0_94], %342 {strides = array<i32>} : memref<8x32xf32, #tpu.memory_space<vmem>>, vector<8x32xf32>,
    %c0_95 = arith.constant 0 : index
    %c0_96 = arith.constant 0 : index
    %348 = vector.load %arg14[%c0_95, %c0_96] : memref<8x32xf32, #tpu.memory_space<vmem>>, vector<8x32xf32>
    tpu.vector_store %arg14[%c0_95, %c0_96], %338 {strides = array<i32>} : memref<8x32xf32, #tpu.memory_space<vmem>>, vector<8x32xf32>,
    %c0_i32_97 = arith.constant 0 : i32
    %349 = arith.cmpi eq, %arg1, %c0_i32_97 : i32
    %350 = arith.extui %349 : i1 to i32
    %c0_i32_98 = arith.constant 0 : i32
    %351 = arith.cmpi ne, %350, %c0_i32_98 : i32
    scf.if %351 {
      %c0_99 = arith.constant 0 : index
      %c0_100 = arith.constant 0 : index
      %352 = vector.load %arg11[%c0_99, %c0_100] : memref<8x32xf32, #tpu.memory_space<vmem>>, vector<8x32xf32>
      tpu.vector_store %arg11[%c0_99, %c0_100], %342 {strides = array<i32>} : memref<8x32xf32, #tpu.memory_space<vmem>>, vector<8x32xf32>,
      %c0_101 = arith.constant 0 : index
      %c0_102 = arith.constant 0 : index
      %353 = vector.load %arg12[%c0_101, %c0_102] : memref<8x32xf32, #tpu.memory_space<vmem>>, vector<8x32xf32>
      tpu.vector_store %arg12[%c0_101, %c0_102], %338 {strides = array<i32>} : memref<8x32xf32, #tpu.memory_space<vmem>>, vector<8x32xf32>,
    } else {
    }
    return
  }
  func.func @transform_0(%arg0: i32, %arg1: i32) -> (i32, i32, i32) {
    %c0_i32 = arith.constant 0 : i32
    %c0_i32_0 = arith.constant 0 : i32
    return %arg1, %arg0, %c0_i32 : i32, i32, i32
  }
  func.func @transform_1(%arg0: i32, %arg1: i32) -> (i32, i32) {
    %c0_i32 = arith.constant 0 : i32
    %c0_i32_0 = arith.constant 0 : i32
    return %arg0, %c0_i32 : i32, i32
  }
  func.func @transform_2(%arg0: i32, %arg1: i32) -> (i32, i32) {
    %c0_i32 = arith.constant 0 : i32
    %c0_i32_0 = arith.constant 0 : i32
    return %arg0, %c0_i32 : i32, i32
  }
  func.func @transform_3(%arg0: i32, %arg1: i32) -> (i32, i32) {
    %c0_i32 = arith.constant 0 : i32
    %c0_i32_0 = arith.constant 0 : i32
    %c0_i32_1 = arith.constant 0 : i32
    return %c0_i32, %c0_i32_0 : i32, i32
  }
  func.func @transform_4(%arg0: i32, %arg1: i32) -> (i32, i32) {
    %c0_i32 = arith.constant 0 : i32
    %c0_i32_0 = arith.constant 0 : i32
    %c0_i32_1 = arith.constant 0 : i32
    return %c0_i32, %c0_i32_0 : i32, i32
  }
  func.func @transform_5(%arg0: i32, %arg1: i32) -> (i32, i32) {
    %c0_i32 = arith.constant 0 : i32
    %c0_i32_0 = arith.constant 0 : i32
    %c0_i32_1 = arith.constant 0 : i32
    return %c0_i32, %c0_i32_0 : i32, i32
  }
  func.func @transform_6(%arg0: i32, %arg1: i32) -> (i32, i32) {
    %c0_i32 = arith.constant 0 : i32
    %c0_i32_0 = arith.constant 0 : i32
    %c0_i32_1 = arith.constant 0 : i32
    return %c0_i32, %c0_i32_0 : i32, i32
  }
  func.func @transform_7(%arg0: i32, %arg1: i32) -> (i32, i32) {
    %c0_i32 = arith.constant 0 : i32
    %c0_i32_0 = arith.constant 0 : i32
    %c0_i32_1 = arith.constant 0 : i32
    return %c0_i32, %c0_i32_0 : i32, i32
  }
  func.func @transform_8(%arg0: i32, %arg1: i32) -> (i32, i32, i32) {
    %c0_i32 = arith.constant 0 : i32
    %c0_i32_0 = arith.constant 0 : i32
    return %arg1, %arg0, %c0_i32 : i32, i32, i32
  }
  func.func @transform_9(%arg0: i32, %arg1: i32) -> (i32, i32) {
    %c0_i32 = arith.constant 0 : i32
    %c0_i32_0 = arith.constant 0 : i32
    return %arg0, %c0_i32 : i32, i32
  }
  func.func @transform_10(%arg0: i32, %arg1: i32) -> (i32, i32) {
    %c0_i32 = arith.constant 0 : i32
    %c0_i32_0 = arith.constant 0 : i32
    return %arg0, %c0_i32 : i32, i32
  }
}

</mosaic_0001>

<bundles_post_ra>
// kernel: tpu_custom_call.1
= control target key start
LH: loop header
LB: loop body
LE: loop exit
PB: predicated region body
PF: predicated region fallthrough
CT: control target
= control target key end

     0   :  { %16 = vsyncpa [#allocation6], 0  ;;  %s3010_s0 = inlined_call_operand.hbm [shape: f32[8,8,16], index: 0, kind: input, shape index: {}]   ;;  %s3011_s1 = inlined_call_operand.hbm [shape: f32[8,32], index: 1, kind: input, shape index: {}]   ;;  %s3012_s2 = inlined_call_operand.hbm [shape: f32[8,32], index: 2, kind: input, shape index: {}]   ;;  %s3013_s3 = inlined_call_operand.hbm [shape: f32[16,128], index: 3, kind: input, shape index: {}]   ;;  %s3014_s4 = inlined_call_operand.hbm [shape: f32[32,128], index: 4, kind: input, shape index: {}]   ;;  %s3015_s5 = inlined_call_operand.hbm [shape: f32[32,96], index: 5, kind: input, shape index: {}]   ;;  %s3016_s6 = inlined_call_operand.vmem [shape: f32[1,128], index: 6, kind: input, shape index: {}]   ;;  %s3017_s7 = inlined_call_operand.vmem [shape: f32[1,32], index: 7, kind: input, shape index: {}]   ;;  %s3018_s8 = inlined_call_operand.hbm [shape: f32[8,8,32], index: 8, kind: output, shape index: {0}]   ;;  %s3019_s9 = inlined_call_operand.hbm [shape: f32[8,32], index: 9, kind: output, shape index: {1}]   ;;  %s3020_s10 = inlined_call_operand.hbm [shape: f32[8,32], index: 10, kind: output, shape index: {2}]  }
   0x1   :  { %17 = vsyncpa [#allocation9], 0 }
   0x2   :  { %18 = vsyncpa [#allocation12], 0 }
   0x3   :  { %19 = vsyncpa [#allocation15], 0 }
   0x4   :  { %20 = vsyncpa [#allocation7], 0 }
   0x5   :  { %21 = vsyncpa [#allocation18], 0  ;;  %s2557_s13 = smov [#allocation8]   ;;  %s2347_s17 = scalar_lea.hbm %s3011_s1, 128 }
   0x6   :  { %s40_s14 = sshll.u32 %s2557_s13, 4  ;;  %p2348_p0 = scmp.ne.s32.totalorder %s3011_s1, %s2347_s17  ;;  %s41_s14 = int_to_ptr.vmem [resolvable:$true] %s40_s14 }
   0x7   :  { %p2351_p1 = scmp.lt.u32.totalorder %s2347_s17, %s3011_s1 }
   0x9   :  { %p2353_p2 = pnand %p2351_p1, %p2348_p0 }
   0xb   :  { %2356 = shalt.err (!%p2353_p2)
}
   0xc   :  { %s2357_s22 = scalar_lea.vmem %s41_s14, 128  ;;  %p2362_p4 = scmp.lt.s32.totalorder %s41_s14, %s41_s14 }
   0xd   :  { %p2358_p3 = scmp.ne.s32.totalorder %s41_s14, %s2357_s22  ;;  %p2363_p5 = scmp.lt.s32.totalorder %s2357_s22, %s2357_s22 }
   0xf   :  { %p2364_p6 = por %p2363_p5, %p2362_p4 }
  0x11   :  { %p2365_p7 = pnand %p2364_p6, %p2358_p3 }
  0x13   :  { %2368 = shalt.err (!%p2365_p7)
}
  0x14   :  { %43 = dma.hbm_to_vmem [thread:$0]  %s3011_s1, 128, %s41_s14, [#allocation9]  }
  0x15   :  { %s2558_s25 = smov [#allocation11]   ;;  %s2559_s27 = smov [#allocation5]  }
  0x16   :  { %s59_s26 = sshll.u32 %s2558_s25, 4  ;;  %s27_s28 = sshll.u32 %s2559_s27, 4  ;;  %s60_s26 = int_to_ptr.vmem [resolvable:$true] %s59_s26  ;;  %s28_s28 = int_to_ptr.vmem [resolvable:$true] %s27_s28 }
  0x17   :  { %s2369_s11 = scalar_lea.hbm %s3013_s3, 256 }
  0x18   :  { %p2370_p8 = scmp.ne.s32.totalorder %s3013_s3, %s2369_s11  ;;  %p2373_p9 = scmp.lt.u32.totalorder %s2369_s11, %s3013_s3 }
  0x1a   :  { %p2375_p10 = pnand %p2373_p9, %p2370_p8 }
  0x1c   :  { %2378 = shalt.err (!%p2375_p10)
}
  0x1d   :  { %s2379_s1 = scalar_lea.vmem %s60_s26, 256  ;;  %p2384_p12 = scmp.lt.s32.totalorder %s60_s26, %s60_s26 }
  0x1e   :  { %p2380_p11 = scmp.ne.s32.totalorder %s60_s26, %s2379_s1  ;;  %p2385_p13 = scmp.lt.s32.totalorder %s2379_s1, %s2379_s1 }
  0x20   :  { %p2386_p0 = por %p2385_p13, %p2384_p12 }
  0x22   :  { %p2387_p1 = pnand %p2386_p0, %p2380_p11 }
  0x24   :  { %2390 = shalt.err (!%p2387_p1)
}
  0x25   :  { %s2560_s14 = smov 128   ;;  %s2561_s17 = smov 8  }
  0x26   :  { %65 = dma.hbm_to_vmem [thread:$0]  %s3013_s3, 256, %s60_s26, [#allocation12], %s2560_s14, %s2560_s14, %s2561_s17  }
  0x27   :  { %s2391_s22 = scalar_lea.hbm %s3010_s0, 1024 }
  0x28   :  { %p2392_p2 = scmp.ne.s32.totalorder %s3010_s0, %s2391_s22  ;;  %p2395_p3 = scmp.lt.u32.totalorder %s2391_s22, %s3010_s0 }
  0x2a   :  { %p2397_p4 = pnand %p2395_p3, %p2392_p2 }
  0x2c   :  { %2400 = shalt.err (!%p2397_p4)
}
  0x2d   :  { %s2401_s29 = scalar_lea.vmem %s28_s28, 1024  ;;  %p2406_p6 = scmp.lt.s32.totalorder %s28_s28, %s28_s28 }
  0x2e   :  { %p2402_p5 = scmp.ne.s32.totalorder %s28_s28, %s2401_s29  ;;  %p2407_p7 = scmp.lt.s32.totalorder %s2401_s29, %s2401_s29 }
  0x30   :  { %p2408_p8 = por %p2407_p7, %p2406_p6 }
  0x32   :  { %p2409_p9 = pnand %p2408_p8, %p2402_p5 }
  0x34   :  { %2412 = shalt.err (!%p2409_p9)
}
  0x35   :  { %33 = dma.hbm_to_vmem [thread:$0]  %s3010_s0, 1024, %s28_s28, [#allocation6], %s2560_s14, %s2560_s14, %s2561_s17  }
  0x36   :  { %s2562_s30 = smov [#allocation10]   ;;  %s2563_s12 = smov [#allocation13]  }
  0x37   :  { %s50_s11 = sshll.u32 %s2562_s30, 4  ;;  %s71_s13 = sshll.u32 %s2563_s12, 4  ;;  %s51_s11 = int_to_ptr.vmem [resolvable:$true] %s50_s11  ;;  %s72_s13 = int_to_ptr.vmem [resolvable:$true] %s71_s13 }
  0x38   :  { %s2413_s1 = scalar_lea.hbm %s3012_s2, 128 }
  0x39   :  { %p2414_p10 = scmp.ne.s32.totalorder %s3012_s2, %s2413_s1  ;;  %p2417_p11 = scmp.lt.u32.totalorder %s2413_s1, %s3012_s2 }
  0x3b   :  { %p2419_p12 = pnand %p2417_p11, %p2414_p10 }
  0x3d   :  { %2422 = shalt.err (!%p2419_p12)
}
  0x3e   :  { %s2423_s0 = scalar_lea.vmem %s51_s11, 128  ;;  %p2428_p0 = scmp.lt.s32.totalorder %s51_s11, %s51_s11 }
  0x3f   :  { %p2424_p13 = scmp.ne.s32.totalorder %s51_s11, %s2423_s0  ;;  %p2429_p1 = scmp.lt.s32.totalorder %s2423_s0, %s2423_s0 }
  0x41   :  { %p2430_p2 = por %p2429_p1, %p2428_p0 }
  0x43   :  { %p2431_p3 = pnand %p2430_p2, %p2424_p13 }
  0x45   :  { %2434 = shalt.err (!%p2431_p3)
}
  0x46   :  { %53 = dma.hbm_to_vmem [thread:$0]  %s3012_s2, 128, %s51_s11, [#allocation9]  }
  0x47   :  { %s2435_s25 = scalar_lea.hbm %s3014_s4, 512 }
  0x48   :  { %p2436_p4 = scmp.ne.s32.totalorder %s3014_s4, %s2435_s25  ;;  %p2439_p5 = scmp.lt.u32.totalorder %s2435_s25, %s3014_s4 }
  0x4a   :  { %p2441_p6 = pnand %p2439_p5, %p2436_p4 }
  0x4c   :  { %2444 = shalt.err (!%p2441_p6)
}
  0x4d   :  { %s2445_s30 = scalar_lea.vmem %s72_s13, 512  ;;  %p2450_p8 = scmp.lt.s32.totalorder %s72_s13, %s72_s13 }
  0x4e   :  { %p2446_p7 = scmp.ne.s32.totalorder %s72_s13, %s2445_s30  ;;  %p2451_p9 = scmp.lt.s32.totalorder %s2445_s30, %s2445_s30 }
  0x50   :  { %p2452_p10 = por %p2451_p9, %p2450_p8 }
  0x52   :  { %p2453_p11 = pnand %p2452_p10, %p2446_p7 }
  0x54   :  { %2456 = shalt.err (!%p2453_p11)
}
  0x55   :  { %77 = dma.hbm_to_vmem [thread:$0]  %s3014_s4, 512, %s72_s13, [#allocation12], %s2560_s14, %s2560_s14, %s2561_s17  }
  0x56   :  { %s2564_s12 = smov [#allocation14]   ;;  %s2457_s18 = scalar_lea.hbm %s3015_s5, 512 }
  0x57   :  { %s83_s15 = sshll.u32 %s2564_s12, 4  ;;  %p2458_p12 = scmp.ne.s32.totalorder %s3015_s5, %s2457_s18  ;;  %s84_s15 = int_to_ptr.vmem [resolvable:$true] %s83_s15 }
  0x58   :  { %p2461_p13 = scmp.lt.u32.totalorder %s2457_s18, %s3015_s5 }
  0x5a   :  { %p2463_p0 = pnand %p2461_p13, %p2458_p12 }
  0x5c   :  { %2466 = shalt.err (!%p2463_p0)
}
  0x5d   :  { %s2467_s28 = scalar_lea.vmem %s84_s15, 512  ;;  %p2472_p2 = scmp.lt.s32.totalorder %s84_s15, %s84_s15 }
  0x5e   :  { %p2468_p1 = scmp.ne.s32.totalorder %s84_s15, %s2467_s28  ;;  %p2473_p3 = scmp.lt.s32.totalorder %s2467_s28, %s2467_s28 }
  0x60   :  { %p2474_p4 = por %p2473_p3, %p2472_p2 }
  0x62   :  { %p2475_p5 = pnand %p2474_p4, %p2468_p1 }
  0x64   :  { %2478 = shalt.err (!%p2475_p5)
}
  0x65   :  { %89 = dma.hbm_to_vmem [thread:$0]  %s3015_s5, 512, %s84_s15, [#allocation15], %s2560_s14, %s2560_s14, %s2561_s17  }
  0x66   :  { %2545 = dma.done.wait [#allocation6], 1024  }
  0x67   :  { %2546 = vsyncadd [#allocation6], 4294966272 }
  0x68   :  { %2547 = dma.done.wait [#allocation9], 256  }
  0x69   :  { %2548 = vsyncadd [#allocation9], 4294967040 }
  0x6a   :  { %2549 = dma.done.wait [#allocation12], 768  }
  0x6b   :  { %2550 = vsyncadd [#allocation12], 4294966528 }
  0x6c   :  { %2551 = dma.done.wait [#allocation15], 512  }
  0x6d   :  { %2552 = vsyncadd [#allocation15], 4294966784  ;;  %v2565_v0 = vmov 0.0|0.0   ;;  %vm2566_vm0 = vmmov 0   ;;  %v2567_v1 = vmov 0.0   ;;  %vm138_vm1 = vcmask 130048  }
  0x6e   :  { %2170 = vmatprep.subr.bf16.mxu1 %v2565_v0  ;;  %1998 = vmatprep.mubr.msk.f32.mxu1 %vm2566_vm0, %v2567_v1  ;;  %v129_v2 = vld [vmem:[#allocation11] sm:$0xff]  ;;  %v130_v3 = vld [vmem:[#allocation11 + $0x8] sm:$0xff]  ;;  %v276_v4 = vld [vmem:[#allocation13] sm:$0xff]  ;;  %vm117_vm2 = vcmask 261120   ;;  %s2568_s23 = smov 96   ;;  %s2571_s27 = smov [#allocation17]  }
  0x6f   :  { %v2166_v5 = vpack.c.bf16 %v130_v3, %v129_v2  ;;  %v277_v6 = vld [vmem:[#allocation13 + $0x8] sm:$0xff]  ;;  %v121_v7 = vld [vmem:[#allocation5] sm:$0xff]  ;;  %v278_v9 = vld [vmem:[#allocation13 + $0x10] sm:$0xff]  ;;  %s1821_s29 = sshll.u32 %s2571_s27, 4  ;;  %s2572_s3 = smov [#allocation16]   ;;  %s1822_s29 = int_to_ptr.vmem [resolvable:$true] %s1821_s29 }
  0x70   :  { %v2716_v8 = vpack.c.bf16 %v277_v6, %v276_v4  ;;  %1978 = vmatprep.mubr.msk.f32.mxu0 %vm138_vm1, %v121_v7  ;;  %v279_v10 = vld [vmem:[#allocation13 + $0x18] sm:$0xff]  ;;  %v116_v11 = vld [vmem:[#allocation8] sm:$0xff]  ;;  %v122_v12 = vld [vmem:[#allocation5 + $0x8] sm:$0xff]  ;;  %s1808_s26 = sshll.u32 %s2572_s3, 4  ;;  %s2573_s30 = smov [#allocation19]   ;;  %s2954_s26 = int_to_ptr.vmem [resolvable:$true] %s1808_s26 }
  0x71   :  { %2167 = vmatprep.subr.bf16.mxu0 %v2166_v5  ;;  %118 = vst.msk [vmem:[#allocation2] sm:$0xff] %vm117_vm2, %v116_v11  ;;  %v2721_v13 = vpack.c.bf16 %v279_v10, %v278_v9  ;;  %v119_v14 = vld [vmem:[#allocation10] sm:$0xff]  ;;  %v1859_v15 = vld [vmem:[%s3017_s7] ss:$0 sm:$0xff]  ;;  %v280_v16 = vld [vmem:[#allocation14] sm:$0xff]  ;;  %s2569_s7 = smov 32   ;;  %p2484_p7 = scmp.lt.s32.totalorder %s1822_s29, %s1822_s29 }
  0x72   :  { %2172 = vmatpush3.bf16.msra.mxu1 %v2716_v8  ;;  %2169 = vmatpush3.bf16.msra.mxu0 %v2166_v5  ;;  %v281_v17 = vld [vmem:[#allocation14 + $0x8] sm:$0xff]  ;;  %120 = vst.msk [vmem:[#allocation3] sm:$0xff] %vm117_vm2, %v119_v14  ;;  %v282_v19 = vld [vmem:[#allocation14 + $0x10] sm:$0xff]  ;;  %v283_v20 = vld [vmem:[#allocation14 + $0x18] sm:$0xff]  ;;  %s1831_s2 = sshll.u32 %s2573_s30, 4  ;;  %s2479_s11 = scalar_lea.vmem %s1822_s29, 128  ;;  %s2959_s2 = int_to_ptr.vmem [resolvable:$true] %s1831_s2 }
  0x73   :  { %2173 = vmatprep.subr.bf16.mxu1 %v2565_v0  ;;  %448 = vrot.lane.b32.xlu0 %v1859_v15, %s2568_s23  ;;  %v2732_v18 = vpack.c.bf16 %v281_v17, %v280_v16  ;;  %v2739_v22 = vpack.c.bf16 %v283_v20, %v282_v19  ;;  %v2759_v24 = vld [vmem:[%s3016_s6] ss:$0 sm:$0xff]  ;;  %s2570_s6 = smov 64   ;;  %v124_v48 = vld [vmem:[#allocation5 + $0x18] sm:$0xff]  ;;  %v125_v49 = vld [vmem:[#allocation5 + $0x20] sm:$0xff]  ;;  %p2480_p6 = scmp.ne.s32.totalorder %s1822_s29, %s2479_s11 }
  0x74   :  { %2182 = vmatprep.subr.bf16.mxu0 %v2565_v0  ;;  %v123_v47 = vld [vmem:[#allocation5 + $0x10] sm:$0xff]  ;;  %v126_v50 = vld [vmem:[#allocation5 + $0x28] sm:$0xff]  ;;  %v128_v55 = vld [vmem:[#allocation5 + $0x38] sm:$0xff]  ;;  %p2485_p8 = scmp.lt.s32.totalorder %s2479_s11, %s2479_s11 }
  0x75   :  { %1979 = vmatmul.mubr.msk.f32.vlgmr.msra.gmra.mrb[0].mxu0 %vm138_vm1, %v122_v12  ;;  %v127_v51 = vld [vmem:[#allocation5 + $0x30] sm:$0xff] }
  0x76   :  { %2175 = vmatpush3.bf16.msra.mxu1 %v2721_v13  ;;  %2184 = vmatpush3.bf16.msra.mxu0 %v2716_v8  ;;  %p2486_p9 = por %p2485_p8, %p2484_p7 }
  0x77   :  { %2176 = vmatprep.subr.bf16.mxu1 %v2565_v0  ;;  %2185 = vmatprep.subr.bf16.mxu0 %v2565_v0 }
  0x78   :  { %v290_v21 = vld [vmem:[#allocation2] sm:$0xff]  ;;  %1981 = vmatprep.mubr.msk.f32.mxu0 %vm138_vm1, %v123_v47  ;;  %p2487_p10 = pnand %p2486_p9, %p2480_p6 }
  0x79   :  { %1999 = vmatmul.mubr.msk.f32.vlgmr.msra.gmra.mrb[0].mxu1 %vm117_vm2, %v290_v21  ;;  %v291_v23 = vld [vmem:[#allocation3] sm:$0xff]  ;;  %1982 = vmatmul.mubr.msk.f32.gmra.mrb[2].mxu0 %vm138_vm1, %v124_v48 }
  0x7a   :  { %2178 = vmatpush3.bf16.msra.mxu1 %v2732_v18  ;;  %2009 = vmatprep.mubr.msk.f32.mxu1 %vm2566_vm0, %v2567_v1 }
  0x7b   :  { %2179 = vmatprep.subr.bf16.mxu1 %v2565_v0  ;;  %453 = vrot.lane.b32.xlu1 %v291_v23, %s2569_s7 }
  0x7c   :  { %2187 = vmatpush3.bf16.msra.mxu0 %v2721_v13  ;;  %1984 = vmatprep.mubr.msk.f32.mxu0 %vm138_vm1, %v125_v49 }
  0x7d   :  { %2194 = vmatprep.subr.bf16.mxu0 %v2565_v0  ;;  %1985 = vmatmul.mubr.msk.f32.gmra.mrb[4].mxu0 %vm138_vm1, %v126_v50 }
  0x7e   :  { %2181 = vmatpush3.bf16.msra.mxu1 %v2739_v22  ;;  %1987 = vmatprep.mubr.msk.f32.mxu0 %vm138_vm1, %v127_v51 }
  0x7f   :  { %2188 = vmatprep.subr.bf16.mxu1 %v2565_v0 }
  0x81   :  { %2010 = vmatmul.mubr.msk.f32.vlgmr.msra.gmra.mrb[2].mxu1 %vm117_vm2, %v291_v23  ;;  %1988 = vmatmul.mubr.msk.f32.gmra.mrb[6].mxu0 %vm138_vm1, %v128_v55 }
  0x82   :  { %2190 = vmatpush3.bf16.msra.mxu1 %v2732_v18  ;;  %2031 = vmatprep.mubr.msk.f32.mxu1 %vm2566_vm0, %v2567_v1 }
  0x83   :  { %2191 = vmatprep.subr.bf16.mxu1 %v2565_v0  ;;  %2020 = vmatprep.mubr.msk.f32.mxu0 %vm2566_vm0, %v2567_v1 }
  0x86   :  { %2193 = vmatpush3.bf16.msra.mxu1 %v2739_v22 }
  0x87   :  { %2200 = vmatprep.subr.bf16.mxu1 %v2565_v0 }
  0xe5   :  { %v2764_v28 = vpop.permute.xlu0 %448 }
  0xed   :  { %v454_v43 = vpop.permute.xlu1 %453 }
 0x148   :  { %v2761_v25 = vpop.f32.mrb[0].mxu0 }
 0x149   :  { %v229_v26 = vpop.f32.mrb[1].mxu0  ;;  %v235_v6 = vadd.f32 %v2761_v25, %v2759_v24 }
 0x14a   :  { %v230_v27 = vadd.f32 %v2759_v24, %v229_v26 }
 0x14c   :  { %v363_v29 = vpop.f32.mrb[0].mxu1  ;;  %v2792_v59 = vpop.f32.mrb[2].mxu0 }
 0x14d   :  { %v440_v30 = vadd.f32 %v363_v29, %v230_v27  ;;  %v451_v31 = vadd.f32 %v2764_v28, %v363_v29  ;;  %v2000_v32 = vpop.f32.mrb[1].mxu1  ;;  %v2794_v60 = vpop.f32.mrb[3].mxu0 }
 0x14f   :  { %2283 = vtanh.f32 %v451_v31 }
 0x150   :  { %v2796_v61 = vpop.f32.mrb[4].mxu0 }
 0x151   :  { %v2798_v62 = vpop.f32.mrb[5].mxu0 }
 0x154   :  { %v436_v33 = vpop.f32.mrb[2].mxu1  ;;  %v2800_v63 = vpop.f32.mrb[6].mxu0 }
 0x155   :  { %v441_v34 = vadd.f32 %v440_v30, %v436_v33  ;;  %v2011_v35 = vpop.f32.mrb[3].mxu1  ;;  %v2802_v2 = vpop.f32.mrb[7].mxu0 }
 0x157   :  { %v1862_v37 = vmul.f32 -1.442695, %v441_v34 }
 0x159   :  { %v2284_v36 = vpop.eup %2283  ;;  %2285 = vpow2.f32 %v1862_v37  ;;  %v240_v37 = vadd.f32 %v2759_v24, %v2794_v60 }
 0x15a   :  { %458 = vrot.lane.b32.xlu0 %v2284_v36, %s2569_s7 }
 0x15e   :  { %469 = vrot.lane.b32.xlu0 %v230_v27, %s2570_s6 }
 0x163   :  { %v2286_v38 = vpop.eup %2285 }
 0x164   :  { %v445_v39 = vadd.f32 1.0, %v2286_v38 }
 0x166   :  { %2287 = vrcp.f32 %v445_v39 }
 0x170   :  { %v2288_v40 = vpop.eup %2287 }
 0x171   :  { %v456_v44 = vmul.f32 %v2288_v40, %v454_v43 }
 0x1cc   :  { %v459_v41 = vpop.permute.xlu0 %458 }
 0x1cd   :  { %v461_v42 = vmul.f32 %v2288_v40, %v459_v41 }
 0x1cf   :  { %463 = vrot.lane.b32.xlu1 %v461_v42, %s2569_s7 }
 0x1d0   :  { %v470_v53 = vpop.permute.xlu0 %469 }
 0x241   :  { %v464_v45 = vpop.permute.xlu1 %463 }
 0x242   :  { %v2770_v46 = vadd.f32 %v464_v45, %v456_v44 }
 0x244   :  { %2289 = vtanh.f32 %v2770_v46 }
 0x24e   :  { %v2290_v52 = vpop.eup %2289 }
 0x24f   :  { %v472_v54 = vadd.f32 %v2290_v52, %v470_v53 }
 0x251   :  { %474 = vrot.lane.b32.xlu1 %v472_v54, %s2569_s7 }
 0x255   :  { %558 = vrot.lane.b32.xlu1 %v2770_v46, %s2568_s23 }
 0x2c3   :  { %v475_v56 = vpop.permute.xlu1 %474 }
 0x2c4   :  { %v477_v57 = vmul.f32 %v2288_v40, %v475_v56 }
 0x2c6   :  { %479 = vrot.lane.b32.xlu0 %v477_v57, %s2570_s6 }
 0x2c7   :  { %v559_v58 = vpop.permute.xlu1 %558 }
 0x2c8   :  { %2032 = vmatmul.mubr.msk.f32.vlgmr.msra.gmra.mrb[4].mxu1 %vm117_vm2, %v559_v58 }
 0x2c9   :  { %2202 = vmatpush3.bf16.msra.mxu1 %v2732_v18  ;;  %2053 = vmatprep.mubr.msk.f32.mxu1 %vm2566_vm0, %v2567_v1 }
 0x2ca   :  { %2203 = vmatprep.subr.bf16.mxu1 %v2565_v0 }
 0x2cd   :  { %2205 = vmatpush3.bf16.msra.mxu1 %v2739_v22 }
 0x2ce   :  { %2212 = vmatprep.subr.bf16.mxu1 %v2565_v0 }
 0x338   :  { %v480_v3 = vpop.permute.xlu0 %479 }
 0x339   :  { %482 = vst.msk [vmem:[#allocation16] sm:$0xff] %vm117_vm2, %v480_v3  ;;  %2021 = vmatmul.mubr.msk.f32.vlgmr.msra.gmra.mrb[8].mxu0 %vm117_vm2, %v480_v3 }
 0x33a   :  { %2196 = vmatpush3.bf16.msra.mxu0 %v2716_v8  ;;  %2042 = vmatprep.mubr.msk.f32.mxu0 %vm2566_vm0, %v2567_v1 }
 0x33b   :  { %2197 = vmatprep.subr.bf16.mxu0 %v2565_v0 }
 0x33e   :  { %2199 = vmatpush3.bf16.msra.mxu0 %v2721_v13 }
 0x33f   :  { %2206 = vmatprep.subr.bf16.mxu0 %v2565_v0 }
 0x39b   :  { %v628_v4 = vpop.f32.mrb[4].mxu1 }
 0x39c   :  { %v2033_v5 = vpop.f32.mrb[5].mxu1 }
 0x39d   :  { %v245_v5 = vadd.f32 %v2792_v59, %v2759_v24 }
 0x40c   :  { %v553_v7 = vpop.f32.mrb[8].mxu0 }
 0x40d   :  { %v632_v9 = vadd.f32 %v553_v7, %v235_v6  ;;  %v640_v10 = vadd.f32 %v553_v7, %v2764_v28  ;;  %v2022_v11 = vpop.f32.mrb[9].mxu0 }
 0x40f   :  { %v633_v12 = vadd.f32 %v632_v9, %v628_v4  ;;  %2291 = vtanh.f32 %v640_v10 }
 0x411   :  { %v1865_v15 = vmul.f32 -1.442695, %v633_v12 }
 0x413   :  { %2293 = vpow2.f32 %v1865_v15 }
 0x419   :  { %v2292_v14 = vpop.eup %2291 }
 0x41a   :  { %644 = vrot.lane.b32.xlu0 %v2292_v14, %s2569_s7 }
 0x41d   :  { %v2294_v16 = vpop.eup %2293 }
 0x41e   :  { %655 = vrot.lane.b32.xlu0 %v235_v6, %s2570_s6  ;;  %v637_v17 = vadd.f32 1.0, %v2294_v16 }
 0x420   :  { %2295 = vrcp.f32 %v637_v17 }
 0x42a   :  { %v2296_v19 = vpop.eup %2295 }
 0x42b   :  { %v642_v23 = vmul.f32 %v2296_v19, %v2770_v46 }
 0x48c   :  { %v645_v20 = vpop.permute.xlu0 %644 }
 0x48d   :  { %v647_v21 = vmul.f32 %v2296_v19, %v645_v20 }
 0x48f   :  { %649 = vrot.lane.b32.xlu1 %v647_v21, %s2569_s7 }
 0x490   :  { %v656_v29 = vpop.permute.xlu0 %655 }
 0x501   :  { %v650_v25 = vpop.permute.xlu1 %649 }
 0x502   :  { %v652_v26 = vadd.f32 %v650_v25, %v642_v23 }
 0x504   :  { %2297 = vtanh.f32 %v652_v26 }
 0x50e   :  { %v2298_v27 = vpop.eup %2297 }
 0x50f   :  { %v658_v30 = vadd.f32 %v2298_v27, %v656_v29 }
 0x511   :  { %660 = vrot.lane.b32.xlu1 %v658_v30, %s2569_s7 }
 0x515   :  { %745 = vrot.lane.b32.xlu1 %v652_v26, %s2568_s23 }
 0x583   :  { %v661_v31 = vpop.permute.xlu1 %660 }
 0x584   :  { %v663_v32 = vmul.f32 %v2296_v19, %v661_v31 }
 0x586   :  { %665 = vrot.lane.b32.xlu0 %v663_v32, %s2570_s6 }
 0x587   :  { %v746_v33 = vpop.permute.xlu1 %745 }
 0x588   :  { %2054 = vmatmul.mubr.msk.f32.vlgmr.msra.gmra.mrb[6].mxu1 %vm117_vm2, %v746_v33 }
 0x589   :  { %2214 = vmatpush3.bf16.msra.mxu1 %v2732_v18  ;;  %2075 = vmatprep.mubr.msk.f32.mxu1 %vm2566_vm0, %v2567_v1 }
 0x58a   :  { %2215 = vmatprep.subr.bf16.mxu1 %v2565_v0 }
 0x58d   :  { %2217 = vmatpush3.bf16.msra.mxu1 %v2739_v22 }
 0x58e   :  { %2224 = vmatprep.subr.bf16.mxu1 %v2565_v0 }
 0x5f8   :  { %v666_v34 = vpop.permute.xlu0 %665 }
 0x5f9   :  { %669 = vst.msk [vmem:[#allocation16 + $0x8] sm:$0xff] %vm117_vm2, %v666_v34  ;;  %2043 = vmatmul.mubr.msk.f32.vlgmr.msra.gmra.mrb[10].mxu0 %vm117_vm2, %v666_v34 }
 0x5fa   :  { %2208 = vmatpush3.bf16.msra.mxu0 %v2716_v8  ;;  %2064 = vmatprep.mubr.msk.f32.mxu0 %vm2566_vm0, %v2567_v1 }
 0x5fb   :  { %2209 = vmatprep.subr.bf16.mxu0 %v2565_v0 }
 0x5fe   :  { %2211 = vmatpush3.bf16.msra.mxu0 %v2721_v13 }
 0x5ff   :  { %2218 = vmatprep.subr.bf16.mxu0 %v2565_v0 }
 0x65b   :  { %v815_v35 = vpop.f32.mrb[6].mxu1 }
 0x65c   :  { %v2055_v36 = vpop.f32.mrb[7].mxu1 }
 0x6cc   :  { %v740_v38 = vpop.f32.mrb[10].mxu0 }
 0x6cd   :  { %v819_v39 = vadd.f32 %v740_v38, %v240_v37  ;;  %v827_v40 = vadd.f32 %v740_v38, %v2764_v28  ;;  %v2044_v41 = vpop.f32.mrb[11].mxu0 }
 0x6cf   :  { %v820_v42 = vadd.f32 %v819_v39, %v815_v35  ;;  %2299 = vtanh.f32 %v827_v40  ;;  %v250_v35 = vadd.f32 %v2759_v24, %v2798_v62 }
 0x6d1   :  { %v1868_v44 = vmul.f32 -1.442695, %v820_v42 }
 0x6d3   :  { %2301 = vpow2.f32 %v1868_v44 }
 0x6d9   :  { %v2300_v43 = vpop.eup %2299 }
 0x6da   :  { %831 = vrot.lane.b32.xlu0 %v2300_v43, %s2569_s7 }
 0x6dd   :  { %v2302_v45 = vpop.eup %2301 }
 0x6de   :  { %842 = vrot.lane.b32.xlu0 %v240_v37, %s2570_s6  ;;  %v824_v46 = vadd.f32 1.0, %v2302_v45 }
 0x6e0   :  { %2303 = vrcp.f32 %v824_v46 }
 0x6ea   :  { %v2304_v47 = vpop.eup %2303 }
 0x6eb   :  { %v829_v50 = vmul.f32 %v2304_v47, %v652_v26 }
 0x74c   :  { %v832_v48 = vpop.permute.xlu0 %831 }
 0x74d   :  { %v834_v49 = vmul.f32 %v2304_v47, %v832_v48 }
 0x74f   :  { %836 = vrot.lane.b32.xlu1 %v834_v49, %s2569_s7 }
 0x750   :  { %v843_v54 = vpop.permute.xlu0 %842 }
 0x7c1   :  { %v837_v51 = vpop.permute.xlu1 %836 }
 0x7c2   :  { %v839_v52 = vadd.f32 %v837_v51, %v829_v50 }
 0x7c4   :  { %2305 = vtanh.f32 %v839_v52 }
 0x7ce   :  { %v2306_v53 = vpop.eup %2305 }
 0x7cf   :  { %v845_v55 = vadd.f32 %v2306_v53, %v843_v54 }
 0x7d1   :  { %847 = vrot.lane.b32.xlu1 %v845_v55, %s2569_s7 }
 0x7d5   :  { %932 = vrot.lane.b32.xlu1 %v839_v52, %s2568_s23 }
 0x843   :  { %v848_v56 = vpop.permute.xlu1 %847 }
 0x844   :  { %v850_v57 = vmul.f32 %v2304_v47, %v848_v56 }
 0x846   :  { %852 = vrot.lane.b32.xlu0 %v850_v57, %s2570_s6 }
 0x847   :  { %v933_v58 = vpop.permute.xlu1 %932 }
 0x848   :  { %2076 = vmatmul.mubr.msk.f32.vlgmr.msra.gmra.mrb[8].mxu1 %vm117_vm2, %v933_v58 }
 0x849   :  { %2226 = vmatpush3.bf16.msra.mxu1 %v2732_v18  ;;  %2097 = vmatprep.mubr.msk.f32.mxu1 %vm2566_vm0, %v2567_v1 }
 0x84a   :  { %2227 = vmatprep.subr.bf16.mxu1 %v2565_v0 }
 0x84d   :  { %2229 = vmatpush3.bf16.msra.mxu1 %v2739_v22 }
 0x84e   :  { %2236 = vmatprep.subr.bf16.mxu1 %v2565_v0 }
 0x8b8   :  { %v853_v60 = vpop.permute.xlu0 %852 }
 0x8b9   :  { %856 = vst.msk [vmem:[#allocation16 + $0x10] sm:$0xff] %vm117_vm2, %v853_v60  ;;  %2065 = vmatmul.mubr.msk.f32.vlgmr.msra.gmra.mrb[12].mxu0 %vm117_vm2, %v853_v60  ;;  %v255_v60 = vadd.f32 %v2796_v61, %v2759_v24 }
 0x8ba   :  { %2220 = vmatpush3.bf16.msra.mxu0 %v2716_v8  ;;  %2086 = vmatprep.mubr.msk.f32.mxu0 %vm2566_vm0, %v2567_v1 }
 0x8bb   :  { %2221 = vmatprep.subr.bf16.mxu0 %v2565_v0 }
 0x8be   :  { %2223 = vmatpush3.bf16.msra.mxu0 %v2721_v13 }
 0x8bf   :  { %2230 = vmatprep.subr.bf16.mxu0 %v2565_v0 }
 0x91b   :  { %v1002_v3 = vpop.f32.mrb[8].mxu1 }
 0x91c   :  { %v2077_v4 = vpop.f32.mrb[9].mxu1 }
 0x98c   :  { %v927_v6 = vpop.f32.mrb[12].mxu0 }
 0x98d   :  { %v1006_v7 = vadd.f32 %v927_v6, %v245_v5  ;;  %v1014_v9 = vadd.f32 %v927_v6, %v2764_v28  ;;  %v2066_v10 = vpop.f32.mrb[13].mxu0 }
 0x98f   :  { %v1007_v11 = vadd.f32 %v1006_v7, %v1002_v3  ;;  %2307 = vtanh.f32 %v1014_v9 }
 0x991   :  { %v1871_v14 = vmul.f32 -1.442695, %v1007_v11 }
 0x993   :  { %2309 = vpow2.f32 %v1871_v14 }
 0x999   :  { %v2308_v12 = vpop.eup %2307 }
 0x99a   :  { %1018 = vrot.lane.b32.xlu0 %v2308_v12, %s2569_s7 }
 0x99d   :  { %v2310_v15 = vpop.eup %2309 }
 0x99e   :  { %1029 = vrot.lane.b32.xlu0 %v245_v5, %s2570_s6  ;;  %v1011_v16 = vadd.f32 1.0, %v2310_v15 }
 0x9a0   :  { %2311 = vrcp.f32 %v1011_v16 }
 0x9aa   :  { %v2312_v17 = vpop.eup %2311 }
 0x9ab   :  { %v1016_v20 = vmul.f32 %v2312_v17, %v839_v52 }
 0xa0c   :  { %v1019_v19 = vpop.permute.xlu0 %1018 }
 0xa0d   :  { %v1021_v59 = vmul.f32 %v2312_v17, %v1019_v19 }
 0xa0f   :  { %1023 = vrot.lane.b32.xlu1 %v1021_v59, %s2569_s7 }
 0xa10   :  { %v1030_v26 = vpop.permute.xlu0 %1029 }
 0xa81   :  { %v1024_v21 = vpop.permute.xlu1 %1023 }
 0xa82   :  { %v1026_v23 = vadd.f32 %v1024_v21, %v1016_v20 }
 0xa84   :  { %2313 = vtanh.f32 %v1026_v23 }
 0xa8e   :  { %v2314_v25 = vpop.eup %2313 }
 0xa8f   :  { %v1032_v27 = vadd.f32 %v2314_v25, %v1030_v26 }
 0xa91   :  { %1034 = vrot.lane.b32.xlu1 %v1032_v27, %s2569_s7 }
 0xa95   :  { %1119 = vrot.lane.b32.xlu1 %v1026_v23, %s2568_s23 }
 0xb03   :  { %v1035_v29 = vpop.permute.xlu1 %1034 }
 0xb04   :  { %v1037_v30 = vmul.f32 %v2312_v17, %v1035_v29 }
 0xb06   :  { %1039 = vrot.lane.b32.xlu0 %v1037_v30, %s2570_s6  ;;  %v260_v30 = vadd.f32 %v2759_v24, %v2802_v2 }
 0xb07   :  { %v1120_v31 = vpop.permute.xlu1 %1119 }
 0xb08   :  { %2098 = vmatmul.mubr.msk.f32.vlgmr.msra.gmra.mrb[10].mxu1 %vm117_vm2, %v1120_v31 }
 0xb09   :  { %2238 = vmatpush3.bf16.msra.mxu1 %v2732_v18  ;;  %2119 = vmatprep.mubr.msk.f32.mxu1 %vm2566_vm0, %v2567_v1 }
 0xb0a   :  { %2239 = vmatprep.subr.bf16.mxu1 %v2565_v0 }
 0xb0d   :  { %2241 = vmatpush3.bf16.msra.mxu1 %v2739_v22 }
 0xb0e   :  { %2248 = vmatprep.subr.bf16.mxu1 %v2565_v0 }
 0xb78   :  { %v1040_v32 = vpop.permute.xlu0 %1039 }
 0xb79   :  { %1043 = vst.msk [vmem:[#allocation16 + $0x18] sm:$0xff] %vm117_vm2, %v1040_v32  ;;  %2087 = vmatmul.mubr.msk.f32.vlgmr.msra.gmra.mrb[14].mxu0 %vm117_vm2, %v1040_v32 }
 0xb7a   :  { %2232 = vmatpush3.bf16.msra.mxu0 %v2716_v8  ;;  %2108 = vmatprep.mubr.msk.f32.mxu0 %vm2566_vm0, %v2567_v1 }
 0xb7b   :  { %2233 = vmatprep.subr.bf16.mxu0 %v2565_v0 }
 0xb7e   :  { %2235 = vmatpush3.bf16.msra.mxu0 %v2721_v13 }
 0xb7f   :  { %2242 = vmatprep.subr.bf16.mxu0 %v2565_v0 }
 0xbdb   :  { %v1189_v33 = vpop.f32.mrb[10].mxu1 }
 0xbdc   :  { %v2099_v34 = vpop.f32.mrb[11].mxu1 }
 0xc4c   :  { %v1114_v36 = vpop.f32.mrb[14].mxu0 }
 0xc4d   :  { %v1193_v37 = vadd.f32 %v1114_v36, %v250_v35  ;;  %v1201_v38 = vadd.f32 %v1114_v36, %v2764_v28  ;;  %v2088_v39 = vpop.f32.mrb[15].mxu0 }
 0xc4f   :  { %v1194_v40 = vadd.f32 %v1193_v37, %v1189_v33  ;;  %2315 = vtanh.f32 %v1201_v38 }
 0xc51   :  { %v1874_v42 = vmul.f32 -1.442695, %v1194_v40 }
 0xc53   :  { %2317 = vpow2.f32 %v1874_v42 }
 0xc59   :  { %v2316_v41 = vpop.eup %2315 }
 0xc5a   :  { %1205 = vrot.lane.b32.xlu0 %v2316_v41, %s2569_s7 }
 0xc5d   :  { %v2318_v43 = vpop.eup %2317 }
 0xc5e   :  { %1216 = vrot.lane.b32.xlu0 %v250_v35, %s2570_s6  ;;  %v1198_v44 = vadd.f32 1.0, %v2318_v43 }
 0xc60   :  { %2319 = vrcp.f32 %v1198_v44 }
 0xc6a   :  { %v2320_v45 = vpop.eup %2319 }
 0xc6b   :  { %v1203_v47 = vmul.f32 %v2320_v45, %v1026_v23 }
 0xccc   :  { %v1206_v46 = vpop.permute.xlu0 %1205 }
 0xccd   :  { %v1208_v62 = vmul.f32 %v2320_v45, %v1206_v46 }
 0xccf   :  { %1210 = vrot.lane.b32.xlu1 %v1208_v62, %s2569_s7 }
 0xcd0   :  { %v1217_v51 = vpop.permute.xlu0 %1216 }
 0xd41   :  { %v1211_v48 = vpop.permute.xlu1 %1210 }
 0xd42   :  { %v1213_v49 = vadd.f32 %v1211_v48, %v1203_v47  ;;  %v265_v48 = vadd.f32 %v2800_v63, %v2759_v24 }
 0xd44   :  { %2321 = vtanh.f32 %v1213_v49 }
 0xd4e   :  { %v2322_v50 = vpop.eup %2321 }
 0xd4f   :  { %v1219_v52 = vadd.f32 %v2322_v50, %v1217_v51 }
 0xd51   :  { %1221 = vrot.lane.b32.xlu1 %v1219_v52, %s2569_s7 }
 0xd55   :  { %1306 = vrot.lane.b32.xlu1 %v1213_v49, %s2568_s23 }
 0xdc3   :  { %v1222_v53 = vpop.permute.xlu1 %1221 }
 0xdc4   :  { %v1224_v54 = vmul.f32 %v2320_v45, %v1222_v53 }
 0xdc6   :  { %1226 = vrot.lane.b32.xlu0 %v1224_v54, %s2570_s6 }
 0xdc7   :  { %v1307_v55 = vpop.permute.xlu1 %1306 }
 0xdc8   :  { %2120 = vmatmul.mubr.msk.f32.vlgmr.msra.gmra.mrb[12].mxu1 %vm117_vm2, %v1307_v55 }
 0xdc9   :  { %2250 = vmatpush3.bf16.msra.mxu1 %v2732_v18  ;;  %2141 = vmatprep.mubr.msk.f32.mxu1 %vm2566_vm0, %v2567_v1 }
 0xdca   :  { %2251 = vmatprep.subr.bf16.mxu1 %v2565_v0 }
 0xdcd   :  { %2253 = vmatpush3.bf16.msra.mxu1 %v2739_v22 }
 0xdce   :  { %2260 = vmatprep.subr.bf16.mxu1 %v2565_v0 }
 0xe38   :  { %v1227_v56 = vpop.permute.xlu0 %1226 }
 0xe39   :  { %1230 = vst.msk [vmem:[#allocation16 + $0x20] sm:$0xff] %vm117_vm2, %v1227_v56  ;;  %2109 = vmatmul.mubr.msk.f32.vlgmr.msra.gmra.mrb[16].mxu0 %vm117_vm2, %v1227_v56 }
 0xe3a   :  { %2244 = vmatpush3.bf16.msra.mxu0 %v2716_v8  ;;  %2130 = vmatprep.mubr.msk.f32.mxu0 %vm2566_vm0, %v2567_v1 }
 0xe3b   :  { %2245 = vmatprep.subr.bf16.mxu0 %v2565_v0 }
 0xe3e   :  { %2247 = vmatpush3.bf16.msra.mxu0 %v2721_v13 }
 0xe3f   :  { %2254 = vmatprep.subr.bf16.mxu0 %v2565_v0 }
 0xe9b   :  { %v1376_v57 = vpop.f32.mrb[12].mxu1 }
 0xe9c   :  { %v2121_v58 = vpop.f32.mrb[13].mxu1 }
 0xf0c   :  { %v1301_v3 = vpop.f32.mrb[16].mxu0 }
 0xf0d   :  { %v1380_v4 = vadd.f32 %v1301_v3, %v255_v60  ;;  %v1388_v5 = vadd.f32 %v1301_v3, %v2764_v28  ;;  %v2110_v6 = vpop.f32.mrb[17].mxu0 }
 0xf0f   :  { %v1381_v7 = vadd.f32 %v1380_v4, %v1376_v57  ;;  %2323 = vtanh.f32 %v1388_v5 }
 0xf11   :  { %v1877_v10 = vmul.f32 -1.442695, %v1381_v7 }
 0xf13   :  { %2325 = vpow2.f32 %v1877_v10 }
 0xf19   :  { %v2324_v9 = vpop.eup %2323 }
 0xf1a   :  { %1392 = vrot.lane.b32.xlu0 %v2324_v9, %s2569_s7 }
 0xf1d   :  { %v2326_v11 = vpop.eup %2325 }
 0xf1e   :  { %1403 = vrot.lane.b32.xlu0 %v255_v60, %s2570_s6  ;;  %v1385_v12 = vadd.f32 1.0, %v2326_v11 }
 0xf20   :  { %2327 = vrcp.f32 %v1385_v12 }
 0xf2a   :  { %v2328_v14 = vpop.eup %2327 }
 0xf2b   :  { %v1390_v16 = vmul.f32 %v2328_v14, %v1213_v49 }
 0xf8c   :  { %v1393_v15 = vpop.permute.xlu0 %1392 }
 0xf8d   :  { %v1395_v61 = vmul.f32 %v2328_v14, %v1393_v15 }
 0xf8f   :  { %1397 = vrot.lane.b32.xlu1 %v1395_v61, %s2569_s7 }
 0xf90   :  { %v1404_v20 = vpop.permute.xlu0 %1403 }
0x1001   :  { %v1398_v17 = vpop.permute.xlu1 %1397 }
0x1002   :  { %v1400_v19 = vadd.f32 %v1398_v17, %v1390_v16 }
0x1004   :  { %2329 = vtanh.f32 %v1400_v19 }
0x100e   :  { %v2330_v59 = vpop.eup %2329 }
0x100f   :  { %v1406_v21 = vadd.f32 %v2330_v59, %v1404_v20 }
0x1011   :  { %1408 = vrot.lane.b32.xlu1 %v1406_v21, %s2569_s7 }
0x1015   :  { %1493 = vrot.lane.b32.xlu1 %v1400_v19, %s2568_s23 }
0x1083   :  { %v1409_v23 = vpop.permute.xlu1 %1408 }
0x1084   :  { %v1411_v25 = vmul.f32 %v2328_v14, %v1409_v23 }
0x1086   :  { %1413 = vrot.lane.b32.xlu0 %v1411_v25, %s2570_s6 }
0x1087   :  { %v1494_v26 = vpop.permute.xlu1 %1493 }
0x1088   :  { %2142 = vmatmul.mubr.msk.f32.vlgmr.msra.gmra.mrb[14].mxu1 %vm117_vm2, %v1494_v26 }
0x1089   :  { %2262 = vmatpush3.bf16.msra.mxu1 %v2732_v18  ;;  %2163 = vmatprep.mubr.msk.f32.mxu1 %vm2566_vm0, %v2567_v1 }
0x108a   :  { %2263 = vmatprep.subr.bf16.mxu1 %v2565_v0 }
0x108d   :  { %2265 = vmatpush3.bf16.msra.mxu1 %v2739_v22 }
0x10f8   :  { %v1414_v27 = vpop.permute.xlu0 %1413 }
0x10f9   :  { %1417 = vst.msk [vmem:[#allocation16 + $0x28] sm:$0xff] %vm117_vm2, %v1414_v27  ;;  %2131 = vmatmul.mubr.msk.f32.vlgmr.msra.gmra.mrb[18].mxu0 %vm117_vm2, %v1414_v27 }
0x10fa   :  { %2256 = vmatpush3.bf16.msra.mxu0 %v2716_v8  ;;  %2152 = vmatprep.mubr.msk.f32.mxu0 %vm2566_vm0, %v2567_v1 }
0x10fb   :  { %2257 = vmatprep.subr.bf16.mxu0 %v2565_v0 }
0x10fe   :  { %2259 = vmatpush3.bf16.msra.mxu0 %v2721_v13 }
0x115b   :  { %v1563_v18 = vpop.f32.mrb[14].mxu1 }
0x115c   :  { %v2143_v29 = vpop.f32.mrb[15].mxu1 }
0x11cc   :  { %v1488_v22 = vpop.f32.mrb[18].mxu0 }
0x11cd   :  { %v1567_v31 = vadd.f32 %v1488_v22, %v260_v30  ;;  %v1575_v32 = vadd.f32 %v1488_v22, %v2764_v28  ;;  %v2132_v33 = vpop.f32.mrb[19].mxu0 }
0x11cf   :  { %v1568_v34 = vadd.f32 %v1567_v31, %v1563_v18  ;;  %2331 = vtanh.f32 %v1575_v32 }
0x11d1   :  { %v1880_v0 = vmul.f32 -1.442695, %v1568_v34 }
0x11d3   :  { %2333 = vpow2.f32 %v1880_v0 }
0x11d9   :  { %v2332_v8 = vpop.eup %2331 }
0x11da   :  { %1579 = vrot.lane.b32.xlu0 %v2332_v8, %s2569_s7 }
0x11dd   :  { %v2334_v1 = vpop.eup %2333 }
0x11de   :  { %1590 = vrot.lane.b32.xlu0 %v260_v30, %s2570_s6  ;;  %v1572_v13 = vadd.f32 1.0, %v2334_v1 }
0x11e0   :  { %2335 = vrcp.f32 %v1572_v13 }
0x11ea   :  { %v2336_v35 = vpop.eup %2335 }
0x11eb   :  { %v1577_v37 = vmul.f32 %v2336_v35, %v1400_v19 }
0x124c   :  { %v1580_v36 = vpop.permute.xlu0 %1579 }
0x124d   :  { %v1582_v2 = vmul.f32 %v2336_v35, %v1580_v36 }
0x124f   :  { %1584 = vrot.lane.b32.xlu1 %v1582_v2, %s2569_s7 }
0x1250   :  { %v1591_v41 = vpop.permute.xlu0 %1590 }
0x12c1   :  { %v1585_v38 = vpop.permute.xlu1 %1584 }
0x12c2   :  { %v1587_v39 = vadd.f32 %v1585_v38, %v1577_v37 }
0x12c4   :  { %2337 = vtanh.f32 %v1587_v39 }
0x12ce   :  { %v2338_v40 = vpop.eup %2337 }
0x12cf   :  { %v1593_v42 = vadd.f32 %v2338_v40, %v1591_v41 }
0x12d1   :  { %1595 = vrot.lane.b32.xlu1 %v1593_v42, %s2569_s7 }
0x12d5   :  { %1680 = vrot.lane.b32.xlu1 %v1587_v39, %s2568_s23 }
0x1343   :  { %v1596_v43 = vpop.permute.xlu1 %1595 }
0x1344   :  { %v1598_v44 = vmul.f32 %v2336_v35, %v1596_v43 }
0x1346   :  { %1600 = vrot.lane.b32.xlu0 %v1598_v44, %s2570_s6 }
0x1347   :  { %v1681_v45 = vpop.permute.xlu1 %1680 }
0x1348   :  { %2164 = vmatmul.mubr.msk.f32.vlgmr.msra.gmra.mrb[16].mxu1 %vm117_vm2, %v1681_v45 }
0x13b8   :  { %v1601_v46 = vpop.permute.xlu0 %1600 }
0x13b9   :  { %1604 = vst.msk [vmem:[#allocation16 + $0x30] sm:$0xff] %vm117_vm2, %v1601_v46  ;;  %2153 = vmatmul.mubr.msk.f32.vlgmr.msra.gmra.mrb[20].mxu0 %vm117_vm2, %v1601_v46 }
0x141b   :  { %v1750_v62 = vpop.f32.mrb[16].mxu1 }
0x141c   :  { %v2165_v47 = vpop.f32.mrb[17].mxu1 }
0x148c   :  { %v1675_v49 = vpop.f32.mrb[20].mxu0 }
0x148d   :  { %v1754_v50 = vadd.f32 %v1675_v49, %v265_v48  ;;  %v1762_v51 = vadd.f32 %v1675_v49, %v2764_v28  ;;  %v2154_v52 = vpop.f32.mrb[21].mxu0 }
0x148f   :  { %v1755_v53 = vadd.f32 %v1754_v50, %v1750_v62  ;;  %2339 = vtanh.f32 %v1762_v51 }
0x1491   :  { %v1883_v55 = vmul.f32 -1.442695, %v1755_v53 }
0x1493   :  { %2341 = vpow2.f32 %v1883_v55 }
0x1499   :  { %v2340_v54 = vpop.eup %2339 }
0x149a   :  { %1766 = vrot.lane.b32.xlu0 %v2340_v54, %s2569_s7 }
0x149d   :  { %v2342_v56 = vpop.eup %2341 }
0x149e   :  { %1777 = vrot.lane.b32.xlu0 %v265_v48, %s2570_s6  ;;  %v1759_v57 = vadd.f32 1.0, %v2342_v56 }
0x14a0   :  { %2343 = vrcp.f32 %v1759_v57 }
0x14aa   :  { %v2344_v58 = vpop.eup %2343 }
0x14ab   :  { %v1764_v63 = vmul.f32 %v2344_v58, %v1587_v39 }
0x150c   :  { %v1767_v60 = vpop.permute.xlu0 %1766 }
0x150d   :  { %v1769_v24 = vmul.f32 %v2344_v58, %v1767_v60 }
0x150f   :  { %1771 = vrot.lane.b32.xlu1 %v1769_v24, %s2569_s7 }
0x1510   :  { %v1778_v5 = vpop.permute.xlu0 %1777 }
0x1581   :  { %v1772_v28 = vpop.permute.xlu1 %1771 }
0x1582   :  { %v1774_v3 = vadd.f32 %v1772_v28, %v1764_v63 }
0x1584   :  { %2345 = vtanh.f32 %v1774_v3 }
0x158e   :  { %v2346_v4 = vpop.eup %2345 }
0x158f   :  { %v1780_v6 = vadd.f32 %v2346_v4, %v1778_v5 }
0x1591   :  { %1782 = vrot.lane.b32.xlu1 %v1780_v6, %s2569_s7 }
0x1595   :  { %1794 = vrot.lane.b32.xlu1 %v1774_v3, %s2568_s23 }
0x1603   :  { %v1783_v7 = vpop.permute.xlu1 %1782 }
0x1604   :  { %v1785_v9 = vmul.f32 %v2344_v58, %v1783_v7 }
0x1606   :  { %1787 = vrot.lane.b32.xlu0 %v1785_v9, %s2570_s6 }
0x1607   :  { %v1795_v10 = vpop.permute.xlu1 %1794 }
0x1608   :  { %1797 = vst.msk [vmem:[#allocation3] sm:$0xff] %vm117_vm2, %v1795_v10  ;;  %1802 = vst.msk [vmem:[#allocation19] sm:$0xff] %vm117_vm2, %v1795_v10 }
0x1678   :  { %v1788_v11 = vpop.permute.xlu0 %1787 }
0x1679   :  { %1791 = vst.msk [vmem:[#allocation16 + $0x38] sm:$0xff] %vm117_vm2, %v1788_v11  ;;  %1792 = vst.msk [vmem:[#allocation2] sm:$0xff] %vm117_vm2, %v1788_v11 }
0x167a   :  { %1801 = vst.msk [vmem:[#allocation17] sm:$0xff] %vm117_vm2, %v1788_v11 }
0x167b   :  { %2490 = shalt.err (!%p2487_p10)
}
0x167c   :  { %s2491_s16 = scalar_lea.hbm %s3019_s9, 128 }
0x167d   :  { %p2492_p11 = scmp.ne.s32.totalorder %s3019_s9, %s2491_s16  ;;  %p2495_p12 = scmp.lt.u32.totalorder %s2491_s16, %s3019_s9 }
0x167f   :  { %p2497_p13 = pnand %p2495_p12, %p2492_p11 }
0x1681   :  { %2500 = shalt.err (!%p2497_p13)
}
0x1682   :  { %1824 = dma.vmem_to_hbm [thread:$0]  %s1822_s29, 128, %s3019_s9, [#allocation18]  }
0x1683   :  { %s2501_s28 = scalar_lea.vmem %s2954_s26, 1024  ;;  %p2506_p1 = scmp.lt.s32.totalorder %s2954_s26, %s2954_s26 }
0x1684   :  { %p2502_p0 = scmp.ne.s32.totalorder %s2954_s26, %s2501_s28  ;;  %p2507_p2 = scmp.lt.s32.totalorder %s2501_s28, %s2501_s28 }
0x1686   :  { %p2508_p3 = por %p2507_p2, %p2506_p1 }
0x1688   :  { %p2509_p4 = pnand %p2508_p3, %p2502_p0 }
0x168a   :  { %2512 = shalt.err (!%p2509_p4)
}
0x168b   :  { %s2513_s5 = scalar_lea.hbm %s3018_s8, 1024 }
0x168c   :  { %p2514_p5 = scmp.ne.s32.totalorder %s3018_s8, %s2513_s5  ;;  %p2517_p6 = scmp.lt.u32.totalorder %s2513_s5, %s3018_s8 }
0x168e   :  { %p2519_p7 = pnand %p2517_p6, %p2514_p5 }
0x1690   :  { %2522 = shalt.err (!%p2519_p7)
}
0x1691   :  { %1814 = dma.vmem_to_hbm [thread:$0]  %s2954_s26, 1024, %s3018_s8, [#allocation7], %s2560_s14, %s2560_s14, %s2561_s17  }
0x1692   :  { %s2523_s6 = scalar_lea.vmem %s2959_s2, 128  ;;  %p2528_p9 = scmp.lt.s32.totalorder %s2959_s2, %s2959_s2 }
0x1693   :  { %p2524_p8 = scmp.ne.s32.totalorder %s2959_s2, %s2523_s6  ;;  %p2529_p10 = scmp.lt.s32.totalorder %s2523_s6, %s2523_s6 }
0x1695   :  { %p2530_p11 = por %p2529_p10, %p2528_p9 }
0x1697   :  { %p2531_p12 = pnand %p2530_p11, %p2524_p8 }
0x1699   :  { %2534 = shalt.err (!%p2531_p12)
}
0x169a   :  { %s2535_s3 = scalar_lea.hbm %s3020_s10, 128 }
0x169b   :  { %p2536_p13 = scmp.ne.s32.totalorder %s3020_s10, %s2535_s3  ;;  %p2539_p0 = scmp.lt.u32.totalorder %s2535_s3, %s3020_s10 }
0x169d   :  { %p2541_p1 = pnand %p2539_p0, %p2536_p13 }
0x169f   :  { %2544 = shalt.err (!%p2541_p1)
}
0x16a0   :  { %1834 = dma.vmem_to_hbm [thread:$0]  %s2959_s2, 128, %s3020_s10, [#allocation18]  }
0x16a1   :  { %2553 = dma.done.wait [#allocation7], 1024  }
0x16a2   :  { %2554 = vsyncadd [#allocation7], 4294966272 }
0x16a3   :  { %2555 = dma.done.wait [#allocation18], 256  }
0x16a4   :  { %2556 = vsyncadd [#allocation18], 4294967040 }
0x16a5   :  { %1844 = vsyncpa [#allocation6], 1 }
0x16a6   :  { %1845 = vsyncpa [#allocation9], 1 }
0x16a7   :  { %1846 = vsyncpa [#allocation12], 1 }
0x16a8   :  { %1847 = vsyncpa [#allocation15], 1 }
0x16a9   :  { %1848 = vsyncpa [#allocation7], 1 }
0x16aa   :  { %1849 = vsyncpa [#allocation18], 1 }

// kernel: tpu_custom_call.1
= control target key start
LH: loop header
LB: loop body
LE: loop exit
PB: predicated region body
PF: predicated region fallthrough
CT: control target
= control target key end

     0   :  { %16 = vsyncpa [#allocation6], 0  ;;  %s3010_s0 = inlined_call_operand.hbm [shape: f32[8,8,16], index: 0, kind: input, shape index: {}]   ;;  %s3011_s1 = inlined_call_operand.hbm [shape: f32[8,32], index: 1, kind: input, shape index: {}]   ;;  %s3012_s2 = inlined_call_operand.hbm [shape: f32[8,32], index: 2, kind: input, shape index: {}]   ;;  %s3013_s3 = inlined_call_operand.hbm [shape: f32[16,128], index: 3, kind: input, shape index: {}]   ;;  %s3014_s4 = inlined_call_operand.hbm [shape: f32[32,128], index: 4, kind: input, shape index: {}]   ;;  %s3015_s5 = inlined_call_operand.hbm [shape: f32[32,96], index: 5, kind: input, shape index: {}]   ;;  %s3016_s6 = inlined_call_operand.vmem [shape: f32[1,128], index: 6, kind: input, shape index: {}]   ;;  %s3017_s7 = inlined_call_operand.vmem [shape: f32[1,32], index: 7, kind: input, shape index: {}]   ;;  %s3018_s8 = inlined_call_operand.hbm [shape: f32[8,8,32], index: 8, kind: output, shape index: {0}]   ;;  %s3019_s9 = inlined_call_operand.hbm [shape: f32[8,32], index: 9, kind: output, shape index: {1}]   ;;  %s3020_s10 = inlined_call_operand.hbm [shape: f32[8,32], index: 10, kind: output, shape index: {2}]  }
   0x1   :  { %17 = vsyncpa [#allocation9], 0 }
   0x2   :  { %18 = vsyncpa [#allocation12], 0 }
   0x3   :  { %19 = vsyncpa [#allocation15], 0 }
   0x4   :  { %20 = vsyncpa [#allocation7], 0 }
   0x5   :  { %21 = vsyncpa [#allocation18], 0  ;;  %s2557_s13 = smov [#allocation8]   ;;  %s2347_s17 = scalar_lea.hbm %s3011_s1, 128 }
   0x6   :  { %s40_s14 = sshll.u32 %s2557_s13, 4  ;;  %p2348_p0 = scmp.ne.s32.totalorder %s3011_s1, %s2347_s17  ;;  %s41_s14 = int_to_ptr.vmem [resolvable:$true] %s40_s14 }
   0x7   :  { %p2351_p1 = scmp.lt.u32.totalorder %s2347_s17, %s3011_s1 }
   0x9   :  { %p2353_p2 = pnand %p2351_p1, %p2348_p0 }
   0xb   :  { %2356 = shalt.err (!%p2353_p2)
}
   0xc   :  { %s2357_s22 = scalar_lea.vmem %s41_s14, 128  ;;  %p2362_p4 = scmp.lt.s32.totalorder %s41_s14, %s41_s14 }
   0xd   :  { %p2358_p3 = scmp.ne.s32.totalorder %s41_s14, %s2357_s22  ;;  %p2363_p5 = scmp.lt.s32.totalorder %s2357_s22, %s2357_s22 }
   0xf   :  { %p2364_p6 = por %p2363_p5, %p2362_p4 }
  0x11   :  { %p2365_p7 = pnand %p2364_p6, %p2358_p3 }
  0x13   :  { %2368 = shalt.err (!%p2365_p7)
}
  0x14   :  { %43 = dma.hbm_to_vmem [thread:$0]  %s3011_s1, 128, %s41_s14, [#allocation9]  }
  0x15   :  { %s2558_s25 = smov [#allocation11]   ;;  %s2559_s27 = smov [#allocation5]  }
  0x16   :  { %s59_s26 = sshll.u32 %s2558_s25, 4  ;;  %s27_s28 = sshll.u32 %s2559_s27, 4  ;;  %s60_s26 = int_to_ptr.vmem [resolvable:$true] %s59_s26  ;;  %s28_s28 = int_to_ptr.vmem [resolvable:$true] %s27_s28 }
  0x17   :  { %s2369_s11 = scalar_lea.hbm %s3013_s3, 256 }
  0x18   :  { %p2370_p8 = scmp.ne.s32.totalorder %s3013_s3, %s2369_s11  ;;  %p2373_p9 = scmp.lt.u32.totalorder %s2369_s11, %s3013_s3 }
  0x1a   :  { %p2375_p10 = pnand %p2373_p9, %p2370_p8 }
  0x1c   :  { %2378 = shalt.err (!%p2375_p10)
}
  0x1d   :  { %s2379_s1 = scalar_lea.vmem %s60_s26, 256  ;;  %p2384_p12 = scmp.lt.s32.totalorder %s60_s26, %s60_s26 }
  0x1e   :  { %p2380_p11 = scmp.ne.s32.totalorder %s60_s26, %s2379_s1  ;;  %p2385_p13 = scmp.lt.s32.totalorder %s2379_s1, %s2379_s1 }
  0x20   :  { %p2386_p0 = por %p2385_p13, %p2384_p12 }
  0x22   :  { %p2387_p1 = pnand %p2386_p0, %p2380_p11 }
  0x24   :  { %2390 = shalt.err (!%p2387_p1)
}
  0x25   :  { %s2560_s14 = smov 128   ;;  %s2561_s17 = smov 8  }
  0x26   :  { %65 = dma.hbm_to_vmem [thread:$0]  %s3013_s3, 256, %s60_s26, [#allocation12], %s2560_s14, %s2560_s14, %s2561_s17  }
  0x27   :  { %s2391_s22 = scalar_lea.hbm %s3010_s0, 1024 }
  0x28   :  { %p2392_p2 = scmp.ne.s32.totalorder %s3010_s0, %s2391_s22  ;;  %p2395_p3 = scmp.lt.u32.totalorder %s2391_s22, %s3010_s0 }
  0x2a   :  { %p2397_p4 = pnand %p2395_p3, %p2392_p2 }
  0x2c   :  { %2400 = shalt.err (!%p2397_p4)
}
  0x2d   :  { %s2401_s29 = scalar_lea.vmem %s28_s28, 1024  ;;  %p2406_p6 = scmp.lt.s32.totalorder %s28_s28, %s28_s28 }
  0x2e   :  { %p2402_p5 = scmp.ne.s32.totalorder %s28_s28, %s2401_s29  ;;  %p2407_p7 = scmp.lt.s32.totalorder %s2401_s29, %s2401_s29 }
  0x30   :  { %p2408_p8 = por %p2407_p7, %p2406_p6 }
  0x32   :  { %p2409_p9 = pnand %p2408_p8, %p2402_p5 }
  0x34   :  { %2412 = shalt.err (!%p2409_p9)
}
  0x35   :  { %33 = dma.hbm_to_vmem [thread:$0]  %s3010_s0, 1024, %s28_s28, [#allocation6], %s2560_s14, %s2560_s14, %s2561_s17  }
  0x36   :  { %s2562_s30 = smov [#allocation10]   ;;  %s2563_s12 = smov [#allocation13]  }
  0x37   :  { %s50_s11 = sshll.u32 %s2562_s30, 4  ;;  %s71_s13 = sshll.u32 %s2563_s12, 4  ;;  %s51_s11 = int_to_ptr.vmem [resolvable:$true] %s50_s11  ;;  %s72_s13 = int_to_ptr.vmem [resolvable:$true] %s71_s13 }
  0x38   :  { %s2413_s1 = scalar_lea.hbm %s3012_s2, 128 }
  0x39   :  { %p2414_p10 = scmp.ne.s32.totalorder %s3012_s2, %s2413_s1  ;;  %p2417_p11 = scmp.lt.u32.totalorder %s2413_s1, %s3012_s2 }
  0x3b   :  { %p2419_p12 = pnand %p2417_p11, %p2414_p10 }
  0x3d   :  { %2422 = shalt.err (!%p2419_p12)
}
  0x3e   :  { %s2423_s0 = scalar_lea.vmem %s51_s11, 128  ;;  %p2428_p0 = scmp.lt.s32.totalorder %s51_s11, %s51_s11 }
  0x3f   :  { %p2424_p13 = scmp.ne.s32.totalorder %s51_s11, %s2423_s0  ;;  %p2429_p1 = scmp.lt.s32.totalorder %s2423_s0, %s2423_s0 }
  0x41   :  { %p2430_p2 = por %p2429_p1, %p2428_p0 }
  0x43   :  { %p2431_p3 = pnand %p2430_p2, %p2424_p13 }
  0x45   :  { %2434 = shalt.err (!%p2431_p3)
}
  0x46   :  { %53 = dma.hbm_to_vmem [thread:$0]  %s3012_s2, 128, %s51_s11, [#allocation9]  }
  0x47   :  { %s2435_s25 = scalar_lea.hbm %s3014_s4, 512 }
  0x48   :  { %p2436_p4 = scmp.ne.s32.totalorder %s3014_s4, %s2435_s25  ;;  %p2439_p5 = scmp.lt.u32.totalorder %s2435_s25, %s3014_s4 }
  0x4a   :  { %p2441_p6 = pnand %p2439_p5, %p2436_p4 }
  0x4c   :  { %2444 = shalt.err (!%p2441_p6)
}
  0x4d   :  { %s2445_s30 = scalar_lea.vmem %s72_s13, 512  ;;  %p2450_p8 = scmp.lt.s32.totalorder %s72_s13, %s72_s13 }
  0x4e   :  { %p2446_p7 = scmp.ne.s32.totalorder %s72_s13, %s2445_s30  ;;  %p2451_p9 = scmp.lt.s32.totalorder %s2445_s30, %s2445_s30 }
  0x50   :  { %p2452_p10 = por %p2451_p9, %p2450_p8 }
  0x52   :  { %p2453_p11 = pnand %p2452_p10, %p2446_p7 }
  0x54   :  { %2456 = shalt.err (!%p2453_p11)
}
  0x55   :  { %77 = dma.hbm_to_vmem [thread:$0]  %s3014_s4, 512, %s72_s13, [#allocation12], %s2560_s14, %s2560_s14, %s2561_s17  }
  0x56   :  { %s2564_s12 = smov [#allocation14]   ;;  %s2457_s18 = scalar_lea.hbm %s3015_s5, 512 }
  0x57   :  { %s83_s15 = sshll.u32 %s2564_s12, 4  ;;  %p2458_p12 = scmp.ne.s32.totalorder %s3015_s5, %s2457_s18  ;;  %s84_s15 = int_to_ptr.vmem [resolvable:$true] %s83_s15 }
  0x58   :  { %p2461_p13 = scmp.lt.u32.totalorder %s2457_s18, %s3015_s5 }
  0x5a   :  { %p2463_p0 = pnand %p2461_p13, %p2458_p12 }
  0x5c   :  { %2466 = shalt.err (!%p2463_p0)
}
  0x5d   :  { %s2467_s28 = scalar_lea.vmem %s84_s15, 512  ;;  %p2472_p2 = scmp.lt.s32.totalorder %s84_s15, %s84_s15 }
  0x5e   :  { %p2468_p1 = scmp.ne.s32.totalorder %s84_s15, %s2467_s28  ;;  %p2473_p3 = scmp.lt.s32.totalorder %s2467_s28, %s2467_s28 }
  0x60   :  { %p2474_p4 = por %p2473_p3, %p2472_p2 }
  0x62   :  { %p2475_p5 = pnand %p2474_p4, %p2468_p1 }
  0x64   :  { %2478 = shalt.err (!%p2475_p5)
}
  0x65   :  { %89 = dma.hbm_to_vmem [thread:$0]  %s3015_s5, 512, %s84_s15, [#allocation15], %s2560_s14, %s2560_s14, %s2561_s17  }
  0x66   :  { %2545 = dma.done.wait [#allocation6], 1024  }
  0x67   :  { %2546 = vsyncadd [#allocation6], 4294966272 }
  0x68   :  { %2547 = dma.done.wait [#allocation9], 256  }
  0x69   :  { %2548 = vsyncadd [#allocation9], 4294967040 }
  0x6a   :  { %2549 = dma.done.wait [#allocation12], 768  }
  0x6b   :  { %2550 = vsyncadd [#allocation12], 4294966528 }
  0x6c   :  { %2551 = dma.done.wait [#allocation15], 512  }
  0x6d   :  { %2552 = vsyncadd [#allocation15], 4294966784  ;;  %v2565_v0 = vmov 0.0|0.0   ;;  %vm2566_vm0 = vmmov 0   ;;  %v2567_v1 = vmov 0.0   ;;  %vm138_vm1 = vcmask 130048  }
  0x6e   :  { %2170 = vmatprep.subr.bf16.mxu1 %v2565_v0  ;;  %1998 = vmatprep.mubr.msk.f32.mxu1 %vm2566_vm0, %v2567_v1  ;;  %v129_v2 = vld [vmem:[#allocation11] sm:$0xff]  ;;  %v130_v3 = vld [vmem:[#allocation11 + $0x8] sm:$0xff]  ;;  %v276_v4 = vld [vmem:[#allocation13] sm:$0xff]  ;;  %vm117_vm2 = vcmask 261120   ;;  %s2568_s23 = smov 96   ;;  %s2571_s27 = smov [#allocation17]  }
  0x6f   :  { %v2166_v5 = vpack.c.bf16 %v130_v3, %v129_v2  ;;  %v277_v6 = vld [vmem:[#allocation13 + $0x8] sm:$0xff]  ;;  %v121_v7 = vld [vmem:[#allocation5] sm:$0xff]  ;;  %v278_v9 = vld [vmem:[#allocation13 + $0x10] sm:$0xff]  ;;  %s1821_s29 = sshll.u32 %s2571_s27, 4  ;;  %s2572_s3 = smov [#allocation16]   ;;  %s1822_s29 = int_to_ptr.vmem [resolvable:$true] %s1821_s29 }
  0x70   :  { %v2716_v8 = vpack.c.bf16 %v277_v6, %v276_v4  ;;  %1978 = vmatprep.mubr.msk.f32.mxu0 %vm138_vm1, %v121_v7  ;;  %v279_v10 = vld [vmem:[#allocation13 + $0x18] sm:$0xff]  ;;  %v116_v11 = vld [vmem:[#allocation8] sm:$0xff]  ;;  %v122_v12 = vld [vmem:[#allocation5 + $0x8] sm:$0xff]  ;;  %s1808_s26 = sshll.u32 %s2572_s3, 4  ;;  %s2573_s30 = smov [#allocation19]   ;;  %s2954_s26 = int_to_ptr.vmem [resolvable:$true] %s1808_s26 }
  0x71   :  { %2167 = vmatprep.subr.bf16.mxu0 %v2166_v5  ;;  %118 = vst.msk [vmem:[#allocation2] sm:$0xff] %vm117_vm2, %v116_v11  ;;  %v2721_v13 = vpack.c.bf16 %v279_v10, %v278_v9  ;;  %v119_v14 = vld [vmem:[#allocation10] sm:$0xff]  ;;  %v1859_v15 = vld [vmem:[%s3017_s7] ss:$0 sm:$0xff]  ;;  %v280_v16 = vld [vmem:[#allocation14] sm:$0xff]  ;;  %s2569_s7 = smov 32   ;;  %p2484_p7 = scmp.lt.s32.totalorder %s1822_s29, %s1822_s29 }
  0x72   :  { %2172 = vmatpush3.bf16.msra.mxu1 %v2716_v8  ;;  %2169 = vmatpush3.bf16.msra.mxu0 %v2166_v5  ;;  %v281_v17 = vld [vmem:[#allocation14 + $0x8] sm:$0xff]  ;;  %120 = vst.msk [vmem:[#allocation3] sm:$0xff] %vm117_vm2, %v119_v14  ;;  %v282_v19 = vld [vmem:[#allocation14 + $0x10] sm:$0xff]  ;;  %v283_v20 = vld [vmem:[#allocation14 + $0x18] sm:$0xff]  ;;  %s1831_s2 = sshll.u32 %s2573_s30, 4  ;;  %s2479_s11 = scalar_lea.vmem %s1822_s29, 128  ;;  %s2959_s2 = int_to_ptr.vmem [resolvable:$true] %s1831_s2 }
  0x73   :  { %2173 = vmatprep.subr.bf16.mxu1 %v2565_v0  ;;  %448 = vrot.lane.b32.xlu0 %v1859_v15, %s2568_s23  ;;  %v2732_v18 = vpack.c.bf16 %v281_v17, %v280_v16  ;;  %v2739_v22 = vpack.c.bf16 %v283_v20, %v282_v19  ;;  %v2759_v24 = vld [vmem:[%s3016_s6] ss:$0 sm:$0xff]  ;;  %s2570_s6 = smov 64   ;;  %v124_v48 = vld [vmem:[#allocation5 + $0x18] sm:$0xff]  ;;  %v125_v49 = vld [vmem:[#allocation5 + $0x20] sm:$0xff]  ;;  %p2480_p6 = scmp.ne.s32.totalorder %s1822_s29, %s2479_s11 }
  0x74   :  { %2182 = vmatprep.subr.bf16.mxu0 %v2565_v0  ;;  %v123_v47 = vld [vmem:[#allocation5 + $0x10] sm:$0xff]  ;;  %v126_v50 = vld [vmem:[#allocation5 + $0x28] sm:$0xff]  ;;  %v128_v55 = vld [vmem:[#allocation5 + $0x38] sm:$0xff]  ;;  %p2485_p8 = scmp.lt.s32.totalorder %s2479_s11, %s2479_s11 }
  0x75   :  { %1979 = vmatmul.mubr.msk.f32.vlgmr.msra.gmra.mrb[0].mxu0 %vm138_vm1, %v122_v12  ;;  %v127_v51 = vld [vmem:[#allocation5 + $0x30] sm:$0xff] }
  0x76   :  { %2175 = vmatpush3.bf16.msra.mxu1 %v2721_v13  ;;  %2184 = vmatpush3.bf16.msra.mxu0 %v2716_v8  ;;  %p2486_p9 = por %p2485_p8, %p2484_p7 }
  0x77   :  { %2176 = vmatprep.subr.bf16.mxu1 %v2565_v0  ;;  %2185 = vmatprep.subr.bf16.mxu0 %v2565_v0 }
  0x78   :  { %v290_v21 = vld [vmem:[#allocation2] sm:$0xff]  ;;  %1981 = vmatprep.mubr.msk.f32.mxu0 %vm138_vm1, %v123_v47  ;;  %p2487_p10 = pnand %p2486_p9, %p2480_p6 }
  0x79   :  { %1999 = vmatmul.mubr.msk.f32.vlgmr.msra.gmra.mrb[0].mxu1 %vm117_vm2, %v290_v21  ;;  %v291_v23 = vld [vmem:[#allocation3] sm:$0xff]  ;;  %1982 = vmatmul.mubr.msk.f32.gmra.mrb[2].mxu0 %vm138_vm1, %v124_v48 }
  0x7a   :  { %2178 = vmatpush3.bf16.msra.mxu1 %v2732_v18  ;;  %2009 = vmatprep.mubr.msk.f32.mxu1 %vm2566_vm0, %v2567_v1 }
  0x7b   :  { %2179 = vmatprep.subr.bf16.mxu1 %v2565_v0  ;;  %453 = vrot.lane.b32.xlu1 %v291_v23, %s2569_s7 }
  0x7c   :  { %2187 = vmatpush3.bf16.msra.mxu0 %v2721_v13  ;;  %1984 = vmatprep.mubr.msk.f32.mxu0 %vm138_vm1, %v125_v49 }
  0x7d   :  { %2194 = vmatprep.subr.bf16.mxu0 %v2565_v0  ;;  %1985 = vmatmul.mubr.msk.f32.gmra.mrb[4].mxu0 %vm138_vm1, %v126_v50 }
  0x7e   :  { %2181 = vmatpush3.bf16.msra.mxu1 %v2739_v22  ;;  %1987 = vmatprep.mubr.msk.f32.mxu0 %vm138_vm1, %v127_v51 }
  0x7f   :  { %2188 = vmatprep.subr.bf16.mxu1 %v2565_v0 }
  0x81   :  { %2010 = vmatmul.mubr.msk.f32.vlgmr.msra.gmra.mrb[2].mxu1 %vm117_vm2, %v291_v23  ;;  %1988 = vmatmul.mubr.msk.f32.gmra.mrb[6].mxu0 %vm138_vm1, %v128_v55 }
  0x82   :  { %2190 = vmatpush3.bf16.msra.mxu1 %v2732_v18  ;;  %2031 = vmatprep.mubr.msk.f32.mxu1 %vm2566_vm0, %v2567_v1 }
  0x83   :  { %2191 = vmatprep.subr.bf16.mxu1 %v2565_v0  ;;  %2020 = vmatprep.mubr.msk.f32.mxu0 %vm2566_vm0, %v2567_v1 }
  0x86   :  { %2193 = vmatpush3.bf16.msra.mxu1 %v2739_v22 }
  0x87   :  { %2200 = vmatprep.subr.bf16.mxu1 %v2565_v0 }
  0xe5   :  { %v2764_v28 = vpop.permute.xlu0 %448 }
  0xed   :  { %v454_v43 = vpop.permute.xlu1 %453 }
 0x148   :  { %v2761_v25 = vpop.f32.mrb[0].mxu0 }
 0x149   :  { %v229_v26 = vpop.f32.mrb[1].mxu0  ;;  %v235_v6 = vadd.f32 %v2761_v25, %v2759_v24 }
 0x14a   :  { %v230_v27 = vadd.f32 %v2759_v24, %v229_v26 }
 0x14c   :  { %v363_v29 = vpop.f32.mrb[0].mxu1  ;;  %v2792_v59 = vpop.f32.mrb[2].mxu0 }
 0x14d   :  { %v440_v30 = vadd.f32 %v363_v29, %v230_v27  ;;  %v451_v31 = vadd.f32 %v2764_v28, %v363_v29  ;;  %v2000_v32 = vpop.f32.mrb[1].mxu1  ;;  %v2794_v60 = vpop.f32.mrb[3].mxu0 }
 0x14f   :  { %2283 = vtanh.f32 %v451_v31 }
 0x150   :  { %v2796_v61 = vpop.f32.mrb[4].mxu0 }
 0x151   :  { %v2798_v62 = vpop.f32.mrb[5].mxu0 }
 0x154   :  { %v436_v33 = vpop.f32.mrb[2].mxu1  ;;  %v2800_v63 = vpop.f32.mrb[6].mxu0 }
 0x155   :  { %v441_v34 = vadd.f32 %v440_v30, %v436_v33  ;;  %v2011_v35 = vpop.f32.mrb[3].mxu1  ;;  %v2802_v2 = vpop.f32.mrb[7].mxu0 }
 0x157   :  { %v1862_v37 = vmul.f32 -1.442695, %v441_v34 }
 0x159   :  { %v2284_v36 = vpop.eup %2283  ;;  %2285 = vpow2.f32 %v1862_v37  ;;  %v240_v37 = vadd.f32 %v2759_v24, %v2794_v60 }
 0x15a   :  { %458 = vrot.lane.b32.xlu0 %v2284_v36, %s2569_s7 }
 0x15e   :  { %469 = vrot.lane.b32.xlu0 %v230_v27, %s2570_s6 }
 0x163   :  { %v2286_v38 = vpop.eup %2285 }
 0x164   :  { %v445_v39 = vadd.f32 1.0, %v2286_v38 }
 0x166   :  { %2287 = vrcp.f32 %v445_v39 }
 0x170   :  { %v2288_v40 = vpop.eup %2287 }
 0x171   :  { %v456_v44 = vmul.f32 %v2288_v40, %v454_v43 }
 0x1cc   :  { %v459_v41 = vpop.permute.xlu0 %458 }
 0x1cd   :  { %v461_v42 = vmul.f32 %v2288_v40, %v459_v41 }
 0x1cf   :  { %463 = vrot.lane.b32.xlu1 %v461_v42, %s2569_s7 }
 0x1d0   :  { %v470_v53 = vpop.permute.xlu0 %469 }
 0x241   :  { %v464_v45 = vpop.permute.xlu1 %463 }
 0x242   :  { %v2770_v46 = vadd.f32 %v464_v45, %v456_v44 }
 0x244   :  { %2289 = vtanh.f32 %v2770_v46 }
 0x24e   :  { %v2290_v52 = vpop.eup %2289 }
 0x24f   :  { %v472_v54 = vadd.f32 %v2290_v52, %v470_v53 }
 0x251   :  { %474 = vrot.lane.b32.xlu1 %v472_v54, %s2569_s7 }
 0x255   :  { %558 = vrot.lane.b32.xlu1 %v2770_v46, %s2568_s23 }
 0x2c3   :  { %v475_v56 = vpop.permute.xlu1 %474 }
 0x2c4   :  { %v477_v57 = vmul.f32 %v2288_v40, %v475_v56 }
 0x2c6   :  { %479 = vrot.lane.b32.xlu0 %v477_v57, %s2570_s6 }
 0x2c7   :  { %v559_v58 = vpop.permute.xlu1 %558 }
 0x2c8   :  { %2032 = vmatmul.mubr.msk.f32.vlgmr.msra.gmra.mrb[4].mxu1 %vm117_vm2, %v559_v58 }
 0x2c9   :  { %2202 = vmatpush3.bf16.msra.mxu1 %v2732_v18  ;;  %2053 = vmatprep.mubr.msk.f32.mxu1 %vm2566_vm0, %v2567_v1 }
 0x2ca   :  { %2203 = vmatprep.subr.bf16.mxu1 %v2565_v0 }
 0x2cd   :  { %2205 = vmatpush3.bf16.msra.mxu1 %v2739_v22 }
 0x2ce   :  { %2212 = vmatprep.subr.bf16.mxu1 %v2565_v0 }
 0x338   :  { %v480_v3 = vpop.permute.xlu0 %479 }
 0x339   :  { %482 = vst.msk [vmem:[#allocation16] sm:$0xff] %vm117_vm2, %v480_v3  ;;  %2021 = vmatmul.mubr.msk.f32.vlgmr.msra.gmra.mrb[8].mxu0 %vm117_vm2, %v480_v3 }
 0x33a   :  { %2196 = vmatpush3.bf16.msra.mxu0 %v2716_v8  ;;  %2042 = vmatprep.mubr.msk.f32.mxu0 %vm2566_vm0, %v2567_v1 }
 0x33b   :  { %2197 = vmatprep.subr.bf16.mxu0 %v2565_v0 }
 0x33e   :  { %2199 = vmatpush3.bf16.msra.mxu0 %v2721_v13 }
 0x33f   :  { %2206 = vmatprep.subr.bf16.mxu0 %v2565_v0 }
 0x39b   :  { %v628_v4 = vpop.f32.mrb[4].mxu1 }
 0x39c   :  { %v2033_v5 = vpop.f32.mrb[5].mxu1 }
 0x39d   :  { %v245_v5 = vadd.f32 %v2792_v59, %v2759_v24 }
 0x40c   :  { %v553_v7 = vpop.f32.mrb[8].mxu0 }
 0x40d   :  { %v632_v9 = vadd.f32 %v553_v7, %v235_v6  ;;  %v640_v10 = vadd.f32 %v553_v7, %v2764_v28  ;;  %v2022_v11 = vpop.f32.mrb[9].mxu0 }
 0x40f   :  { %v633_v12 = vadd.f32 %v632_v9, %v628_v4  ;;  %2291 = vtanh.f32 %v640_v10 }
 0x411   :  { %v1865_v15 = vmul.f32 -1.442695, %v633_v12 }
 0x413   :  { %2293 = vpow2.f32 %v1865_v15 }
 0x419   :  { %v2292_v14 = vpop.eup %2291 }
 0x41a   :  { %644 = vrot.lane.b32.xlu0 %v2292_v14, %s2569_s7 }
 0x41d   :  { %v2294_v16 = vpop.eup %2293 }
 0x41e   :  { %655 = vrot.lane.b32.xlu0 %v235_v6, %s2570_s6  ;;  %v637_v17 = vadd.f32 1.0, %v2294_v16 }
 0x420   :  { %2295 = vrcp.f32 %v637_v17 }
 0x42a   :  { %v2296_v19 = vpop.eup %2295 }
 0x42b   :  { %v642_v23 = vmul.f32 %v2296_v19, %v2770_v46 }
 0x48c   :  { %v645_v20 = vpop.permute.xlu0 %644 }
 0x48d   :  { %v647_v21 = vmul.f32 %v2296_v19, %v645_v20 }
 0x48f   :  { %649 = vrot.lane.b32.xlu1 %v647_v21, %s2569_s7 }
 0x490   :  { %v656_v29 = vpop.permute.xlu0 %655 }
 0x501   :  { %v650_v25 = vpop.permute.xlu1 %649 }
 0x502   :  { %v652_v26 = vadd.f32 %v650_v25, %v642_v23 }
 0x504   :  { %2297 = vtanh.f32 %v652_v26 }
 0x50e   :  { %v2298_v27 = vpop.eup %2297 }
 0x50f   :  { %v658_v30 = vadd.f32 %v2298_v27, %v656_v29 }
 0x511   :  { %660 = vrot.lane.b32.xlu1 %v658_v30, %s2569_s7 }
 0x515   :  { %745 = vrot.lane.b32.xlu1 %v652_v26, %s2568_s23 }
 0x583   :  { %v661_v31 = vpop.permute.xlu1 %660 }
 0x584   :  { %v663_v32 = vmul.f32 %v2296_v19, %v661_v31 }
 0x586   :  { %665 = vrot.lane.b32.xlu0 %v663_v32, %s2570_s6 }
 0x587   :  { %v746_v33 = vpop.permute.xlu1 %745 }
 0x588   :  { %2054 = vmatmul.mubr.msk.f32.vlgmr.msra.gmra.mrb[6].mxu1 %vm117_vm2, %v746_v33 }
 0x589   :  { %2214 = vmatpush3.bf16.msra.mxu1 %v2732_v18  ;;  %2075 = vmatprep.mubr.msk.f32.mxu1 %vm2566_vm0, %v2567_v1 }
 0x58a   :  { %2215 = vmatprep.subr.bf16.mxu1 %v2565_v0 }
 0x58d   :  { %2217 = vmatpush3.bf16.msra.mxu1 %v2739_v22 }
 0x58e   :  { %2224 = vmatprep.subr.bf16.mxu1 %v2565_v0 }
 0x5f8   :  { %v666_v34 = vpop.permute.xlu0 %665 }
 0x5f9   :  { %669 = vst.msk [vmem:[#allocation16 + $0x8] sm:$0xff] %vm117_vm2, %v666_v34  ;;  %2043 = vmatmul.mubr.msk.f32.vlgmr.msra.gmra.mrb[10].mxu0 %vm117_vm2, %v666_v34 }
 0x5fa   :  { %2208 = vmatpush3.bf16.msra.mxu0 %v2716_v8  ;;  %2064 = vmatprep.mubr.msk.f32.mxu0 %vm2566_vm0, %v2567_v1 }
 0x5fb   :  { %2209 = vmatprep.subr.bf16.mxu0 %v2565_v0 }
 0x5fe   :  { %2211 = vmatpush3.bf16.msra.mxu0 %v2721_v13 }
 0x5ff   :  { %2218 = vmatprep.subr.bf16.mxu0 %v2565_v0 }
 0x65b   :  { %v815_v35 = vpop.f32.mrb[6].mxu1 }
 0x65c   :  { %v2055_v36 = vpop.f32.mrb[7].mxu1 }
 0x6cc   :  { %v740_v38 = vpop.f32.mrb[10].mxu0 }
 0x6cd   :  { %v819_v39 = vadd.f32 %v740_v38, %v240_v37  ;;  %v827_v40 = vadd.f32 %v740_v38, %v2764_v28  ;;  %v2044_v41 = vpop.f32.mrb[11].mxu0 }
 0x6cf   :  { %v820_v42 = vadd.f32 %v819_v39, %v815_v35  ;;  %2299 = vtanh.f32 %v827_v40  ;;  %v250_v35 = vadd.f32 %v2759_v24, %v2798_v62 }
 0x6d1   :  { %v1868_v44 = vmul.f32 -1.442695, %v820_v42 }
 0x6d3   :  { %2301 = vpow2.f32 %v1868_v44 }
 0x6d9   :  { %v2300_v43 = vpop.eup %2299 }
 0x6da   :  { %831 = vrot.lane.b32.xlu0 %v2300_v43, %s2569_s7 }
 0x6dd   :  { %v2302_v45 = vpop.eup %2301 }
 0x6de   :  { %842 = vrot.lane.b32.xlu0 %v240_v37, %s2570_s6  ;;  %v824_v46 = vadd.f32 1.0, %v2302_v45 }
 0x6e0   :  { %2303 = vrcp.f32 %v824_v46 }
 0x6ea   :  { %v2304_v47 = vpop.eup %2303 }
 0x6eb   :  { %v829_v50 = vmul.f32 %v2304_v47, %v652_v26 }
 0x74c   :  { %v832_v48 = vpop.permute.xlu0 %831 }
 0x74d   :  { %v834_v49 = vmul.f32 %v2304_v47, %v832_v48 }
 0x74f   :  { %836 = vrot.lane.b32.xlu1 %v834_v49, %s2569_s7 }
 0x750   :  { %v843_v54 = vpop.permute.xlu0 %842 }
 0x7c1   :  { %v837_v51 = vpop.permute.xlu1 %836 }
 0x7c2   :  { %v839_v52 = vadd.f32 %v837_v51, %v829_v50 }
 0x7c4   :  { %2305 = vtanh.f32 %v839_v52 }
 0x7ce   :  { %v2306_v53 = vpop.eup %2305 }
 0x7cf   :  { %v845_v55 = vadd.f32 %v2306_v53, %v843_v54 }
 0x7d1   :  { %847 = vrot.lane.b32.xlu1 %v845_v55, %s2569_s7 }
 0x7d5   :  { %932 = vrot.lane.b32.xlu1 %v839_v52, %s2568_s23 }
 0x843   :  { %v848_v56 = vpop.permute.xlu1 %847 }
 0x844   :  { %v850_v57 = vmul.f32 %v2304_v47, %v848_v56 }
 0x846   :  { %852 = vrot.lane.b32.xlu0 %v850_v57, %s2570_s6 }
 0x847   :  { %v933_v58 = vpop.permute.xlu1 %932 }
 0x848   :  { %2076 = vmatmul.mubr.msk.f32.vlgmr.msra.gmra.mrb[8].mxu1 %vm117_vm2, %v933_v58 }
 0x849   :  { %2226 = vmatpush3.bf16.msra.mxu1 %v2732_v18  ;;  %2097 = vmatprep.mubr.msk.f32.mxu1 %vm2566_vm0, %v2567_v1 }
 0x84a   :  { %2227 = vmatprep.subr.bf16.mxu1 %v2565_v0 }
 0x84d   :  { %2229 = vmatpush3.bf16.msra.mxu1 %v2739_v22 }
 0x84e   :  { %2236 = vmatprep.subr.bf16.mxu1 %v2565_v0 }
 0x8b8   :  { %v853_v60 = vpop.permute.xlu0 %852 }
 0x8b9   :  { %856 = vst.msk [vmem:[#allocation16 + $0x10] sm:$0xff] %vm117_vm2, %v853_v60  ;;  %2065 = vmatmul.mubr.msk.f32.vlgmr.msra.gmra.mrb[12].mxu0 %vm117_vm2, %v853_v60  ;;  %v255_v60 = vadd.f32 %v2796_v61, %v2759_v24 }
 0x8ba   :  { %2220 = vmatpush3.bf16.msra.mxu0 %v2716_v8  ;;  %2086 = vmatprep.mubr.msk.f32.mxu0 %vm2566_vm0, %v2567_v1 }
 0x8bb   :  { %2221 = vmatprep.subr.bf16.mxu0 %v2565_v0 }
 0x8be   :  { %2223 = vmatpush3.bf16.msra.mxu0 %v2721_v13 }
 0x8bf   :  { %2230 = vmatprep.subr.bf16.mxu0 %v2565_v0 }
 0x91b   :  { %v1002_v3 = vpop.f32.mrb[8].mxu1 }
 0x91c   :  { %v2077_v4 = vpop.f32.mrb[9].mxu1 }
 0x98c   :  { %v927_v6 = vpop.f32.mrb[12].mxu0 }
 0x98d   :  { %v1006_v7 = vadd.f32 %v927_v6, %v245_v5  ;;  %v1014_v9 = vadd.f32 %v927_v6, %v2764_v28  ;;  %v2066_v10 = vpop.f32.mrb[13].mxu0 }
 0x98f   :  { %v1007_v11 = vadd.f32 %v1006_v7, %v1002_v3  ;;  %2307 = vtanh.f32 %v1014_v9 }
 0x991   :  { %v1871_v14 = vmul.f32 -1.442695, %v1007_v11 }
 0x993   :  { %2309 = vpow2.f32 %v1871_v14 }
 0x999   :  { %v2308_v12 = vpop.eup %2307 }
 0x99a   :  { %1018 = vrot.lane.b32.xlu0 %v2308_v12, %s2569_s7 }
 0x99d   :  { %v2310_v15 = vpop.eup %2309 }
 0x99e   :  { %1029 = vrot.lane.b32.xlu0 %v245_v5, %s2570_s6  ;;  %v1011_v16 = vadd.f32 1.0, %v2310_v15 }
 0x9a0   :  { %2311 = vrcp.f32 %v1011_v16 }
 0x9aa   :  { %v2312_v17 = vpop.eup %2311 }
 0x9ab   :  { %v1016_v20 = vmul.f32 %v2312_v17, %v839_v52 }
 0xa0c   :  { %v1019_v19 = vpop.permute.xlu0 %1018 }
 0xa0d   :  { %v1021_v59 = vmul.f32 %v2312_v17, %v1019_v19 }
 0xa0f   :  { %1023 = vrot.lane.b32.xlu1 %v1021_v59, %s2569_s7 }
 0xa10   :  { %v1030_v26 = vpop.permute.xlu0 %1029 }
 0xa81   :  { %v1024_v21 = vpop.permute.xlu1 %1023 }
 0xa82   :  { %v1026_v23 = vadd.f32 %v1024_v21, %v1016_v20 }
 0xa84   :  { %2313 = vtanh.f32 %v1026_v23 }
 0xa8e   :  { %v2314_v25 = vpop.eup %2313 }
 0xa8f   :  { %v1032_v27 = vadd.f32 %v2314_v25, %v1030_v26 }
 0xa91   :  { %1034 = vrot.lane.b32.xlu1 %v1032_v27, %s2569_s7 }
 0xa95   :  { %1119 = vrot.lane.b32.xlu1 %v1026_v23, %s2568_s23 }
 0xb03   :  { %v1035_v29 = vpop.permute.xlu1 %1034 }
 0xb04   :  { %v1037_v30 = vmul.f32 %v2312_v17, %v1035_v29 }
 0xb06   :  { %1039 = vrot.lane.b32.xlu0 %v1037_v30, %s2570_s6  ;;  %v260_v30 = vadd.f32 %v2759_v24, %v2802_v2 }
 0xb07   :  { %v1120_v31 = vpop.permute.xlu1 %1119 }
 0xb08   :  { %2098 = vmatmul.mubr.msk.f32.vlgmr.msra.gmra.mrb[10].mxu1 %vm117_vm2, %v1120_v31 }
 0xb09   :  { %2238 = vmatpush3.bf16.msra.mxu1 %v2732_v18  ;;  %2119 = vmatprep.mubr.msk.f32.mxu1 %vm2566_vm0, %v2567_v1 }
 0xb0a   :  { %2239 = vmatprep.subr.bf16.mxu1 %v2565_v0 }
 0xb0d   :  { %2241 = vmatpush3.bf16.msra.mxu1 %v2739_v22 }
 0xb0e   :  { %2248 = vmatprep.subr.bf16.mxu1 %v2565_v0 }
 0xb78   :  { %v1040_v32 = vpop.permute.xlu0 %1039 }
 0xb79   :  { %1043 = vst.msk [vmem:[#allocation16 + $0x18] sm:$0xff] %vm117_vm2, %v1040_v32  ;;  %2087 = vmatmul.mubr.msk.f32.vlgmr.msra.gmra.mrb[14].mxu0 %vm117_vm2, %v1040_v32 }
 0xb7a   :  { %2232 = vmatpush3.bf16.msra.mxu0 %v2716_v8  ;;  %2108 = vmatprep.mubr.msk.f32.mxu0 %vm2566_vm0, %v2567_v1 }
 0xb7b   :  { %2233 = vmatprep.subr.bf16.mxu0 %v2565_v0 }
 0xb7e   :  { %2235 = vmatpush3.bf16.msra.mxu0 %v2721_v13 }
 0xb7f   :  { %2242 = vmatprep.subr.bf16.mxu0 %v2565_v0 }
 0xbdb   :  { %v1189_v33 = vpop.f32.mrb[10].mxu1 }
 0xbdc   :  { %v2099_v34 = vpop.f32.mrb[11].mxu1 }
 0xc4c   :  { %v1114_v36 = vpop.f32.mrb[14].mxu0 }
 0xc4d   :  { %v1193_v37 = vadd.f32 %v1114_v36, %v250_v35  ;;  %v1201_v38 = vadd.f32 %v1114_v36, %v2764_v28  ;;  %v2088_v39 = vpop.f32.mrb[15].mxu0 }
 0xc4f   :  { %v1194_v40 = vadd.f32 %v1193_v37, %v1189_v33  ;;  %2315 = vtanh.f32 %v1201_v38 }
 0xc51   :  { %v1874_v42 = vmul.f32 -1.442695, %v1194_v40 }
 0xc53   :  { %2317 = vpow2.f32 %v1874_v42 }
 0xc59   :  { %v2316_v41 = vpop.eup %2315 }
 0xc5a   :  { %1205 = vrot.lane.b32.xlu0 %v2316_v41, %s2569_s7 }
 0xc5d   :  { %v2318_v43 = vpop.eup %2317 }
 0xc5e   :  { %1216 = vrot.lane.b32.xlu0 %v250_v35, %s2570_s6  ;;  %v1198_v44 = vadd.f32 1.0, %v2318_v43 }
 0xc60   :  { %2319 = vrcp.f32 %v1198_v44 }
 0xc6a   :  { %v2320_v45 = vpop.eup %2319 }
 0xc6b   :  { %v1203_v47 = vmul.f32 %v2320_v45, %v1026_v23 }
 0xccc   :  { %v1206_v46 = vpop.permute.xlu0 %1205 }
 0xccd   :  { %v1208_v62 = vmul.f32 %v2320_v45, %v1206_v46 }
 0xccf   :  { %1210 = vrot.lane.b32.xlu1 %v1208_v62, %s2569_s7 }
 0xcd0   :  { %v1217_v51 = vpop.permute.xlu0 %1216 }
 0xd41   :  { %v1211_v48 = vpop.permute.xlu1 %1210 }
 0xd42   :  { %v1213_v49 = vadd.f32 %v1211_v48, %v1203_v47  ;;  %v265_v48 = vadd.f32 %v2800_v63, %v2759_v24 }
 0xd44   :  { %2321 = vtanh.f32 %v1213_v49 }
 0xd4e   :  { %v2322_v50 = vpop.eup %2321 }
 0xd4f   :  { %v1219_v52 = vadd.f32 %v2322_v50, %v1217_v51 }
 0xd51   :  { %1221 = vrot.lane.b32.xlu1 %v1219_v52, %s2569_s7 }
 0xd55   :  { %1306 = vrot.lane.b32.xlu1 %v1213_v49, %s2568_s23 }
 0xdc3   :  { %v1222_v53 = vpop.permute.xlu1 %1221 }
 0xdc4   :  { %v1224_v54 = vmul.f32 %v2320_v45, %v1222_v53 }
 0xdc6   :  { %1226 = vrot.lane.b32.xlu0 %v1224_v54, %s2570_s6 }
 0xdc7   :  { %v1307_v55 = vpop.permute.xlu1 %1306 }
 0xdc8   :  { %2120 = vmatmul.mubr.msk.f32.vlgmr.msra.gmra.mrb[12].mxu1 %vm117_vm2, %v1307_v55 }
 0xdc9   :  { %2250 = vmatpush3.bf16.msra.mxu1 %v2732_v18  ;;  %2141 = vmatprep.mubr.msk.f32.mxu1 %vm2566_vm0, %v2567_v1 }
 0xdca   :  { %2251 = vmatprep.subr.bf16.mxu1 %v2565_v0 }
 0xdcd   :  { %2253 = vmatpush3.bf16.msra.mxu1 %v2739_v22 }
 0xdce   :  { %2260 = vmatprep.subr.bf16.mxu1 %v2565_v0 }
 0xe38   :  { %v1227_v56 = vpop.permute.xlu0 %1226 }
 0xe39   :  { %1230 = vst.msk [vmem:[#allocation16 + $0x20] sm:$0xff] %vm117_vm2, %v1227_v56  ;;  %2109 = vmatmul.mubr.msk.f32.vlgmr.msra.gmra.mrb[16].mxu0 %vm117_vm2, %v1227_v56 }
 0xe3a   :  { %2244 = vmatpush3.bf16.msra.mxu0 %v2716_v8  ;;  %2130 = vmatprep.mubr.msk.f32.mxu0 %vm2566_vm0, %v2567_v1 }
 0xe3b   :  { %2245 = vmatprep.subr.bf16.mxu0 %v2565_v0 }
 0xe3e   :  { %2247 = vmatpush3.bf16.msra.mxu0 %v2721_v13 }
 0xe3f   :  { %2254 = vmatprep.subr.bf16.mxu0 %v2565_v0 }
 0xe9b   :  { %v1376_v57 = vpop.f32.mrb[12].mxu1 }
 0xe9c   :  { %v2121_v58 = vpop.f32.mrb[13].mxu1 }
 0xf0c   :  { %v1301_v3 = vpop.f32.mrb[16].mxu0 }
 0xf0d   :  { %v1380_v4 = vadd.f32 %v1301_v3, %v255_v60  ;;  %v1388_v5 = vadd.f32 %v1301_v3, %v2764_v28  ;;  %v2110_v6 = vpop.f32.mrb[17].mxu0 }
 0xf0f   :  { %v1381_v7 = vadd.f32 %v1380_v4, %v1376_v57  ;;  %2323 = vtanh.f32 %v1388_v5 }
 0xf11   :  { %v1877_v10 = vmul.f32 -1.442695, %v1381_v7 }
 0xf13   :  { %2325 = vpow2.f32 %v1877_v10 }
 0xf19   :  { %v2324_v9 = vpop.eup %2323 }
 0xf1a   :  { %1392 = vrot.lane.b32.xlu0 %v2324_v9, %s2569_s7 }
 0xf1d   :  { %v2326_v11 = vpop.eup %2325 }
 0xf1e   :  { %1403 = vrot.lane.b32.xlu0 %v255_v60, %s2570_s6  ;;  %v1385_v12 = vadd.f32 1.0, %v2326_v11 }
 0xf20   :  { %2327 = vrcp.f32 %v1385_v12 }
 0xf2a   :  { %v2328_v14 = vpop.eup %2327 }
 0xf2b   :  { %v1390_v16 = vmul.f32 %v2328_v14, %v1213_v49 }
 0xf8c   :  { %v1393_v15 = vpop.permute.xlu0 %1392 }
 0xf8d   :  { %v1395_v61 = vmul.f32 %v2328_v14, %v1393_v15 }
 0xf8f   :  { %1397 = vrot.lane.b32.xlu1 %v1395_v61, %s2569_s7 }
 0xf90   :  { %v1404_v20 = vpop.permute.xlu0 %1403 }
0x1001   :  { %v1398_v17 = vpop.permute.xlu1 %1397 }
0x1002   :  { %v1400_v19 = vadd.f32 %v1398_v17, %v1390_v16 }
0x1004   :  { %2329 = vtanh.f32 %v1400_v19 }
0x100e   :  { %v2330_v59 = vpop.eup %2329 }
0x100f   :  { %v1406_v21 = vadd.f32 %v2330_v59, %v1404_v20 }
0x1011   :  { %1408 = vrot.lane.b32.xlu1 %v1406_v21, %s2569_s7 }
0x1015   :  { %1493 = vrot.lane.b32.xlu1 %v1400_v19, %s2568_s23 }
0x1083   :  { %v1409_v23 = vpop.permute.xlu1 %1408 }
0x1084   :  { %v1411_v25 = vmul.f32 %v2328_v14, %v1409_v23 }
0x1086   :  { %1413 = vrot.lane.b32.xlu0 %v1411_v25, %s2570_s6 }
0x1087   :  { %v1494_v26 = vpop.permute.xlu1 %1493 }
0x1088   :  { %2142 = vmatmul.mubr.msk.f32.vlgmr.msra.gmra.mrb[14].mxu1 %vm117_vm2, %v1494_v26 }
0x1089   :  { %2262 = vmatpush3.bf16.msra.mxu1 %v2732_v18  ;;  %2163 = vmatprep.mubr.msk.f32.mxu1 %vm2566_vm0, %v2567_v1 }
0x108a   :  { %2263 = vmatprep.subr.bf16.mxu1 %v2565_v0 }
0x108d   :  { %2265 = vmatpush3.bf16.msra.mxu1 %v2739_v22 }
0x10f8   :  { %v1414_v27 = vpop.permute.xlu0 %1413 }
0x10f9   :  { %1417 = vst.msk [vmem:[#allocation16 + $0x28] sm:$0xff] %vm117_vm2, %v1414_v27  ;;  %2131 = vmatmul.mubr.msk.f32.vlgmr.msra.gmra.mrb[18].mxu0 %vm117_vm2, %v1414_v27 }
0x10fa   :  { %2256 = vmatpush3.bf16.msra.mxu0 %v2716_v8  ;;  %2152 = vmatprep.mubr.msk.f32.mxu0 %vm2566_vm0, %v2567_v1 }
0x10fb   :  { %2257 = vmatprep.subr.bf16.mxu0 %v2565_v0 }
0x10fe   :  { %2259 = vmatpush3.bf16.msra.mxu0 %v2721_v13 }
0x115b   :  { %v1563_v18 = vpop.f32.mrb[14].mxu1 }
0x115c   :  { %v2143_v29 = vpop.f32.mrb[15].mxu1 }
0x11cc   :  { %v1488_v22 = vpop.f32.mrb[18].mxu0 }
0x11cd   :  { %v1567_v31 = vadd.f32 %v1488_v22, %v260_v30  ;;  %v1575_v32 = vadd.f32 %v1488_v22, %v2764_v28  ;;  %v2132_v33 = vpop.f32.mrb[19].mxu0 }
0x11cf   :  { %v1568_v34 = vadd.f32 %v1567_v31, %v1563_v18  ;;  %2331 = vtanh.f32 %v1575_v32 }
0x11d1   :  { %v1880_v0 = vmul.f32 -1.442695, %v1568_v34 }
0x11d3   :  { %2333 = vpow2.f32 %v1880_v0 }
0x11d9   :  { %v2332_v8 = vpop.eup %2331 }
0x11da   :  { %1579 = vrot.lane.b32.xlu0 %v2332_v8, %s2569_s7 }
0x11dd   :  { %v2334_v1 = vpop.eup %2333 }
0x11de   :  { %1590 = vrot.lane.b32.xlu0 %v260_v30, %s2570_s6  ;;  %v1572_v13 = vadd.f32 1.0, %v2334_v1 }
0x11e0   :  { %2335 = vrcp.f32 %v1572_v13 }
0x11ea   :  { %v2336_v35 = vpop.eup %2335 }
0x11eb   :  { %v1577_v37 = vmul.f32 %v2336_v35, %v1400_v19 }
0x124c   :  { %v1580_v36 = vpop.permute.xlu0 %1579 }
0x124d   :  { %v1582_v2 = vmul.f32 %v2336_v35, %v1580_v36 }
0x124f   :  { %1584 = vrot.lane.b32.xlu1 %v1582_v2, %s2569_s7 }
0x1250   :  { %v1591_v41 = vpop.permute.xlu0 %1590 }
0x12c1   :  { %v1585_v38 = vpop.permute.xlu1 %1584 }
0x12c2   :  { %v1587_v39 = vadd.f32 %v1585_v38, %v1577_v37 }
0x12c4   :  { %2337 = vtanh.f32 %v1587_v39 }
0x12ce   :  { %v2338_v40 = vpop.eup %2337 }
0x12cf   :  { %v1593_v42 = vadd.f32 %v2338_v40, %v1591_v41 }
0x12d1   :  { %1595 = vrot.lane.b32.xlu1 %v1593_v42, %s2569_s7 }
0x12d5   :  { %1680 = vrot.lane.b32.xlu1 %v1587_v39, %s2568_s23 }
0x1343   :  { %v1596_v43 = vpop.permute.xlu1 %1595 }
0x1344   :  { %v1598_v44 = vmul.f32 %v2336_v35, %v1596_v43 }
0x1346   :  { %1600 = vrot.lane.b32.xlu0 %v1598_v44, %s2570_s6 }
0x1347   :  { %v1681_v45 = vpop.permute.xlu1 %1680 }
0x1348   :  { %2164 = vmatmul.mubr.msk.f32.vlgmr.msra.gmra.mrb[16].mxu1 %vm117_vm2, %v1681_v45 }
0x13b8   :  { %v1601_v46 = vpop.permute.xlu0 %1600 }
0x13b9   :  { %1604 = vst.msk [vmem:[#allocation16 + $0x30] sm:$0xff] %vm117_vm2, %v1601_v46  ;;  %2153 = vmatmul.mubr.msk.f32.vlgmr.msra.gmra.mrb[20].mxu0 %vm117_vm2, %v1601_v46 }
0x141b   :  { %v1750_v62 = vpop.f32.mrb[16].mxu1 }
0x141c   :  { %v2165_v47 = vpop.f32.mrb[17].mxu1 }
0x148c   :  { %v1675_v49 = vpop.f32.mrb[20].mxu0 }
0x148d   :  { %v1754_v50 = vadd.f32 %v1675_v49, %v265_v48  ;;  %v1762_v51 = vadd.f32 %v1675_v49, %v2764_v28  ;;  %v2154_v52 = vpop.f32.mrb[21].mxu0 }
0x148f   :  { %v1755_v53 = vadd.f32 %v1754_v50, %v1750_v62  ;;  %2339 = vtanh.f32 %v1762_v51 }
0x1491   :  { %v1883_v55 = vmul.f32 -1.442695, %v1755_v53 }
0x1493   :  { %2341 = vpow2.f32 %v1883_v55 }
0x1499   :  { %v2340_v54 = vpop.eup %2339 }
0x149a   :  { %1766 = vrot.lane.b32.xlu0 %v2340_v54, %s2569_s7 }
0x149d   :  { %v2342_v56 = vpop.eup %2341 }
0x149e   :  { %1777 = vrot.lane.b32.xlu0 %v265_v48, %s2570_s6  ;;  %v1759_v57 = vadd.f32 1.0, %v2342_v56 }
0x14a0   :  { %2343 = vrcp.f32 %v1759_v57 }
0x14aa   :  { %v2344_v58 = vpop.eup %2343 }
0x14ab   :  { %v1764_v63 = vmul.f32 %v2344_v58, %v1587_v39 }
0x150c   :  { %v1767_v60 = vpop.permute.xlu0 %1766 }
0x150d   :  { %v1769_v24 = vmul.f32 %v2344_v58, %v1767_v60 }
0x150f   :  { %1771 = vrot.lane.b32.xlu1 %v1769_v24, %s2569_s7 }
0x1510   :  { %v1778_v5 = vpop.permute.xlu0 %1777 }
0x1581   :  { %v1772_v28 = vpop.permute.xlu1 %1771 }
0x1582   :  { %v1774_v3 = vadd.f32 %v1772_v28, %v1764_v63 }
0x1584   :  { %2345 = vtanh.f32 %v1774_v3 }
0x158e   :  { %v2346_v4 = vpop.eup %2345 }
0x158f   :  { %v1780_v6 = vadd.f32 %v2346_v4, %v1778_v5 }
0x1591   :  { %1782 = vrot.lane.b32.xlu1 %v1780_v6, %s2569_s7 }
0x1595   :  { %1794 = vrot.lane.b32.xlu1 %v1774_v3, %s2568_s23 }
0x1603   :  { %v1783_v7 = vpop.permute.xlu1 %1782 }
0x1604   :  { %v1785_v9 = vmul.f32 %v2344_v58, %v1783_v7 }
0x1606   :  { %1787 = vrot.lane.b32.xlu0 %v1785_v9, %s2570_s6 }
0x1607   :  { %v1795_v10 = vpop.permute.xlu1 %1794 }
0x1608   :  { %1797 = vst.msk [vmem:[#allocation3] sm:$0xff] %vm117_vm2, %v1795_v10  ;;  %1802 = vst.msk [vmem:[#allocation19] sm:$0xff] %vm117_vm2, %v1795_v10 }
0x1678   :  { %v1788_v11 = vpop.permute.xlu0 %1787 }
0x1679   :  { %1791 = vst.msk [vmem:[#allocation16 + $0x38] sm:$0xff] %vm117_vm2, %v1788_v11  ;;  %1792 = vst.msk [vmem:[#allocation2] sm:$0xff] %vm117_vm2, %v1788_v11 }
0x167a   :  { %1801 = vst.msk [vmem:[#allocation17] sm:$0xff] %vm117_vm2, %v1788_v11 }
0x167b   :  { %2490 = shalt.err (!%p2487_p10)
}
0x167c   :  { %s2491_s16 = scalar_lea.hbm %s3019_s9, 128 }
0x167d   :  { %p2492_p11 = scmp.ne.s32.totalorder %s3019_s9, %s2491_s16  ;;  %p2495_p12 = scmp.lt.u32.totalorder %s2491_s16, %s3019_s9 }
0x167f   :  { %p2497_p13 = pnand %p2495_p12, %p2492_p11 }
0x1681   :  { %2500 = shalt.err (!%p2497_p13)
}
0x1682   :  { %1824 = dma.vmem_to_hbm [thread:$0]  %s1822_s29, 128, %s3019_s9, [#allocation18]  }
0x1683   :  { %s2501_s28 = scalar_lea.vmem %s2954_s26, 1024  ;;  %p2506_p1 = scmp.lt.s32.totalorder %s2954_s26, %s2954_s26 }
0x1684   :  { %p2502_p0 = scmp.ne.s32.totalorder %s2954_s26, %s2501_s28  ;;  %p2507_p2 = scmp.lt.s32.totalorder %s2501_s28, %s2501_s28 }
0x1686   :  { %p2508_p3 = por %p2507_p2, %p2506_p1 }
0x1688   :  { %p2509_p4 = pnand %p2508_p3, %p2502_p0 }
0x168a   :  { %2512 = shalt.err (!%p2509_p4)
}
0x168b   :  { %s2513_s5 = scalar_lea.hbm %s3018_s8, 1024 }
0x168c   :  { %p2514_p5 = scmp.ne.s32.totalorder %s3018_s8, %s2513_s5  ;;  %p2517_p6 = scmp.lt.u32.totalorder %s2513_s5, %s3018_s8 }
0x168e   :  { %p2519_p7 = pnand %p2517_p6, %p2514_p5 }
0x1690   :  { %2522 = shalt.err (!%p2519_p7)
}
0x1691   :  { %1814 = dma.vmem_to_hbm [thread:$0]  %s2954_s26, 1024, %s3018_s8, [#allocation7], %s2560_s14, %s2560_s14, %s2561_s17  }
0x1692   :  { %s2523_s6 = scalar_lea.vmem %s2959_s2, 128  ;;  %p2528_p9 = scmp.lt.s32.totalorder %s2959_s2, %s2959_s2 }
0x1693   :  { %p2524_p8 = scmp.ne.s32.totalorder %s2959_s2, %s2523_s6  ;;  %p2529_p10 = scmp.lt.s32.totalorder %s2523_s6, %s2523_s6 }
0x1695   :  { %p2530_p11 = por %p2529_p10, %p2528_p9 }
0x1697   :  { %p2531_p12 = pnand %p2530_p11, %p2524_p8 }
0x1699   :  { %2534 = shalt.err (!%p2531_p12)
}
0x169a   :  { %s2535_s3 = scalar_lea.hbm %s3020_s10, 128 }
0x169b   :  { %p2536_p13 = scmp.ne.s32.totalorder %s3020_s10, %s2535_s3  ;;  %p2539_p0 = scmp.lt.u32.totalorder %s2535_s3, %s3020_s10 }
0x169d   :  { %p2541_p1 = pnand %p2539_p0, %p2536_p13 }
0x169f   :  { %2544 = shalt.err (!%p2541_p1)
}
0x16a0   :  { %1834 = dma.vmem_to_hbm [thread:$0]  %s2959_s2, 128, %s3020_s10, [#allocation18]  }
0x16a1   :  { %2553 = dma.done.wait [#allocation7], 1024  }
0x16a2   :  { %2554 = vsyncadd [#allocation7], 4294966272 }
0x16a3   :  { %2555 = dma.done.wait [#allocation18], 256  }
0x16a4   :  { %2556 = vsyncadd [#allocation18], 4294967040 }
0x16a5   :  { %1844 = vsyncpa [#allocation6], 1 }
0x16a6   :  { %1845 = vsyncpa [#allocation9], 1 }
0x16a7   :  { %1846 = vsyncpa [#allocation12], 1 }
0x16a8   :  { %1847 = vsyncpa [#allocation15], 1 }
0x16a9   :  { %1848 = vsyncpa [#allocation7], 1 }
0x16aa   :  { %1849 = vsyncpa [#allocation18], 1 }

</bundles_post_ra>
